<compile_context>
chip_gen: v7x
topology: tpu7x:2x2x1
jax: 0.10.0
libtpu: 0.0.40
codegen_flags: <defaults>
</compile_context>

<pallas_src>
import functools

import jax
import jax.numpy as jnp
from jax.experimental import pallas as pl
from jax.experimental.pallas import tpu as pltpu


# ----------------------------------------------------------------------------
# Kernel: one batch element per grid step.
# Layouts (per step): conv activations (T_l, S*C_l) with lane = s*C_l + c.
# ----------------------------------------------------------------------------
def _base_encoder_kernel(
        x_e_ref, x_o_ref,                         # (T0e, S*Cin), (T0o, S*Cin) bf16
        w1_ref, b1_ref, w2_ref, b2_ref,           # block-diag conv weights (bf16),
        w3_ref, b3_ref, w4_ref, b4_ref,           # biases (1, S*Co) f32
        wqkv_ref,                                 # (F, 2Q+F) bf16  [Wq^T|Wk^T|Wv^T]
        wfc_ref,                                  # (Td*F, N) bf16  (pre-permuted)
        bfc_ref,                                  # (1, N) f32
        gamma_ref,                                # (1, 1) f32 in SMEM
        o_ref,                                    # (S, N) f32
        a1_ref, a2_ref, a3_ref,                   # f32 VMEM conv activations
        *, fs, activation, S, F, Q, Td, T1, T2, T3):
    f32 = jnp.float32
    bf16 = jnp.bfloat16

    def conv_from_taps(taps, w_ref, b_ref):
        acc = jnp.dot(taps[0], w_ref[0], preferred_element_type=f32)
        for k in range(1, fs):                    # fs is tiny & static
            acc = acc + jnp.dot(taps[k], w_ref[k], preferred_element_type=f32)
        acc = acc + b_ref[...]
        return jnp.maximum(acc, 0.0) if activation == "ReLU" else jnp.tanh(acc)

    # -------- PART 1: channel-wise conv stack (block-diag over S only) --------
    # Layer 1: contiguous tap reads from the even/odd pre-split input.
    taps1 = [(x_e_ref if k % 2 == 0 else x_o_ref)[pl.ds(k // 2, T1), :]
             for k in range(fs)]
    a1_ref[...] = conv_from_taps(taps1, w1_ref, b1_ref)

    # TODO(synk): deinterleave a1/a2/a3 into even/odd halves so these stride-2
    # reads become contiguous (only pays off for larger fs / T).
    def strided_taps(src_ref, t_out):
        return [src_ref[pl.ds(k, t_out, stride=2), :].astype(bf16)
                for k in range(fs)]

    a2_ref[...] = conv_from_taps(strided_taps(a1_ref, T2), w2_ref, b2_ref)
    a3_ref[...] = conv_from_taps(strided_taps(a2_ref, T3), w3_ref, b3_ref)
    a4 = conv_from_taps(strided_taps(a3_ref, Td), w4_ref, b4_ref)   # (Td, S*F) f32

    # ------- PART 2: cross-channel self-attention, batched over timesteps -----
    # (Td, S*F) lane layout -> (Td, S, F) via S static lane slices (all values,
    # no masked single-row VMEM stores).
    x3 = jnp.stack([a4[:, s * F:(s + 1) * F] for s in range(S)], axis=1)
    # Single batched QKV projection for all (t, s) pairs: one MXU dot.
    fgh = jnp.dot(x3.reshape(Td * S, F).astype(bf16), wqkv_ref[...],
                  preferred_element_type=f32).reshape(Td, S, 2 * Q + F)
    fq = fgh[:, :, 0:Q]            # query  (Td, S, Q)
    gk = fgh[:, :, Q:2 * Q]        # key    (Td, S, Q)
    hv = fgh[:, :, 2 * Q:]         # value  (Td, S, F)
    # Tiny SxSxQ contraction on the VPU (broadcast-mul + sum), batched over t.
    st = jnp.sum(gk[:, :, None, :] * fq[:, None, :, :], axis=-1)    # (Td, S, S)
    st = st - jnp.max(st, axis=-1, keepdims=True)
    p = jnp.exp(st)
    beta = p * pl.reciprocal(jnp.sum(p, axis=-1, keepdims=True), approx=True)
    attn = jnp.sum(beta[:, :, :, None] * hv[:, None, :, :], axis=2)  # (Td, S, F)
    out3 = gamma_ref[0, 0] * attn + x3                               # (Td, S, F)

    # --------- PART 3: cross-channel fusion (one lane-dense matmul) -----------
    z = jnp.concatenate([out3[t] for t in range(Td)], axis=1)        # (S, Td*F)
    o_ref[...] = (jnp.dot(z.astype(bf16), wfc_ref[...],
                          preferred_element_type=f32) + bfc_ref[...])


# ----------------------------------------------------------------------------
# One-time weight preparation (== model-init work, NOT per forward call).
# ----------------------------------------------------------------------------
def prepare_params(params, num_sensor_channels):
    S = num_sensor_channels
    convs = params["convs"]
    eye_s = jnp.eye(S, dtype=jnp.float32)
    conv_w, conv_b = [], []
    for (w, b) in convs:
        fs_, ci, co = w.shape
        # Per-sample block-diag weight: (fs, S*ci, S*co) -- constant size.
        wbd = jnp.einsum('pr,kio->kpiro', eye_s, w).reshape(fs_, S * ci, S * co)
        conv_w.append(wbd.astype(jnp.bfloat16))
        conv_b.append(jnp.tile(b, S).reshape(1, S * co).astype(jnp.float32))
    wq_t, wk_t, wv_t, gamma = params["sa"]
    F = wq_t.shape[0]
    wqkv = jnp.concatenate([wq_t, wk_t, wv_t], axis=1).astype(jnp.bfloat16)
    w_fc, b_fc = params["fc"]
    N = w_fc.shape[0]
    Td = w_fc.shape[1] // F
    # PyTorch fc column index is f*Td + t; reorder to t*F + f and transpose.
    wfc = jnp.transpose(w_fc.reshape(N, F, Td), (2, 1, 0)).reshape(Td * F, N)
    return {
        "conv_w": conv_w, "conv_b": conv_b,
        "wqkv": wqkv,
        "gamma": gamma.reshape(1, 1).astype(jnp.float32),
        "wfc": wfc.astype(jnp.bfloat16),
        "bfc": b_fc.reshape(1, N).astype(jnp.float32),
        "dims": {"S": S, "F": F, "Q": int(wq_t.shape[1]), "Td": int(Td), "N": int(N)},
    }


def pallas_forward(x, prep, fs, activation):
    B, C_in, T0, S = x.shape
    d = prep["dims"]
    assert d["S"] == S
    F, Q, Td, N = d["F"], d["Q"], d["Td"], d["N"]

    Ts = [T0]
    for _ in range(4):
        Ts.append((Ts[-1] - fs) // 2 + 1)
    T1, T2, T3, Td_x = Ts[1:]
    assert Td_x == Td, (Td_x, Td)

    # (B, C_in, T, S) -> (B, T, S*C_in), lane = s*C_in + c; split T into even/odd
    # halves so layer-1 taps are contiguous reads (free layout plumbing).
    x2 = jnp.transpose(x, (0, 2, 3, 1)).reshape(B, T0, S * C_in).astype(jnp.bfloat16)
    x_e, x_o = x2[:, 0::2, :], x2[:, 1::2, :]

    kernel = functools.partial(
        _base_encoder_kernel, fs=fs, activation=activation,
        S=S, F=F, Q=Q, Td=Td, T1=T1, T2=T2, T3=T3)

    def full(arr):        # whole array, identical block every grid step
        return pl.BlockSpec(arr.shape, lambda b, n=arr.ndim: (0,) * n)

    def per_batch(arr):   # (B, rows, lanes) -> (rows, lanes) block for step b
        return pl.BlockSpec((None,) + arr.shape[1:], lambda b: (b, 0, 0))

    cw, cb = prep["conv_w"], prep["conv_b"]
    in_specs = [per_batch(x_e), per_batch(x_o)]
    operands = [x_e, x_o]
    for l in range(4):
        in_specs += [full(cw[l]), full(cb[l])]
        operands += [cw[l], cb[l]]
    in_specs += [full(prep["wqkv"]), full(prep["wfc"]), full(prep["bfc"]),
                 pl.BlockSpec(memory_space=pltpu.MemorySpace.SMEM)]
    operands += [prep["wqkv"], prep["wfc"], prep["bfc"], prep["gamma"]]

    out = pl.pallas_call(
        kernel,
        grid=(B,),
        in_specs=in_specs,
        out_specs=pl.BlockSpec((None, S, N), lambda b: (b, 0, 0)),
        out_shape=jax.ShapeDtypeStruct((B, S, N), jnp.float32),
        scratch_shapes=[
            pltpu.VMEM((T1, S * F), jnp.float32),
            pltpu.VMEM((T2, S * F), jnp.float32),
            pltpu.VMEM((T3, S * F), jnp.float32),
        ],
        compiler_params=pltpu.CompilerParams(
            dimension_semantics=("parallel",),
            vmem_limit_bytes=32 * 1024 * 1024),
    )(*operands)
    return out


# ----------------------------------------------------------------------------
# Pure-JAX f32 reference (mirrors the PyTorch BaseEncoder forward).
# ----------------------------------------------------------------------------
def ref_forward(x_nchw, params, fs, activation):
    y = x_nchw
    for (w, b) in params["convs"]:
        B, Ci, T, S = y.shape
        Co = w.shape[-1]
        T_out = (T - fs) // 2 + 1
        out = jnp.zeros((B, Co, T_out, S), jnp.float32)
        for k in range(fs):
            ys = y[:, :, k:k + 2 * (T_out - 1) + 1:2, :]
            out = out + jnp.einsum('io,bitw->botw', w[k], ys)
        out = out + b[None, :, None, None]
        y = jnp.maximum(out, 0.0) if activation == "ReLU" else jnp.tanh(out)
    B, F, Td, S = y.shape
    wq_t, wk_t, wv_t, gamma = params["sa"]
    outs = []
    for t in range(Td):
        xt = y[:, :, t, :]                                  # (B, F, S)
        f = jnp.einsum('fq,bfc->bqc', wq_t, xt)
        g = jnp.einsum('fq,bfc->bqc', wk_t, xt)
        h = jnp.einsum('fv,bfc->bvc', wv_t, xt)
        scores = jnp.einsum('bqc,bqd->bcd', f, g)
        beta = jax.nn.softmax(scores, axis=1)
        o = gamma[0, 0] * jnp.einsum('bvc,bcd->bvd', h, beta) + xt
        outs.append(o[..., None])
    refined = jnp.concatenate(outs, axis=-1)                # (B, F, S, Td)
    z = jnp.transpose(refined, (0, 2, 1, 3)).reshape(B, S, F * Td)
    w_fc, b_fc = params["fc"]
    return z @ w_fc.T + b_fc


def downsampled_length(T, fs, n_layers=4):
    for _ in range(n_layers):
        T = (T - fs) // 2 + 1
    return T


if __name__ == "__main__":
    # Small shapes consistent with the module's forward.
    B, C_in, T, S = 2, 4, 128, 6        # (batch, input ch, temp_length, sensor ch)
    F, fs, sa_div = 8, 5, 2             # filter_num, filter_size, sa_div
    activation = "ReLU"
    Td = downsampled_length(T, fs)      # = 5

    key = jax.random.PRNGKey(0)
    ks = jax.random.split(key, 16)

    def init(k, shape, scale=0.1):
        return (scale * jax.random.normal(k, shape)).astype(jnp.float32)

    params = {
        "convs": [
            (init(ks[0], (fs, C_in, F)), init(ks[1], (F,))),
            (init(ks[2], (fs, F, F)), init(ks[3], (F,))),
            (init(ks[4], (fs, F, F)), init(ks[5], (F,))),
            (init(ks[6], (fs, F, F)), init(ks[7], (F,))),
        ],
        "sa": (
            init(ks[8], (F, F // sa_div)),          # W_query^T
            init(ks[9], (F, F // sa_div)),          # W_key^T
            init(ks[10], (F, F)),                   # W_value^T
            jnp.array([[0.1]], dtype=jnp.float32),  # gamma (nonzero -> attention path used)
        ),
        "fc": (
            init(ks[11], (2 * F, Td * F)),
            init(ks[12], (2 * F,)),
        ),
    }

    x = jax.random.normal(ks[13], (B, C_in, T, S), dtype=jnp.float32)

    prep = prepare_params(params, S)     # one-time (model-init) layout work
    out = pallas_forward(x, prep, fs, activation)
    out = jax.block_until_ready(out)

    ref = ref_forward(x, params, fs, activation)
    assert out.shape == (B, S, 2 * F), out.shape
    max_err = float(jnp.max(jnp.abs(out - ref)))
    # bf16 matmul operands with f32 accumulation -> relaxed tolerance vs f32 ref.
    assert max_err < 3e-2, f"mismatch vs reference: {max_err}"

    print("KERNEL_OK")
</pallas_src>

<mosaic_0001>
module attributes {stable_mosaic.version = 11 : i64} {
  func.func @_base_encoder_kernel(%arg0: i32, %arg1: memref<1x64x24xbf16, #tpu.memory_space<vmem>>, %arg2: memref<1x64x24xbf16, #tpu.memory_space<vmem>>, %arg3: memref<5x24x48xbf16, #tpu.memory_space<vmem>>, %arg4: memref<1x48xf32, #tpu.memory_space<vmem>>, %arg5: memref<5x48x48xbf16, #tpu.memory_space<vmem>>, %arg6: memref<1x48xf32, #tpu.memory_space<vmem>>, %arg7: memref<5x48x48xbf16, #tpu.memory_space<vmem>>, %arg8: memref<1x48xf32, #tpu.memory_space<vmem>>, %arg9: memref<5x48x48xbf16, #tpu.memory_space<vmem>>, %arg10: memref<1x48xf32, #tpu.memory_space<vmem>>, %arg11: memref<8x16xbf16, #tpu.memory_space<vmem>>, %arg12: memref<40x16xbf16, #tpu.memory_space<vmem>>, %arg13: memref<1x16xf32, #tpu.memory_space<vmem>>, %arg14: memref<1x1xf32, #tpu.memory_space<smem>>, %arg15: memref<1x6x16xf32, #tpu.memory_space<vmem>>, %arg16: memref<62x48xf32, #tpu.memory_space<vmem>>, %arg17: memref<29x48xf32, #tpu.memory_space<vmem>>, %arg18: memref<13x48xf32, #tpu.memory_space<vmem>>) attributes {dimension_semantics = [#tpu.dimension_semantics<parallel>], iteration_bounds = array<i64: 2>, scalar_prefetch = 0 : i64, scratch_operands = 3 : i64, tpu.core_type = #tpu.core_type<tc>, window_params = [{transform_indices = @transform_0, window_bounds = array<i64: 1, 64, 24>}, {transform_indices = @transform_1, window_bounds = array<i64: 1, 64, 24>}, {pipeline_mode = #tpu.pipeline_mode<synchronous>, transform_indices = @transform_2, window_bounds = array<i64: 5, 24, 48>}, {pipeline_mode = #tpu.pipeline_mode<synchronous>, transform_indices = @transform_3, window_bounds = array<i64: 1, 48>}, {pipeline_mode = #tpu.pipeline_mode<synchronous>, transform_indices = @transform_4, window_bounds = array<i64: 5, 48, 48>}, {pipeline_mode = #tpu.pipeline_mode<synchronous>, transform_indices = @transform_5, window_bounds = array<i64: 1, 48>}, {pipeline_mode = #tpu.pipeline_mode<synchronous>, transform_indices = @transform_6, window_bounds = array<i64: 5, 48, 48>}, {pipeline_mode = #tpu.pipeline_mode<synchronous>, transform_indices = @transform_7, window_bounds = array<i64: 1, 48>}, {pipeline_mode = #tpu.pipeline_mode<synchronous>, transform_indices = @transform_8, window_bounds = array<i64: 5, 48, 48>}, {pipeline_mode = #tpu.pipeline_mode<synchronous>, transform_indices = @transform_9, window_bounds = array<i64: 1, 48>}, {pipeline_mode = #tpu.pipeline_mode<synchronous>, transform_indices = @transform_10, window_bounds = array<i64: 8, 16>}, {pipeline_mode = #tpu.pipeline_mode<synchronous>, transform_indices = @transform_11, window_bounds = array<i64: 40, 16>}, {pipeline_mode = #tpu.pipeline_mode<synchronous>, transform_indices = @transform_12, window_bounds = array<i64: 1, 16>}, {transform_indices = @transform_13, window_bounds = array<i64: 1, 1>}, {transform_indices = @transform_14, window_bounds = array<i64: 1, 6, 16>}]} {
    %c0 = arith.constant 0 : index
    %c0_0 = arith.constant 0 : index
    %c0_1 = arith.constant 0 : index
    %0 = vector.load %arg1[%c0, %c0_0, %c0_1] : memref<1x64x24xbf16, #tpu.memory_space<vmem>>, vector<1x62x24xbf16>
    %1 = vector.shape_cast %0 : vector<1x62x24xbf16> to vector<62x24xbf16>
    %c0_2 = arith.constant 0 : index
    %c0_3 = arith.constant 0 : index
    %c0_4 = arith.constant 0 : index
    %2 = vector.load %arg2[%c0_2, %c0_3, %c0_4] : memref<1x64x24xbf16, #tpu.memory_space<vmem>>, vector<1x62x24xbf16>
    %3 = vector.shape_cast %2 : vector<1x62x24xbf16> to vector<62x24xbf16>
    %c0_5 = arith.constant 0 : index
    %c1 = arith.constant 1 : index
    %c0_6 = arith.constant 0 : index
    %4 = vector.load %arg1[%c0_5, %c1, %c0_6] : memref<1x64x24xbf16, #tpu.memory_space<vmem>>, vector<1x62x24xbf16>
    %5 = vector.shape_cast %4 : vector<1x62x24xbf16> to vector<62x24xbf16>
    %c0_7 = arith.constant 0 : index
    %c1_8 = arith.constant 1 : index
    %c0_9 = arith.constant 0 : index
    %6 = vector.load %arg2[%c0_7, %c1_8, %c0_9] : memref<1x64x24xbf16, #tpu.memory_space<vmem>>, vector<1x62x24xbf16>
    %7 = vector.shape_cast %6 : vector<1x62x24xbf16> to vector<62x24xbf16>
    %c0_10 = arith.constant 0 : index
    %c2 = arith.constant 2 : index
    %c0_11 = arith.constant 0 : index
    %8 = vector.load %arg1[%c0_10, %c2, %c0_11] : memref<1x64x24xbf16, #tpu.memory_space<vmem>>, vector<1x62x24xbf16>
    %9 = vector.shape_cast %8 : vector<1x62x24xbf16> to vector<62x24xbf16>
    %c0_12 = arith.constant 0 : index
    %c0_13 = arith.constant 0 : index
    %c0_14 = arith.constant 0 : index
    %10 = vector.load %arg3[%c0_12, %c0_13, %c0_14] : memref<5x24x48xbf16, #tpu.memory_space<vmem>>, vector<1x24x48xbf16>
    %11 = vector.shape_cast %10 : vector<1x24x48xbf16> to vector<24x48xbf16>
    %cst = arith.constant dense<0.000000e+00> : vector<62x48xf32>
    %12 = tpu.matmul %1, %11, %cst {dimension_numbers = #tpu.dot_dimension_numbers<[1], [0], [0], [1], [0, 0, 1, 1], [], []>} : vector<62x24xbf16>, vector<24x48xbf16>, vector<62x48xf32> -> vector<62x48xf32>
    %c1_15 = arith.constant 1 : index
    %c0_16 = arith.constant 0 : index
    %c0_17 = arith.constant 0 : index
    %13 = vector.load %arg3[%c1_15, %c0_16, %c0_17] : memref<5x24x48xbf16, #tpu.memory_space<vmem>>, vector<1x24x48xbf16>
    %14 = vector.shape_cast %13 : vector<1x24x48xbf16> to vector<24x48xbf16>
    %cst_18 = arith.constant dense<0.000000e+00> : vector<62x48xf32>
    %15 = tpu.matmul %3, %14, %cst_18 {dimension_numbers = #tpu.dot_dimension_numbers<[1], [0], [0], [1], [0, 0, 1, 1], [], []>} : vector<62x24xbf16>, vector<24x48xbf16>, vector<62x48xf32> -> vector<62x48xf32>
    %16 = arith.addf %12, %15 : vector<62x48xf32>
    %c2_19 = arith.constant 2 : index
    %c0_20 = arith.constant 0 : index
    %c0_21 = arith.constant 0 : index
    %17 = vector.load %arg3[%c2_19, %c0_20, %c0_21] : memref<5x24x48xbf16, #tpu.memory_space<vmem>>, vector<1x24x48xbf16>
    %18 = vector.shape_cast %17 : vector<1x24x48xbf16> to vector<24x48xbf16>
    %cst_22 = arith.constant dense<0.000000e+00> : vector<62x48xf32>
    %19 = tpu.matmul %5, %18, %cst_22 {dimension_numbers = #tpu.dot_dimension_numbers<[1], [0], [0], [1], [0, 0, 1, 1], [], []>} : vector<62x24xbf16>, vector<24x48xbf16>, vector<62x48xf32> -> vector<62x48xf32>
    %20 = arith.addf %16, %19 : vector<62x48xf32>
    %c3 = arith.constant 3 : index
    %c0_23 = arith.constant 0 : index
    %c0_24 = arith.constant 0 : index
    %21 = vector.load %arg3[%c3, %c0_23, %c0_24] : memref<5x24x48xbf16, #tpu.memory_space<vmem>>, vector<1x24x48xbf16>
    %22 = vector.shape_cast %21 : vector<1x24x48xbf16> to vector<24x48xbf16>
    %cst_25 = arith.constant dense<0.000000e+00> : vector<62x48xf32>
    %23 = tpu.matmul %7, %22, %cst_25 {dimension_numbers = #tpu.dot_dimension_numbers<[1], [0], [0], [1], [0, 0, 1, 1], [], []>} : vector<62x24xbf16>, vector<24x48xbf16>, vector<62x48xf32> -> vector<62x48xf32>
    %24 = arith.addf %20, %23 : vector<62x48xf32>
    %c4 = arith.constant 4 : index
    %c0_26 = arith.constant 0 : index
    %c0_27 = arith.constant 0 : index
    %25 = vector.load %arg3[%c4, %c0_26, %c0_27] : memref<5x24x48xbf16, #tpu.memory_space<vmem>>, vector<1x24x48xbf16>
    %26 = vector.shape_cast %25 : vector<1x24x48xbf16> to vector<24x48xbf16>
    %cst_28 = arith.constant dense<0.000000e+00> : vector<62x48xf32>
    %27 = tpu.matmul %9, %26, %cst_28 {dimension_numbers = #tpu.dot_dimension_numbers<[1], [0], [0], [1], [0, 0, 1, 1], [], []>} : vector<62x24xbf16>, vector<24x48xbf16>, vector<62x48xf32> -> vector<62x48xf32>
    %28 = arith.addf %24, %27 : vector<62x48xf32>
    %c0_29 = arith.constant 0 : index
    %c0_30 = arith.constant 0 : index
    %29 = vector.load %arg4[%c0_29, %c0_30] : memref<1x48xf32, #tpu.memory_space<vmem>>, vector<1x48xf32>
    %30 = vector.broadcast %29 : vector<1x48xf32> to vector<62x48xf32>
    %31 = arith.addf %28, %30 : vector<62x48xf32>
    %cst_31 = arith.constant 0.000000e+00 : f32
    %32 = vector.broadcast %cst_31 : f32 to vector<62x48xf32>
    %33 = arith.maximumf %31, %32 : vector<62x48xf32>
    %c0_32 = arith.constant 0 : index
    %c0_33 = arith.constant 0 : index
    %34 = vector.load %arg16[%c0_32, %c0_33] : memref<62x48xf32, #tpu.memory_space<vmem>>, vector<62x48xf32>
    tpu.vector_store %arg16[%c0_32, %c0_33], %33 {strides = array<i32>} : memref<62x48xf32, #tpu.memory_space<vmem>>, vector<62x48xf32>,
    %c0_34 = arith.constant 0 : index
    %c0_35 = arith.constant 0 : index
    %35 = tpu.strided_load %arg16[%c0_34, %c0_35] {strides = array<i32: 2, 1>} : memref<62x48xf32, #tpu.memory_space<vmem>>, vector<29x48xf32>
    %36 = arith.truncf %35 : vector<29x48xf32> to vector<29x48xbf16>
    %c1_36 = arith.constant 1 : index
    %c0_37 = arith.constant 0 : index
    %37 = tpu.strided_load %arg16[%c1_36, %c0_37] {strides = array<i32: 2, 1>} : memref<62x48xf32, #tpu.memory_space<vmem>>, vector<29x48xf32>
    %38 = arith.truncf %37 : vector<29x48xf32> to vector<29x48xbf16>
    %c2_38 = arith.constant 2 : index
    %c0_39 = arith.constant 0 : index
    %39 = tpu.strided_load %arg16[%c2_38, %c0_39] {strides = array<i32: 2, 1>} : memref<62x48xf32, #tpu.memory_space<vmem>>, vector<29x48xf32>
    %40 = arith.truncf %39 : vector<29x48xf32> to vector<29x48xbf16>
    %c3_40 = arith.constant 3 : index
    %c0_41 = arith.constant 0 : index
    %41 = tpu.strided_load %arg16[%c3_40, %c0_41] {strides = array<i32: 2, 1>} : memref<62x48xf32, #tpu.memory_space<vmem>>, vector<29x48xf32>
    %42 = arith.truncf %41 : vector<29x48xf32> to vector<29x48xbf16>
    %c4_42 = arith.constant 4 : index
    %c0_43 = arith.constant 0 : index
    %43 = tpu.strided_load %arg16[%c4_42, %c0_43] {strides = array<i32: 2, 1>} : memref<62x48xf32, #tpu.memory_space<vmem>>, vector<29x48xf32>
    %44 = arith.truncf %43 : vector<29x48xf32> to vector<29x48xbf16>
    %c0_44 = arith.constant 0 : index
    %c0_45 = arith.constant 0 : index
    %c0_46 = arith.constant 0 : index
    %45 = vector.load %arg5[%c0_44, %c0_45, %c0_46] : memref<5x48x48xbf16, #tpu.memory_space<vmem>>, vector<1x48x48xbf16>
    %46 = vector.shape_cast %45 : vector<1x48x48xbf16> to vector<48x48xbf16>
    %cst_47 = arith.constant dense<0.000000e+00> : vector<29x48xf32>
    %47 = tpu.matmul %36, %46, %cst_47 {dimension_numbers = #tpu.dot_dimension_numbers<[1], [0], [0], [1], [0, 0, 1, 1], [], []>} : vector<29x48xbf16>, vector<48x48xbf16>, vector<29x48xf32> -> vector<29x48xf32>
    %c1_48 = arith.constant 1 : index
    %c0_49 = arith.constant 0 : index
    %c0_50 = arith.constant 0 : index
    %48 = vector.load %arg5[%c1_48, %c0_49, %c0_50] : memref<5x48x48xbf16, #tpu.memory_space<vmem>>, vector<1x48x48xbf16>
    %49 = vector.shape_cast %48 : vector<1x48x48xbf16> to vector<48x48xbf16>
    %cst_51 = arith.constant dense<0.000000e+00> : vector<29x48xf32>
    %50 = tpu.matmul %38, %49, %cst_51 {dimension_numbers = #tpu.dot_dimension_numbers<[1], [0], [0], [1], [0, 0, 1, 1], [], []>} : vector<29x48xbf16>, vector<48x48xbf16>, vector<29x48xf32> -> vector<29x48xf32>
    %51 = arith.addf %47, %50 : vector<29x48xf32>
    %c2_52 = arith.constant 2 : index
    %c0_53 = arith.constant 0 : index
    %c0_54 = arith.constant 0 : index
    %52 = vector.load %arg5[%c2_52, %c0_53, %c0_54] : memref<5x48x48xbf16, #tpu.memory_space<vmem>>, vector<1x48x48xbf16>
    %53 = vector.shape_cast %52 : vector<1x48x48xbf16> to vector<48x48xbf16>
    %cst_55 = arith.constant dense<0.000000e+00> : vector<29x48xf32>
    %54 = tpu.matmul %40, %53, %cst_55 {dimension_numbers = #tpu.dot_dimension_numbers<[1], [0], [0], [1], [0, 0, 1, 1], [], []>} : vector<29x48xbf16>, vector<48x48xbf16>, vector<29x48xf32> -> vector<29x48xf32>
    %55 = arith.addf %51, %54 : vector<29x48xf32>
    %c3_56 = arith.constant 3 : index
    %c0_57 = arith.constant 0 : index
    %c0_58 = arith.constant 0 : index
    %56 = vector.load %arg5[%c3_56, %c0_57, %c0_58] : memref<5x48x48xbf16, #tpu.memory_space<vmem>>, vector<1x48x48xbf16>
    %57 = vector.shape_cast %56 : vector<1x48x48xbf16> to vector<48x48xbf16>
    %cst_59 = arith.constant dense<0.000000e+00> : vector<29x48xf32>
    %58 = tpu.matmul %42, %57, %cst_59 {dimension_numbers = #tpu.dot_dimension_numbers<[1], [0], [0], [1], [0, 0, 1, 1], [], []>} : vector<29x48xbf16>, vector<48x48xbf16>, vector<29x48xf32> -> vector<29x48xf32>
    %59 = arith.addf %55, %58 : vector<29x48xf32>
    %c4_60 = arith.constant 4 : index
    %c0_61 = arith.constant 0 : index
    %c0_62 = arith.constant 0 : index
    %60 = vector.load %arg5[%c4_60, %c0_61, %c0_62] : memref<5x48x48xbf16, #tpu.memory_space<vmem>>, vector<1x48x48xbf16>
    %61 = vector.shape_cast %60 : vector<1x48x48xbf16> to vector<48x48xbf16>
    %cst_63 = arith.constant dense<0.000000e+00> : vector<29x48xf32>
    %62 = tpu.matmul %44, %61, %cst_63 {dimension_numbers = #tpu.dot_dimension_numbers<[1], [0], [0], [1], [0, 0, 1, 1], [], []>} : vector<29x48xbf16>, vector<48x48xbf16>, vector<29x48xf32> -> vector<29x48xf32>
    %63 = arith.addf %59, %62 : vector<29x48xf32>
    %c0_64 = arith.constant 0 : index
    %c0_65 = arith.constant 0 : index
    %64 = vector.load %arg6[%c0_64, %c0_65] : memref<1x48xf32, #tpu.memory_space<vmem>>, vector<1x48xf32>
    %65 = vector.broadcast %64 : vector<1x48xf32> to vector<29x48xf32>
    %66 = arith.addf %63, %65 : vector<29x48xf32>
    %cst_66 = arith.constant 0.000000e+00 : f32
    %67 = vector.broadcast %cst_66 : f32 to vector<29x48xf32>
    %68 = arith.maximumf %66, %67 : vector<29x48xf32>
    %c0_67 = arith.constant 0 : index
    %c0_68 = arith.constant 0 : index
    %69 = vector.load %arg17[%c0_67, %c0_68] : memref<29x48xf32, #tpu.memory_space<vmem>>, vector<29x48xf32>
    tpu.vector_store %arg17[%c0_67, %c0_68], %68 {strides = array<i32>} : memref<29x48xf32, #tpu.memory_space<vmem>>, vector<29x48xf32>,
    %c0_69 = arith.constant 0 : index
    %c0_70 = arith.constant 0 : index
    %70 = tpu.strided_load %arg17[%c0_69, %c0_70] {strides = array<i32: 2, 1>} : memref<29x48xf32, #tpu.memory_space<vmem>>, vector<13x48xf32>
    %71 = arith.truncf %70 : vector<13x48xf32> to vector<13x48xbf16>
    %c1_71 = arith.constant 1 : index
    %c0_72 = arith.constant 0 : index
    %72 = tpu.strided_load %arg17[%c1_71, %c0_72] {strides = array<i32: 2, 1>} : memref<29x48xf32, #tpu.memory_space<vmem>>, vector<13x48xf32>
    %73 = arith.truncf %72 : vector<13x48xf32> to vector<13x48xbf16>
    %c2_73 = arith.constant 2 : index
    %c0_74 = arith.constant 0 : index
    %74 = tpu.strided_load %arg17[%c2_73, %c0_74] {strides = array<i32: 2, 1>} : memref<29x48xf32, #tpu.memory_space<vmem>>, vector<13x48xf32>
    %75 = arith.truncf %74 : vector<13x48xf32> to vector<13x48xbf16>
    %c3_75 = arith.constant 3 : index
    %c0_76 = arith.constant 0 : index
    %76 = tpu.strided_load %arg17[%c3_75, %c0_76] {strides = array<i32: 2, 1>} : memref<29x48xf32, #tpu.memory_space<vmem>>, vector<13x48xf32>
    %77 = arith.truncf %76 : vector<13x48xf32> to vector<13x48xbf16>
    %c4_77 = arith.constant 4 : index
    %c0_78 = arith.constant 0 : index
    %78 = tpu.strided_load %arg17[%c4_77, %c0_78] {strides = array<i32: 2, 1>} : memref<29x48xf32, #tpu.memory_space<vmem>>, vector<13x48xf32>
    %79 = arith.truncf %78 : vector<13x48xf32> to vector<13x48xbf16>
    %c0_79 = arith.constant 0 : index
    %c0_80 = arith.constant 0 : index
    %c0_81 = arith.constant 0 : index
    %80 = vector.load %arg7[%c0_79, %c0_80, %c0_81] : memref<5x48x48xbf16, #tpu.memory_space<vmem>>, vector<1x48x48xbf16>
    %81 = vector.shape_cast %80 : vector<1x48x48xbf16> to vector<48x48xbf16>
    %cst_82 = arith.constant dense<0.000000e+00> : vector<13x48xf32>
    %82 = tpu.matmul %71, %81, %cst_82 {dimension_numbers = #tpu.dot_dimension_numbers<[1], [0], [0], [1], [0, 0, 1, 1], [], []>} : vector<13x48xbf16>, vector<48x48xbf16>, vector<13x48xf32> -> vector<13x48xf32>
    %c1_83 = arith.constant 1 : index
    %c0_84 = arith.constant 0 : index
    %c0_85 = arith.constant 0 : index
    %83 = vector.load %arg7[%c1_83, %c0_84, %c0_85] : memref<5x48x48xbf16, #tpu.memory_space<vmem>>, vector<1x48x48xbf16>
    %84 = vector.shape_cast %83 : vector<1x48x48xbf16> to vector<48x48xbf16>
    %cst_86 = arith.constant dense<0.000000e+00> : vector<13x48xf32>
    %85 = tpu.matmul %73, %84, %cst_86 {dimension_numbers = #tpu.dot_dimension_numbers<[1], [0], [0], [1], [0, 0, 1, 1], [], []>} : vector<13x48xbf16>, vector<48x48xbf16>, vector<13x48xf32> -> vector<13x48xf32>
    %86 = arith.addf %82, %85 : vector<13x48xf32>
    %c2_87 = arith.constant 2 : index
    %c0_88 = arith.constant 0 : index
    %c0_89 = arith.constant 0 : index
    %87 = vector.load %arg7[%c2_87, %c0_88, %c0_89] : memref<5x48x48xbf16, #tpu.memory_space<vmem>>, vector<1x48x48xbf16>
    %88 = vector.shape_cast %87 : vector<1x48x48xbf16> to vector<48x48xbf16>
    %cst_90 = arith.constant dense<0.000000e+00> : vector<13x48xf32>
    %89 = tpu.matmul %75, %88, %cst_90 {dimension_numbers = #tpu.dot_dimension_numbers<[1], [0], [0], [1], [0, 0, 1, 1], [], []>} : vector<13x48xbf16>, vector<48x48xbf16>, vector<13x48xf32> -> vector<13x48xf32>
    %90 = arith.addf %86, %89 : vector<13x48xf32>
    %c3_91 = arith.constant 3 : index
    %c0_92 = arith.constant 0 : index
    %c0_93 = arith.constant 0 : index
    %91 = vector.load %arg7[%c3_91, %c0_92, %c0_93] : memref<5x48x48xbf16, #tpu.memory_space<vmem>>, vector<1x48x48xbf16>
    %92 = vector.shape_cast %91 : vector<1x48x48xbf16> to vector<48x48xbf16>
    %cst_94 = arith.constant dense<0.000000e+00> : vector<13x48xf32>
    %93 = tpu.matmul %77, %92, %cst_94 {dimension_numbers = #tpu.dot_dimension_numbers<[1], [0], [0], [1], [0, 0, 1, 1], [], []>} : vector<13x48xbf16>, vector<48x48xbf16>, vector<13x48xf32> -> vector<13x48xf32>
    %94 = arith.addf %90, %93 : vector<13x48xf32>
    %c4_95 = arith.constant 4 : index
    %c0_96 = arith.constant 0 : index
    %c0_97 = arith.constant 0 : index
    %95 = vector.load %arg7[%c4_95, %c0_96, %c0_97] : memref<5x48x48xbf16, #tpu.memory_space<vmem>>, vector<1x48x48xbf16>
    %96 = vector.shape_cast %95 : vector<1x48x48xbf16> to vector<48x48xbf16>
    %cst_98 = arith.constant dense<0.000000e+00> : vector<13x48xf32>
    %97 = tpu.matmul %79, %96, %cst_98 {dimension_numbers = #tpu.dot_dimension_numbers<[1], [0], [0], [1], [0, 0, 1, 1], [], []>} : vector<13x48xbf16>, vector<48x48xbf16>, vector<13x48xf32> -> vector<13x48xf32>
    %98 = arith.addf %94, %97 : vector<13x48xf32>
    %c0_99 = arith.constant 0 : index
    %c0_100 = arith.constant 0 : index
    %99 = vector.load %arg8[%c0_99, %c0_100] : memref<1x48xf32, #tpu.memory_space<vmem>>, vector<1x48xf32>
    %100 = vector.broadcast %99 : vector<1x48xf32> to vector<13x48xf32>
    %101 = arith.addf %98, %100 : vector<13x48xf32>
    %cst_101 = arith.constant 0.000000e+00 : f32
    %102 = vector.broadcast %cst_101 : f32 to vector<13x48xf32>
    %103 = arith.maximumf %101, %102 : vector<13x48xf32>
    %c0_102 = arith.constant 0 : index
    %c0_103 = arith.constant 0 : index
    %104 = vector.load %arg18[%c0_102, %c0_103] : memref<13x48xf32, #tpu.memory_space<vmem>>, vector<13x48xf32>
    tpu.vector_store %arg18[%c0_102, %c0_103], %103 {strides = array<i32>} : memref<13x48xf32, #tpu.memory_space<vmem>>, vector<13x48xf32>,
    %c0_104 = arith.constant 0 : index
    %c0_105 = arith.constant 0 : index
    %105 = tpu.strided_load %arg18[%c0_104, %c0_105] {strides = array<i32: 2, 1>} : memref<13x48xf32, #tpu.memory_space<vmem>>, vector<5x48xf32>
    %106 = arith.truncf %105 : vector<5x48xf32> to vector<5x48xbf16>
    %c1_106 = arith.constant 1 : index
    %c0_107 = arith.constant 0 : index
    %107 = tpu.strided_load %arg18[%c1_106, %c0_107] {strides = array<i32: 2, 1>} : memref<13x48xf32, #tpu.memory_space<vmem>>, vector<5x48xf32>
    %108 = arith.truncf %107 : vector<5x48xf32> to vector<5x48xbf16>
    %c2_108 = arith.constant 2 : index
    %c0_109 = arith.constant 0 : index
    %109 = tpu.strided_load %arg18[%c2_108, %c0_109] {strides = array<i32: 2, 1>} : memref<13x48xf32, #tpu.memory_space<vmem>>, vector<5x48xf32>
    %110 = arith.truncf %109 : vector<5x48xf32> to vector<5x48xbf16>
    %c3_110 = arith.constant 3 : index
    %c0_111 = arith.constant 0 : index
    %111 = tpu.strided_load %arg18[%c3_110, %c0_111] {strides = array<i32: 2, 1>} : memref<13x48xf32, #tpu.memory_space<vmem>>, vector<5x48xf32>
    %112 = arith.truncf %111 : vector<5x48xf32> to vector<5x48xbf16>
    %c4_112 = arith.constant 4 : index
    %c0_113 = arith.constant 0 : index
    %113 = tpu.strided_load %arg18[%c4_112, %c0_113] {strides = array<i32: 2, 1>} : memref<13x48xf32, #tpu.memory_space<vmem>>, vector<5x48xf32>
    %114 = arith.truncf %113 : vector<5x48xf32> to vector<5x48xbf16>
    %c0_114 = arith.constant 0 : index
    %c0_115 = arith.constant 0 : index
    %c0_116 = arith.constant 0 : index
    %115 = vector.load %arg9[%c0_114, %c0_115, %c0_116] : memref<5x48x48xbf16, #tpu.memory_space<vmem>>, vector<1x48x48xbf16>
    %116 = vector.shape_cast %115 : vector<1x48x48xbf16> to vector<48x48xbf16>
    %cst_117 = arith.constant dense<0.000000e+00> : vector<5x48xf32>
    %117 = tpu.matmul %106, %116, %cst_117 {dimension_numbers = #tpu.dot_dimension_numbers<[1], [0], [0], [1], [0, 0, 1, 1], [], []>} : vector<5x48xbf16>, vector<48x48xbf16>, vector<5x48xf32> -> vector<5x48xf32>
    %c1_118 = arith.constant 1 : index
    %c0_119 = arith.constant 0 : index
    %c0_120 = arith.constant 0 : index
    %118 = vector.load %arg9[%c1_118, %c0_119, %c0_120] : memref<5x48x48xbf16, #tpu.memory_space<vmem>>, vector<1x48x48xbf16>
    %119 = vector.shape_cast %118 : vector<1x48x48xbf16> to vector<48x48xbf16>
    %cst_121 = arith.constant dense<0.000000e+00> : vector<5x48xf32>
    %120 = tpu.matmul %108, %119, %cst_121 {dimension_numbers = #tpu.dot_dimension_numbers<[1], [0], [0], [1], [0, 0, 1, 1], [], []>} : vector<5x48xbf16>, vector<48x48xbf16>, vector<5x48xf32> -> vector<5x48xf32>
    %121 = arith.addf %117, %120 : vector<5x48xf32>
    %c2_122 = arith.constant 2 : index
    %c0_123 = arith.constant 0 : index
    %c0_124 = arith.constant 0 : index
    %122 = vector.load %arg9[%c2_122, %c0_123, %c0_124] : memref<5x48x48xbf16, #tpu.memory_space<vmem>>, vector<1x48x48xbf16>
    %123 = vector.shape_cast %122 : vector<1x48x48xbf16> to vector<48x48xbf16>
    %cst_125 = arith.constant dense<0.000000e+00> : vector<5x48xf32>
    %124 = tpu.matmul %110, %123, %cst_125 {dimension_numbers = #tpu.dot_dimension_numbers<[1], [0], [0], [1], [0, 0, 1, 1], [], []>} : vector<5x48xbf16>, vector<48x48xbf16>, vector<5x48xf32> -> vector<5x48xf32>
    %125 = arith.addf %121, %124 : vector<5x48xf32>
    %c3_126 = arith.constant 3 : index
    %c0_127 = arith.constant 0 : index
    %c0_128 = arith.constant 0 : index
    %126 = vector.load %arg9[%c3_126, %c0_127, %c0_128] : memref<5x48x48xbf16, #tpu.memory_space<vmem>>, vector<1x48x48xbf16>
    %127 = vector.shape_cast %126 : vector<1x48x48xbf16> to vector<48x48xbf16>
    %cst_129 = arith.constant dense<0.000000e+00> : vector<5x48xf32>
    %128 = tpu.matmul %112, %127, %cst_129 {dimension_numbers = #tpu.dot_dimension_numbers<[1], [0], [0], [1], [0, 0, 1, 1], [], []>} : vector<5x48xbf16>, vector<48x48xbf16>, vector<5x48xf32> -> vector<5x48xf32>
    %129 = arith.addf %125, %128 : vector<5x48xf32>
    %c4_130 = arith.constant 4 : index
    %c0_131 = arith.constant 0 : index
    %c0_132 = arith.constant 0 : index
    %130 = vector.load %arg9[%c4_130, %c0_131, %c0_132] : memref<5x48x48xbf16, #tpu.memory_space<vmem>>, vector<1x48x48xbf16>
    %131 = vector.shape_cast %130 : vector<1x48x48xbf16> to vector<48x48xbf16>
    %cst_133 = arith.constant dense<0.000000e+00> : vector<5x48xf32>
    %132 = tpu.matmul %114, %131, %cst_133 {dimension_numbers = #tpu.dot_dimension_numbers<[1], [0], [0], [1], [0, 0, 1, 1], [], []>} : vector<5x48xbf16>, vector<48x48xbf16>, vector<5x48xf32> -> vector<5x48xf32>
    %133 = arith.addf %129, %132 : vector<5x48xf32>
    %c0_134 = arith.constant 0 : index
    %c0_135 = arith.constant 0 : index
    %134 = vector.load %arg10[%c0_134, %c0_135] : memref<1x48xf32, #tpu.memory_space<vmem>>, vector<1x48xf32>
    %135 = vector.broadcast %134 : vector<1x48xf32> to vector<5x48xf32>
    %136 = arith.addf %133, %135 : vector<5x48xf32>
    %cst_136 = arith.constant 0.000000e+00 : f32
    %137 = vector.broadcast %cst_136 : f32 to vector<5x48xf32>
    %138 = arith.maximumf %136, %137 : vector<5x48xf32>
    %139 = vector.extract_strided_slice %138 {offsets = [0, 0], sizes = [5, 8], strides = [1, 1]} : vector<5x48xf32> to vector<5x8xf32>
    %140 = vector.extract_strided_slice %138 {offsets = [0, 8], sizes = [5, 8], strides = [1, 1]} : vector<5x48xf32> to vector<5x8xf32>
    %141 = vector.extract_strided_slice %138 {offsets = [0, 16], sizes = [5, 8], strides = [1, 1]} : vector<5x48xf32> to vector<5x8xf32>
    %142 = vector.extract_strided_slice %138 {offsets = [0, 24], sizes = [5, 8], strides = [1, 1]} : vector<5x48xf32> to vector<5x8xf32>
    %143 = vector.extract_strided_slice %138 {offsets = [0, 32], sizes = [5, 8], strides = [1, 1]} : vector<5x48xf32> to vector<5x8xf32>
    %144 = vector.extract_strided_slice %138 {offsets = [0, 40], sizes = [5, 8], strides = [1, 1]} : vector<5x48xf32> to vector<5x8xf32>
    %145 = vector.shape_cast %139 : vector<5x8xf32> to vector<5x1x8xf32>
    %146 = vector.shape_cast %140 : vector<5x8xf32> to vector<5x1x8xf32>
    %147 = vector.shape_cast %141 : vector<5x8xf32> to vector<5x1x8xf32>
    %148 = vector.shape_cast %142 : vector<5x8xf32> to vector<5x1x8xf32>
    %149 = vector.shape_cast %143 : vector<5x8xf32> to vector<5x1x8xf32>
    %150 = vector.shape_cast %144 : vector<5x8xf32> to vector<5x1x8xf32>
    %151 = tpu.concatenate %145, %146, %147, %148, %149, %150 in 1 : vector<5x1x8xf32>, vector<5x1x8xf32>, vector<5x1x8xf32>, vector<5x1x8xf32>, vector<5x1x8xf32>, vector<5x1x8xf32> -> vector<5x6x8xf32>
    %152 = vector.shape_cast %151 : vector<5x6x8xf32> to vector<30x8xf32>
    %153 = arith.truncf %152 : vector<30x8xf32> to vector<30x8xbf16>
    %c0_137 = arith.constant 0 : index
    %c0_138 = arith.constant 0 : index
    %154 = vector.load %arg11[%c0_137, %c0_138] : memref<8x16xbf16, #tpu.memory_space<vmem>>, vector<8x16xbf16>
    %cst_139 = arith.constant dense<0.000000e+00> : vector<30x16xf32>
    %155 = tpu.matmul %153, %154, %cst_139 {dimension_numbers = #tpu.dot_dimension_numbers<[1], [0], [0], [1], [0, 0, 1, 1], [], []>} : vector<30x8xbf16>, vector<8x16xbf16>, vector<30x16xf32> -> vector<30x16xf32>
    %156 = vector.shape_cast %155 : vector<30x16xf32> to vector<5x6x16xf32>
    %157 = vector.extract_strided_slice %156 {offsets = [0, 0, 0], sizes = [5, 6, 4], strides = [1, 1, 1]} : vector<5x6x16xf32> to vector<5x6x4xf32>
    %158 = vector.extract_strided_slice %156 {offsets = [0, 0, 4], sizes = [5, 6, 4], strides = [1, 1, 1]} : vector<5x6x16xf32> to vector<5x6x4xf32>
    %159 = vector.extract_strided_slice %156 {offsets = [0, 0, 8], sizes = [5, 6, 8], strides = [1, 1, 1]} : vector<5x6x16xf32> to vector<5x6x8xf32>
    %160 = vector.shape_cast %158 : vector<5x6x4xf32> to vector<5x6x1x4xf32>
    %161 = vector.shape_cast %157 : vector<5x6x4xf32> to vector<5x1x6x4xf32>
    %162 = vector.broadcast %160 : vector<5x6x1x4xf32> to vector<5x6x6x4xf32>
    %163 = vector.broadcast %161 : vector<5x1x6x4xf32> to vector<5x6x6x4xf32>
    %164 = arith.mulf %162, %163 : vector<5x6x6x4xf32>
    %cst_140 = arith.constant dense<0.000000e+00> : vector<5x6x6xf32>
    %165 = vector.multi_reduction <add>, %164, %cst_140 [3] : vector<5x6x6x4xf32> to vector<5x6x6xf32>
    %cst_141 = arith.constant dense<0xFF800000> : vector<5x6xf32>
    %166 = vector.multi_reduction <maximumf>, %165, %cst_141 [2] : vector<5x6x6xf32> to vector<5x6xf32>
    %167 = vector.shape_cast %166 : vector<5x6xf32> to vector<5x6x1xf32>
    %168 = vector.broadcast %167 : vector<5x6x1xf32> to vector<5x6x6xf32>
    %169 = arith.subf %165, %168 : vector<5x6x6xf32>
    %170 = math.exp %169 : vector<5x6x6xf32>
    %cst_142 = arith.constant dense<0.000000e+00> : vector<5x6xf32>
    %171 = vector.multi_reduction <add>, %170, %cst_142 [2] : vector<5x6x6xf32> to vector<5x6xf32>
    %172 = vector.shape_cast %171 : vector<5x6xf32> to vector<5x6x1xf32>
    %173 = tpu.reciprocal %172 {approx = true} : vector<5x6x1xf32> -> vector<5x6x1xf32>
    %174 = vector.broadcast %173 : vector<5x6x1xf32> to vector<5x6x6xf32>
    %175 = arith.mulf %170, %174 : vector<5x6x6xf32>
    %176 = vector.shape_cast %175 : vector<5x6x6xf32> to vector<5x6x6x1xf32>
    %177 = vector.shape_cast %159 : vector<5x6x8xf32> to vector<5x1x6x8xf32>
    %178 = vector.broadcast %176 : vector<5x6x6x1xf32> to vector<5x6x6x8xf32>
    %179 = vector.broadcast %177 : vector<5x1x6x8xf32> to vector<5x6x6x8xf32>
    %180 = arith.mulf %178, %179 : vector<5x6x6x8xf32>
    %cst_143 = arith.constant dense<0.000000e+00> : vector<5x6x8xf32>
    %181 = vector.multi_reduction <add>, %180, %cst_143 [2] : vector<5x6x6x8xf32> to vector<5x6x8xf32>
    %c0_144 = arith.constant 0 : index
    %c0_145 = arith.constant 0 : index
    %182 = memref.load %arg14[%c0_144, %c0_145] : memref<1x1xf32, #tpu.memory_space<smem>>
    %183 = vector.broadcast %182 : f32 to vector<5x6x8xf32>
    %184 = arith.mulf %183, %181 : vector<5x6x8xf32>
    %185 = arith.addf %184, %151 : vector<5x6x8xf32>
    %186 = vector.extract_strided_slice %185 {offsets = [0, 0, 0], sizes = [1, 6, 8], strides = [1, 1, 1]} : vector<5x6x8xf32> to vector<1x6x8xf32>
    %187 = vector.shape_cast %186 : vector<1x6x8xf32> to vector<6x8xf32>
    %188 = vector.extract_strided_slice %185 {offsets = [1, 0, 0], sizes = [1, 6, 8], strides = [1, 1, 1]} : vector<5x6x8xf32> to vector<1x6x8xf32>
    %189 = vector.shape_cast %188 : vector<1x6x8xf32> to vector<6x8xf32>
    %190 = vector.extract_strided_slice %185 {offsets = [2, 0, 0], sizes = [1, 6, 8], strides = [1, 1, 1]} : vector<5x6x8xf32> to vector<1x6x8xf32>
    %191 = vector.shape_cast %190 : vector<1x6x8xf32> to vector<6x8xf32>
    %192 = vector.extract_strided_slice %185 {offsets = [3, 0, 0], sizes = [1, 6, 8], strides = [1, 1, 1]} : vector<5x6x8xf32> to vector<1x6x8xf32>
    %193 = vector.shape_cast %192 : vector<1x6x8xf32> to vector<6x8xf32>
    %194 = vector.extract_strided_slice %185 {offsets = [4, 0, 0], sizes = [1, 6, 8], strides = [1, 1, 1]} : vector<5x6x8xf32> to vector<1x6x8xf32>
    %195 = vector.shape_cast %194 : vector<1x6x8xf32> to vector<6x8xf32>
    %196 = tpu.concatenate %187, %189, %191, %193, %195 in 1 : vector<6x8xf32>, vector<6x8xf32>, vector<6x8xf32>, vector<6x8xf32>, vector<6x8xf32> -> vector<6x40xf32>
    %197 = arith.truncf %196 : vector<6x40xf32> to vector<6x40xbf16>
    %c0_146 = arith.constant 0 : index
    %c0_147 = arith.constant 0 : index
    %198 = vector.load %arg12[%c0_146, %c0_147] : memref<40x16xbf16, #tpu.memory_space<vmem>>, vector<40x16xbf16>
    %cst_148 = arith.constant dense<0.000000e+00> : vector<6x16xf32>
    %199 = tpu.matmul %197, %198, %cst_148 {dimension_numbers = #tpu.dot_dimension_numbers<[1], [0], [0], [1], [0, 0, 1, 1], [], []>} : vector<6x40xbf16>, vector<40x16xbf16>, vector<6x16xf32> -> vector<6x16xf32>
    %c0_149 = arith.constant 0 : index
    %c0_150 = arith.constant 0 : index
    %200 = vector.load %arg13[%c0_149, %c0_150] : memref<1x16xf32, #tpu.memory_space<vmem>>, vector<1x16xf32>
    %201 = vector.broadcast %200 : vector<1x16xf32> to vector<6x16xf32>
    %202 = arith.addf %199, %201 : vector<6x16xf32>
    %c0_151 = arith.constant 0 : index
    %c0_152 = arith.constant 0 : index
    %c0_153 = arith.constant 0 : index
    %203 = vector.load %arg15[%c0_151, %c0_152, %c0_153] : memref<1x6x16xf32, #tpu.memory_space<vmem>>, vector<1x6x16xf32>
    %204 = vector.shape_cast %203 : vector<1x6x16xf32> to vector<6x16xf32>
    %205 = vector.shape_cast %202 : vector<6x16xf32> to vector<1x6x16xf32>
    tpu.vector_store %arg15[%c0_151, %c0_152, %c0_153], %205 {strides = array<i32>} : memref<1x6x16xf32, #tpu.memory_space<vmem>>, vector<1x6x16xf32>,
    return
  }
  func.func @transform_0(%arg0: i32) -> (i32, i32, i32) {
    %c0_i32 = arith.constant 0 : i32
    %c0_i32_0 = arith.constant 0 : i32
    %c0_i32_1 = arith.constant 0 : i32
    return %arg0, %c0_i32, %c0_i32_0 : i32, i32, i32
  }
  func.func @transform_1(%arg0: i32) -> (i32, i32, i32) {
    %c0_i32 = arith.constant 0 : i32
    %c0_i32_0 = arith.constant 0 : i32
    %c0_i32_1 = arith.constant 0 : i32
    return %arg0, %c0_i32, %c0_i32_0 : i32, i32, i32
  }
  func.func @transform_2(%arg0: i32) -> (i32, i32, i32) {
    %c0_i32 = arith.constant 0 : i32
    %c0_i32_0 = arith.constant 0 : i32
    %c0_i32_1 = arith.constant 0 : i32
    %c0_i32_2 = arith.constant 0 : i32
    return %c0_i32, %c0_i32_0, %c0_i32_1 : i32, i32, i32
  }
  func.func @transform_3(%arg0: i32) -> (i32, i32) {
    %c0_i32 = arith.constant 0 : i32
    %c0_i32_0 = arith.constant 0 : i32
    %c0_i32_1 = arith.constant 0 : i32
    return %c0_i32, %c0_i32_0 : i32, i32
  }
  func.func @transform_4(%arg0: i32) -> (i32, i32, i32) {
    %c0_i32 = arith.constant 0 : i32
    %c0_i32_0 = arith.constant 0 : i32
    %c0_i32_1 = arith.constant 0 : i32
    %c0_i32_2 = arith.constant 0 : i32
    return %c0_i32, %c0_i32_0, %c0_i32_1 : i32, i32, i32
  }
  func.func @transform_5(%arg0: i32) -> (i32, i32) {
    %c0_i32 = arith.constant 0 : i32
    %c0_i32_0 = arith.constant 0 : i32
    %c0_i32_1 = arith.constant 0 : i32
    return %c0_i32, %c0_i32_0 : i32, i32
  }
  func.func @transform_6(%arg0: i32) -> (i32, i32, i32) {
    %c0_i32 = arith.constant 0 : i32
    %c0_i32_0 = arith.constant 0 : i32
    %c0_i32_1 = arith.constant 0 : i32
    %c0_i32_2 = arith.constant 0 : i32
    return %c0_i32, %c0_i32_0, %c0_i32_1 : i32, i32, i32
  }
  func.func @transform_7(%arg0: i32) -> (i32, i32) {
    %c0_i32 = arith.constant 0 : i32
    %c0_i32_0 = arith.constant 0 : i32
    %c0_i32_1 = arith.constant 0 : i32
    return %c0_i32, %c0_i32_0 : i32, i32
  }
  func.func @transform_8(%arg0: i32) -> (i32, i32, i32) {
    %c0_i32 = arith.constant 0 : i32
    %c0_i32_0 = arith.constant 0 : i32
    %c0_i32_1 = arith.constant 0 : i32
    %c0_i32_2 = arith.constant 0 : i32
    return %c0_i32, %c0_i32_0, %c0_i32_1 : i32, i32, i32
  }
  func.func @transform_9(%arg0: i32) -> (i32, i32) {
    %c0_i32 = arith.constant 0 : i32
    %c0_i32_0 = arith.constant 0 : i32
    %c0_i32_1 = arith.constant 0 : i32
    return %c0_i32, %c0_i32_0 : i32, i32
  }
  func.func @transform_10(%arg0: i32) -> (i32, i32) {
    %c0_i32 = arith.constant 0 : i32
    %c0_i32_0 = arith.constant 0 : i32
    %c0_i32_1 = arith.constant 0 : i32
    return %c0_i32, %c0_i32_0 : i32, i32
  }
  func.func @transform_11(%arg0: i32) -> (i32, i32) {
    %c0_i32 = arith.constant 0 : i32
    %c0_i32_0 = arith.constant 0 : i32
    %c0_i32_1 = arith.constant 0 : i32
    return %c0_i32, %c0_i32_0 : i32, i32
  }
  func.func @transform_12(%arg0: i32) -> (i32, i32) {
    %c0_i32 = arith.constant 0 : i32
    %c0_i32_0 = arith.constant 0 : i32
    %c0_i32_1 = arith.constant 0 : i32
    return %c0_i32, %c0_i32_0 : i32, i32
  }
  func.func @transform_13(%arg0: i32) -> (i32, i32) {
    %c0_i32 = arith.constant 0 : i32
    %c0_i32_0 = arith.constant 0 : i32
    %c0_i32_1 = arith.constant 0 : i32
    return %c0_i32, %c0_i32_0 : i32, i32
  }
  func.func @transform_14(%arg0: i32) -> (i32, i32, i32) {
    %c0_i32 = arith.constant 0 : i32
    %c0_i32_0 = arith.constant 0 : i32
    %c0_i32_1 = arith.constant 0 : i32
    return %arg0, %c0_i32, %c0_i32_0 : i32, i32, i32
  }
}

</mosaic_0001>

<bundles_post_ra>
// kernel: tpu_custom_call.1
= control target key start
LH: loop header
LB: loop body
LE: loop exit
PB: predicated region body
PF: predicated region fallthrough
CT: control target
= control target key end

     0   :  { %s7635_s0 = inlined_call_operand.vmem [shape: bf16[2,64,24], index: 0, kind: input, shape index: {}]   ;;  %s7636_s1 = inlined_call_operand.vmem [shape: bf16[2,64,24], index: 1, kind: input, shape index: {}]   ;;  %s7637_s2 = inlined_call_operand.vmem [shape: bf16[5,24,48], index: 2, kind: input, shape index: {}]   ;;  %s7638_s3 = inlined_call_operand.vmem [shape: f32[1,48], index: 3, kind: input, shape index: {}]   ;;  %s7639_s4 = inlined_call_operand.vmem [shape: bf16[5,48,48], index: 4, kind: input, shape index: {}]   ;;  %s7640_s5 = inlined_call_operand.vmem [shape: f32[1,48], index: 5, kind: input, shape index: {}]   ;;  %s7641_s6 = inlined_call_operand.hbm [shape: bf16[5,48,48], index: 6, kind: input, shape index: {}]   ;;  %s7642_s7 = inlined_call_operand.vmem [shape: f32[1,48], index: 7, kind: input, shape index: {}]   ;;  %s7643_s8 = inlined_call_operand.hbm [shape: bf16[5,48,48], index: 8, kind: input, shape index: {}]   ;;  %s7644_s9 = inlined_call_operand.vmem [shape: f32[1,48], index: 9, kind: input, shape index: {}]   ;;  %s7645_s10 = inlined_call_operand.vmem [shape: bf16[8,16], index: 10, kind: input, shape index: {}]   ;;  %s7646_s11 = inlined_call_operand.vmem [shape: bf16[40,16], index: 11, kind: input, shape index: {}]   ;;  %s7647_s12 = inlined_call_operand.vmem [shape: f32[1,16], index: 12, kind: input, shape index: {}]   ;;  %s7648_s13 = inlined_call_operand.<no memory space> [shape: f32[1,1], index: 13, kind: input, shape index: {}]   ;;  %s7649_s14 = inlined_call_operand.vmem [shape: f32[2,6,16], index: 14, kind: output, shape index: {}]  }
   0x1   :  { %19 = sst [smem:[#allocation5]] %s7648_s13 }
   0x2   :  { %20 = vsyncpa [#allocation7], 0 }
   0x3   :  { %21 = vsyncpa [#allocation9], 0  ;;  %s6095_s15 = smov 0  }
   0x4 LB: > { %s6101_s16 = sadd.s32 4294967295, %s5995_s15   ;;  %p5181_p0 = scmp.ge.s32.totalorder %s5995_s15, 1  ;;  %s5995_s15 = sphi %s6095_s15, %s27_s15  }
   0x5   : > { %p362_p1 = scmp.lt.s32.totalorder %s5995_s15, 3  ;;  %s5997_s17 = smov [#allocation6]  }
   0x6   : > { %s386_s13 = sshll.u32 %s5997_s17, 4  ;;  %p7650_p3 = scmp.eq.s32.totalorder %s6101_s16, 0  ;;  %s387_s13 = int_to_ptr.vmem [resolvable:$true] %s386_s13 }
   0x7   : > { %p6105_p2 = pnand %p5181_p0, %p362_p1  ;;  %s5998_s19 = smov [#allocation8]  }
   0x8   : > { %s402_s20 = sshll.u32 %s5998_s19, 4  ;;  %s5925_s24 = scalar_lea.hbm %s7641_s6, 1920  ;;  %s6118_s20 = int_to_ptr.vmem [resolvable:$true] %s402_s20 }
   0x9   : > { %s7669_s18 = scalar_select %p6105_p2, 1, 0 }
   0xa   : > { %p5745_p4 = pneg %p6105_p2  ;;  %p5926_p6 = scmp.ne.s32.totalorder %s7641_s6, %s5925_s24 }
   0xb   : > { %p5932_p10 = scmp.lt.u32.totalorder %s5925_s24, %s7641_s6 }
   0xc   : > { %p6114_p5 = pnand %p7650_p3, %p5745_p4 }
   0xe   : > { %p5927_p7 = pneg %p6114_p5 }
  0x10   : > { %p5928_p8 = pnand %p5927_p7, %p5926_p6 }
  0x12   : > { %p5929_p9 = pneg %p5928_p8 }
  0x14   : > { %p5934_p11 = pnand %p5932_p10, %p5929_p9 }
  0x16   : > { %5937 = shalt.err (!%p5934_p11)
}
  0x17   : > { %s5938_s29 = scalar_lea.vmem %s387_s13, 1920  ;;  %p5946_p1 = scmp.lt.s32.totalorder %s387_s13, %s387_s13 }
  0x18   : > { %p5939_p12 = scmp.ne.s32.totalorder %s387_s13, %s5938_s29  ;;  %p5947_p4 = scmp.lt.s32.totalorder %s5938_s29, %s5938_s29 }
  0x1a   : > { %p5941_p13 = pnand %p5939_p12, %p5927_p7  ;;  %p5948_p3 = por %p5947_p4, %p5946_p1 }
  0x1c   : > { %p5942_p0 = pneg %p5941_p13 }
  0x1e   : > { %p5949_p2 = pnand %p5948_p3, %p5942_p0 }
  0x20   : > { %5952 = shalt.err (!%p5949_p2)
}
  0x21   : > { %s5999_s30 = smov 64   ;;  %s6000_s17 = smov 4  }
  0x22   : > { %5748 = dma.hbm_to_vmem [thread:$0]  (!%p6114_p5), %s7641_s6, 1920, %s387_s13, [#allocation7], %s5999_s30, %s5999_s30, %s6000_s17  }
  0x23   : > { %s5953_s25 = scalar_lea.hbm %s7643_s8, 1920 }
  0x24   : > { %p5954_p6 = scmp.ne.s32.totalorder %s7643_s8, %s5953_s25  ;;  %p5960_p8 = scmp.lt.u32.totalorder %s5953_s25, %s7643_s8 }
  0x26   : > { %p5956_p2 = pnand %p5954_p6, %p5927_p7 }
  0x28   : > { %p5957_p3 = pneg %p5956_p2 }
  0x2a   : > { %p5962_p9 = pnand %p5960_p8, %p5957_p3 }
  0x2c   : > { %5965 = shalt.err (!%p5962_p9)
}
  0x2d   : > { %s5966_s13 = scalar_lea.vmem %s6118_s20, 1920  ;;  %p5974_p13 = scmp.lt.s32.totalorder %s6118_s20, %s6118_s20 }
  0x2e   : > { %p5967_p10 = scmp.ne.s32.totalorder %s6118_s20, %s5966_s13  ;;  %p5975_p0 = scmp.lt.s32.totalorder %s5966_s13, %s5966_s13 }
  0x30   : > { %p5969_p11 = pnand %p5967_p10, %p5927_p7  ;;  %p5976_p1 = por %p5975_p0, %p5974_p13 }
  0x32   : > { %p5970_p12 = pneg %p5969_p11 }
  0x34   : > { %p5977_p4 = pnand %p5976_p1, %p5970_p12 }
  0x36   : > { %5980 = shalt.err (!%p5977_p4)
}
  0x37   : > { %5751 = dma.hbm_to_vmem [thread:$0]  (!%p6114_p5), %s7643_s8, 1920, %s6118_s20, [#allocation9], %s5999_s30, %s5999_s30, %s6000_s17  }
  0x38   : > { %p7671_p6 = scmp.ne.s32.totalorder %s7669_s18, 0 }
  0x3a   : > { %449 = sbr.rel (%p7671_p6) target bundleno = 3084 (0xc0c), region = 76 }
  0x41   : > { %p7672_p2 = scmp.eq.s32.totalorder %s6101_s16, 0 }
  0x43   : > { %5986 = dma.done.wait (%p7672_p2), [#allocation7], 1920   ;;  %p7673_p7 = pmov %p7672_p2 }
  0x44   : > { %p7674_p3 = pmov %p7672_p2 }
  0x45   : > { %5988 = vsyncadd (%p7673_p7), [#allocation7], 4294965376 }
  0x46   : > { %5990 = dma.done.wait (%p7674_p3), [#allocation9], 1920   ;;  %p7675_p8 = pmov %p7672_p2 }
  0x47   : > { %p503_p9 = scmp.lt.s32.totalorder %s6101_s16, 1  ;;  %vm586_vm0 = vcmask 1043456   ;;  %v5786_v0 = vld [vmem:[%s7637_s2 + $0xc] sm:$0xff]   ;;  %vm573_vm1 = vcmask 195584   ;;  %v5787_v1 = vld [vmem:[%s7637_s2 + $0x14] ss:$0 sps:$4 sm:$0xff]  }
  0x48   : > { %5992 = vsyncadd (%p7675_p8), [#allocation9], 4294965376  ;;  %5452 = vmatprep.subr.bf16.mxu0 %v5786_v0  ;;  %5678 = vmatprep.subr.bf16.mxu1 %v5786_v0  ;;  %v588_v3 = vsel %vm586_vm0, %v5787_v1, 0  ;;  %v5790_v4 = vld [vmem:[%s7637_s2] sm:$0xff]   ;;  %v5791_v8 = vld [vmem:[%s7637_s2 + $0x8] ss:$0 sps:$4 sm:$0xff]  }
  0x49   : > { %s7721_s16 = smov (!%p503_p9, %s6101_s16), 1  ;;  %5453 = vmatpush3.bf16.msra.mxu0 %v5786_v0  ;;  %5680 = vmatpush3.bf16.msra.mxu1 %v5786_v0  ;;  %v5794_v14 = vld [vmem:[%s7637_s2 + $0x18] sm:$0xff]   ;;  %v697_v16 = vsel %vm586_vm0, %v5791_v8, 0  ;;  %v5798_v18 = vld [vmem:[%s7637_s2 + $0x20] ss:$0 sps:$4 sm:$0xff]   ;;  %v5799_v49 = vld [vmem:[%s7637_s2 + $0x24] sm:$0xff]  }
  0x4a   : > { %s5348_s18 = sshll.u32 %s7721_s16, 5  ;;  %5730 = vmatprep.subr.msk.bf16.mxu0 %vm586_vm0, %v5787_v1  ;;  %5731 = vmatprep.subr.msk.bf16.mxu1 %vm586_vm0, %v5787_v1  ;;  %v822_v28 = vsel %vm586_vm0, %v5798_v18, 0  ;;  %vm771_vm2 = vsmask.f32 7424  ;;  %v5800_v31 = vld [vmem:[%s7637_s2 + $0x2c] ss:$0 sps:$4 sm:$0xff]  }
  0x4b   : > { %s6185_s30 = scalar_lea.vmem %s7636_s1, %s5348_s18  ;;  %s6196_s28 = scalar_lea.vmem %s7635_s0, %s5348_s18  ;;  %v954_v47 = vsel %vm586_vm0, %v5800_v31, 0  ;;  %v5802_v59 = vld [vmem:[%s7637_s2 + $0x30] sm:$0xff]   ;;  %vm1036_vm3 = vcmask 1046528   ;;  %vm1164_vm4 = vcmask 392192   ;;  %vm1172_vm5 = vcmask 390144  }
  0x4c   : > { %v6199_v2 = vld [vmem:[%s6185_s30] sm:$0xff]   ;;  %v6211_v6 = vld [vmem:[%s6185_s30 + $0x8] sm:$0xff]   ;;  %v534_v11 = vld [vmem:[%s6196_s28 + $0x1c] sm:$0xf]  ;;  %vm6002_vm6 = vmmov 0   ;;  %vm1652_vm7 = vcmask 389120  }
  0x4d   : > { %5456 = vmatprep.mubr.msk.bf16.mxu0 %vm573_vm1, %v6199_v2  ;;  %v518_v5 = vld [vmem:[%s6196_s28] sm:$0xf]  ;;  %v6214_v7 = vld [vmem:[%s6196_s28 + $0x4] sm:$0xf]  ;;  %5455 = vmatpush3.bf16.msra.mxu0 %v588_v3  ;;  %v906_v10 = vshll.u32 %v6199_v2, 16  ;;  %v6227_v13 = vld [vmem:[%s6196_s28 + $0x8] sm:$0xff]  }
  0x4e   : > { %v5206_v9 = vcombine.low %v518_v5, %v6214_v7  ;;  %5681 = vmatpush3.bf16.msra.mxu1 %v588_v3  ;;  %5464 = vmatprep.subr.bf16.mxu0 %v5790_v4  ;;  %v524_v12 = vld [vmem:[%s6196_s28 + $0x18] sm:$0xf]  ;;  %v6237_v17 = vld [vmem:[%s6196_s28 + $0x10] sm:$0xff]   ;;  %v904_v19 = vshrl.u32 %v6199_v2, 16  ;;  %v778_v23 = vshll.u32 %v6227_v13, 16  ;;  %v782_v24 = vshrl.u32 %v6227_v13, 16 }
  0x4f   : > { %v6232_v15 = vcombine.low %v524_v12, %v534_v11  ;;  %v908_v20 = vrot.slane %v906_v10, 1  ;;  %v785_v25 = vshll.u32 %v6237_v17, 16  ;;  %v5801_v27 = vld [vmem:[%s6185_s30 + $0x10] sm:$0xff]   ;;  %v910_v29 = vshll.u32 %v6211_v6, 16  ;;  %v532_v30 = vld [vmem:[%s6185_s30 + $0x18] sm:$0xf] }
  0x50   : > { %5457 = vmatmul.mubr.msk.bf16.vlgmr.msra.gmra.mrb[0].mxu0 %vm573_vm1, %v6211_v6  ;;  %v772_v21 = vshrl.u32 %v5206_v9, 16  ;;  %v774_v22 = vshll.u32 %v5206_v9, 16  ;;  %v535_v32 = vld [vmem:[%s6185_s30 + $0x1c] sm:$0xf]  ;;  %5460 = vmatprep.mubr.msk.bf16.mxu1 %vm573_vm1, %v5801_v27  ;;  %v789_v34 = vshrl.u32 %v6237_v17, 16  ;;  %v917_v35 = vshll.u32 %v5801_v27, 16 }
  0x51   : > { %5465 = vmatpush3.bf16.msra.mxu0 %v5790_v4  ;;  %5468 = vmatprep.mubr.msk.bf16.mxu0 %vm573_vm1, %v5206_v9  ;;  %v793_v26 = vshll.u32 %v6232_v15, 16  ;;  %v5229_v36 = vcombine.low %v532_v30, %v535_v32  ;;  %v780_v37 = vrot.slane %v778_v23, 1  ;;  %v787_v38 = vrot.slane %v785_v25, 1  ;;  %v533_v41 = vld [vmem:[%s6185_s30 + $0x1c] sm:$0x7]  ;;  %s6004_s24 = smov 112  }
  0x52   : > { %5732 = vmatprep.subr.msk.bf16.mxu0 %vm586_vm0, %v5791_v8  ;;  %v776_v33 = vrot.slane %v774_v22, 1  ;;  %v797_v40 = vshrl.u32 %v6232_v15, 16  ;;  %v912_v42 = vrot.slane %v910_v29, 1  ;;  %v914_v43 = vshrl.u32 %v6211_v6, 16  ;;  %v525_v46 = vld [vmem:[%s6196_s28 + $0x1c] sm:$0x7] }
  0x53   : > { %v795_v39 = vrot.slane %v793_v26, 1  ;;  %v925_v44 = vshll.u32 %v5229_v36, 16  ;;  %v5199_v45 = vcombine.low %v532_v30, %v533_v41  ;;  %v921_v48 = vshrl.u32 %v5801_v27, 16  ;;  %v536_v0 = vld [vmem:[%s6196_s28] sm:$0xe]  ;;  %s6005_s25 = smov 120  }
  0x54   : > { %v919_v50 = vrot.slane %v917_v35, 1  ;;  %v777_v52 = vor.u32 %v776_v33, %v772_v21  ;;  %v5209_v53 = vcombine.low %v524_v12, %v525_v46  ;;  %v784_v55 = vor.u32 %v782_v24, %v780_v37  ;;  %v5804_v2 = vld [vmem:[%s7637_s2 + $0x38] ss:$0 sps:$4 sm:$0xff]   ;;  %v5246_v24 = vld [vmem:[%s7638_s3] ss:$0 sm:$0xff]  ;;  %s6006_s26 = smov 96  }
  0x55   : > { %5467 = vmatpush3.bf16.msra.mxu0 %v697_v16  ;;  %v927_v51 = vrot.slane %v925_v44, 1  ;;  %5461 = vmatmul.mubr.msk.bf16.vlgmr.msra.gmra.mrb[0].mxu1 %vm573_vm1, %v5199_v45  ;;  %v791_v56 = vor.u32 %v789_v34, %v787_v38  ;;  %v909_v60 = vor.u32 %v908_v20, %v904_v19  ;;  %v799_v61 = vor.u32 %v797_v40, %v795_v39  ;;  %v5810_v19 = vld [vmem:[%s7639_s4] sm:$0xff]   ;;  %s6007_s30 = smov 104   ;;  %s6008_s27 = smov 88  }
  0x56   : > { %5476 = vmatprep.subr.bf16.mxu0 %v5794_v14  ;;  %v781_v54 = vsel %vm771_vm2, %v777_v52, %v780_v37  ;;  %v788_v57 = vsel %vm771_vm2, %v784_v55, %v787_v38  ;;  %v916_v63 = vor.u32 %v914_v43, %v912_v42  ;;  %v923_v1 = vor.u32 %v921_v48, %v919_v50  ;;  %s6010_s28 = smov 4   ;;  %s6011_s19 = smov 124  }
  0x57   : > { %v796_v58 = vsel %vm771_vm2, %v791_v56, %v795_v39  ;;  %v913_v62 = vsel %vm771_vm2, %v909_v60, %v912_v42  ;;  %v5239_v5 = vcombine.low %v536_v0, %v6214_v7  ;;  %v929_v6 = vshrl.u32 %v5229_v36, 16  ;;  %v5813_v0 = vld [vmem:[%s7639_s4 + $0x30] sm:$0xff]   ;;  %s7292_s22 = sld [smem:[#allocation5]]  ;;  %s6013_s21 = smov 8  }
  0x58   : > { %v920_v3 = vsel %vm771_vm2, %v916_v63, %v919_v50  ;;  %v928_v4 = vsel %vm771_vm2, %v923_v1, %v927_v51  ;;  %v1066_v8 = vsel %vm586_vm0, %v5804_v2, 0  ;;  %v1038_v10 = vrot.slane %v6227_v13, 1  ;;  %v5812_v63 = vld [vmem:[%s7639_s4 + $0x10] sm:$0xff]   ;;  %s5192_s29 = sshll.u32 %s7721_s16, 3 }
  0x59   : > { %v1037_v9 = vrot.slane %v5239_v5, 1  ;;  %v931_v11 = vor.u32 %v929_v6, %v927_v51  ;;  %v1040_v7 = vrot.slane %v6237_v17, 1  ;;  %v5814_v6 = vld [vmem:[%s7639_s4 + $0x38] sm:$0xff]   ;;  %vm2546_vm8 = vcmask 1040384   ;;  %s516_s18 = scalar_lea.vmem %s7649_s14, %s5192_s29 }
  0x5a   : > { %vm2552_vm9 = vcmask 1041408   ;;  %vm2558_vm10 = vcmask 1042432   ;;  %vm2569_vm11 = vcmask 1044480   ;;  %vm2734_vm12 = vcmask 64512  }
  0x5b   : > { %v1039_v12 = vsel %vm1036_vm3, %v1037_v9, %v1038_v10  ;;  %v1041_v16 = vsel %vm1036_vm3, %v1038_v10, %v1040_v7  ;;  %v5815_v9 = vld [vmem:[%s7639_s4 + $0x40] sm:$0xff]   ;;  %v5816_v10 = vld [vmem:[%s7639_s4 + $0x48] sm:$0xff]   ;;  %vm3379_vm13 = vcmask 29696   ;;  %vm3622_vm14 = vcmask 1041409  }
  0x5c   : > { %5469 = vmatmul.mubr.msk.bf16.vlgmr.msra.gmra.mrb[0].mxu0 %vm573_vm1, %v6227_v13  ;;  %v5807_v13 = vld [vmem:[%s7639_s4 + $0x18] sm:$0xff]   ;;  %vm3624_vm15 = vcmask 1042434   ;;  %vm3626_vm2 = vcmask 1043459  }
  0x5d   : > { %5477 = vmatpush3.bf16.msra.mxu0 %v5794_v14  ;;  %5472 = vmatprep.mubr.msk.bf16.mxu0 %vm573_vm1, %v6237_v17  ;;  %v1042_v14 = vrot.slane %v6232_v15, 1  ;;  %v5808_v17 = vld [vmem:[%s7639_s4 + $0x20] sm:$0xff]   ;;  %v5809_v15 = vld [vmem:[%s7639_s4 + $0x28] sm:$0xff]  }
  0x5e   : > { %5733 = vmatprep.subr.msk.bf16.mxu0 %vm586_vm0, %v5798_v18  ;;  %5512 = vmatprep.subr.bf16.mxu1 %v5807_v13 }
  0x5f   : > { %v1043_v18 = vsel %vm1036_vm3, %v1040_v7, %v1042_v14  ;;  %5513 = vmatpush3.bf16.msra.mxu1 %v5807_v13  ;;  %vm3628_vm3 = vcmask 1044484  }
  0x60   : > { %5514 = vmatprep.subr.bf16.mxu1 %v5808_v17 }
  0x61   : > { %5479 = vmatpush3.bf16.msra.mxu0 %v822_v28 }
  0x62   : > { %5488 = vmatprep.subr.bf16.mxu0 %v5799_v49 }
  0x63   : > { %5515 = vmatpush3.bf16.msra.mxu1 %v5808_v17  ;;  %v5818_v17 = vld [vmem:[%s7639_s4 + $0x58] sm:$0xff]  }
  0x64   : > { %5473 = vmatmul.mubr.msk.bf16.gmra.mrb[4].mxu0 %vm573_vm1, %v5209_v53  ;;  %5516 = vmatprep.subr.bf16.mxu1 %v5809_v15 }
  0x65   : > { %5480 = vmatprep.mubr.msk.bf16.mxu0 %vm573_vm1, %v781_v54 }
  0x67   : > { %5517 = vmatpush3.bf16.msra.mxu1 %v5809_v15  ;;  %v5819_v15 = vld [vmem:[%s7639_s4 + $0x60] sm:$0xff]  }
  0x68   : > { %5522 = vmatprep.subr.bf16.mxu1 %v5810_v19 }
  0x6c   : > { %5481 = vmatmul.mubr.msk.bf16.vlgmr.msra.gmra.mrb[0].mxu0 %vm573_vm1, %v788_v57 }
  0x6d   : > { %5489 = vmatpush3.bf16.msra.mxu0 %v5799_v49  ;;  %5484 = vmatprep.mubr.msk.bf16.mxu0 %vm573_vm1, %v796_v58 }
  0x6e   : > { %5734 = vmatprep.subr.msk.bf16.mxu0 %vm586_vm0, %v5800_v31 }
  0x71   : > { %5491 = vmatpush3.bf16.msra.mxu0 %v954_v47 }
  0x72   : > { %5500 = vmatprep.subr.bf16.mxu0 %v5802_v59 }
  0x74   : > { %5485 = vmatmul.mubr.msk.bf16.gmra.mrb[4].mxu0 %vm573_vm1, %v799_v61  ;;  %v5811_v61 = vld [vmem:[%s7639_s4 + $0x8] sm:$0xff]  }
  0x75   : > { %5492 = vmatprep.mubr.msk.bf16.mxu0 %vm573_vm1, %v913_v62 }
  0x7c   : > { %5493 = vmatmul.mubr.msk.bf16.vlgmr.msra.gmra.mrb[0].mxu0 %vm573_vm1, %v920_v3 }
  0x7d   : > { %5501 = vmatpush3.bf16.msra.mxu0 %v5802_v59  ;;  %5496 = vmatprep.mubr.msk.bf16.mxu0 %vm573_vm1, %v928_v4 }
  0x7e   : > { %5735 = vmatprep.subr.msk.bf16.mxu0 %vm586_vm0, %v5804_v2 }
  0x81   : > { %5503 = vmatpush3.bf16.msra.mxu0 %v1066_v8 }
  0x84   : > { %5497 = vmatmul.mubr.msk.bf16.gmra.mrb[4].mxu0 %vm573_vm1, %v931_v11 }
  0x85   : > { %5504 = vmatprep.mubr.msk.bf16.mxu0 %vm573_vm1, %v1039_v12 }
  0x8c   : > { %5505 = vmatmul.mubr.msk.bf16.vlgmr.msra.gmra.mrb[0].mxu0 %vm573_vm1, %v1041_v16 }
  0x8d   : > { %5508 = vmatprep.mubr.msk.bf16.mxu0 %vm573_vm1, %v1043_v18  ;;  %v5817_v18 = vld [vmem:[%s7639_s4 + $0x50] sm:$0xff]  }
  0x94   : > { %5509 = vmatmul.mubr.msk.bf16.gmra.mrb[4].mxu0 %vm573_vm1, %v1042_v14 }
 0x128   : > { %v5462_v20 = vpop.f32.mrb[0].mxu1 }
 0x129   : > { %v640_v21 = vpop.f32.mrb[1].mxu1 }
 0x12a   : > { %v5463_v22 = vpop.f32.mrb[2].mxu1 }
 0x12b   : > { %v643_v23 = vpop.f32.mrb[3].mxu1 }
 0x15f   : > { %v5506_v25 = vpop.f32.mrb[0].mxu0 }
 0x160   : > { %v1150_v26 = vadd.f32 %v5506_v25, %v5246_v24  ;;  %v1102_v27 = vpop.f32.mrb[1].mxu0 }
 0x161   : > { %v1148_v28 = vadd.f32 %v5246_v24, %v1102_v27  ;;  %v5507_v29 = vpop.f32.mrb[2].mxu0 }
 0x162   : > { %v1158_v30 = vmax.f32 %v1150_v26, 0.0  ;;  %v1151_v31 = vadd.f32 %v5507_v29, %v5246_v24  ;;  %v1105_v32 = vpop.f32.mrb[3].mxu0  ;;  %v5821_v26 = vld [vmem:[%s7639_s4 + $0x70] sm:$0xff]  }
 0x163   : > { %v1156_v33 = vmax.f32 %v1148_v28, 0.0  ;;  %v1149_v34 = vadd.f32 %v5246_v24, %v1105_v32  ;;  %v7652_v32 = vmov 0.0  }
 0x164   : > { %1167 = vst.msk [vmem:[#allocation2 + $0x10] sm:$0xff] %vm1164_vm4, %v1158_v30  ;;  %v1159_v35 = vmax.f32 %v1151_v31, 0.0  ;;  %v5822_v30 = vld [vmem:[#allocation6 + $0x18] sm:$0xff]   ;;  %v5823_v31 = vld [vmem:[#allocation6 + $0x30] sm:$0xff]   ;;  %5582 = vmatprep.subr.bf16.mxu0 %v7652_v32  ;;  %5588 = vmatprep.mubr.msk.bf16.mxu0 %vm6002_vm6, %v7652_v32 }
 0x165   : > { %1165 = vst.msk [vmem:[#allocation2] sm:$0xff] %vm1164_vm4, %v1156_v33  ;;  %v1157_v36 = vmax.f32 %v1149_v34, 0.0  ;;  %5583 = vmatpush3.bf16.msra.mxu0 %v5823_v31  ;;  %v5824_v33 = vld [vmem:[#allocation6 + $0x20] sm:$0xff]   ;;  %v5825_v34 = vld [vmem:[#allocation6 + $0x38] sm:$0xff]  }
 0x166   : > { %1168 = vst.msk [vmem:[#allocation2 + $0x18] sm:$0xff] %vm1164_vm4, %v1159_v35  ;;  %5584 = vmatprep.subr.bf16.mxu0 %v7652_v32  ;;  %v5826_v35 = vld [vmem:[#allocation6 + $0x28] sm:$0xff]  }
 0x167   : > { %1166 = vst.msk [vmem:[#allocation2 + $0x8] sm:$0xff] %vm1164_vm4, %v1157_v36  ;;  %v5510_v37 = vpop.f32.mrb[4].mxu0  ;;  %v5827_v36 = vld [vmem:[#allocation6 + $0x40] sm:$0xff]  }
 0x168   : > { %v5682_v38 = vadd.f32 %v5510_v37, %v5462_v20  ;;  %v1118_v39 = vpop.f32.mrb[5].mxu0  ;;  %v5296_v37 = vld [vmem:[%s7640_s5] ss:$0 sm:$0xff] }
 0x169   : > { %v5683_v40 = vadd.f32 %v1118_v39, %v640_v21  ;;  %v5511_v41 = vpop.f32.mrb[6].mxu0  ;;  %5585 = vmatpush3.bf16.msra.mxu0 %v5825_v34 }
 0x16a   : > { %v1154_v42 = vadd.f32 %v5682_v38, %v5246_v24  ;;  %v5684_v43 = vadd.f32 %v5511_v41, %v5463_v22  ;;  %v1121_v44 = vpop.f32.mrb[7].mxu0  ;;  %5586 = vmatprep.subr.bf16.mxu0 %v7652_v32 }
 0x16b   : > { %v1152_v45 = vadd.f32 %v5683_v40, %v5246_v24  ;;  %v5685_v46 = vadd.f32 %v1121_v44, %v643_v23 }
 0x16c   : > { %v1162_v47 = vmax.f32 %v1154_v42, 0.0  ;;  %v1155_v48 = vadd.f32 %v5684_v43, %v5246_v24 }
 0x16d   : > { %v1160_v49 = vmax.f32 %v1152_v45, 0.0  ;;  %v1153_v50 = vadd.f32 %v5685_v46, %v5246_v24  ;;  %v1186_v51 = vld [vmem:[#allocation2 + $0x11] ss:$2 sm:$0xff]  ;;  %v1176_v56 = vld [vmem:[#allocation2 + $0x10] ss:$2 sm:$0xff]  ;;  %v5820_v24 = vld [vmem:[%s7639_s4 + $0x68] sm:$0xff]   ;;  %5587 = vmatpush3.bf16.msra.mxu0 %v5827_v36 }
 0x16e   : > { %1171 = vst.msk [vmem:[#allocation2 + $0x30] sm:$0xff] %vm1164_vm4, %v1162_v47  ;;  %v1163_v52 = vmax.f32 %v1155_v48, 0.0  ;;  %v1184_v53 = vld [vmem:[#allocation2 + $0x1] ss:$2 sm:$0xff]  ;;  %v1174_v58 = vld [vmem:[#allocation2] ss:$2 sm:$0xff]  ;;  %5602 = vmatprep.subr.bf16.mxu0 %v7652_v32 }
 0x16f   : > { %1169 = vst.msk [vmem:[#allocation2 + $0x20] sm:$0xff] %vm1164_vm4, %v1160_v49  ;;  %v1161_v54 = vmax.f32 %v1153_v50, 0.0  ;;  %v1191_v55 = vpack.c.bf16 %v1186_v51, %v1184_v53  ;;  %v1181_v62 = vpack.c.bf16 %v1176_v56, %v1174_v58  ;;  %v1194_v5 = vld [vmem:[#allocation2 + $0x2] ss:$2 sm:$0xff]  ;;  %v1204_v16 = vld [vmem:[#allocation2 + $0x3] ss:$2 sm:$0xff] }
 0x170   : > { %1173 = vst.msk [vmem:[#allocation2 + $0x38] sm:$0x3f] %vm1172_vm5, %v1163_v52  ;;  %v1214_v23 = vld [vmem:[#allocation2 + $0x4] ss:$2 sm:$0xff]  ;;  %v5830_v58 = vld [vmem:[#allocation6 + $0x8] sm:$0xff]   ;;  %vm3657_vm5 = vcmask 46080  }
 0x171   : > { %1170 = vst.msk [vmem:[#allocation2 + $0x28] sm:$0xff] %vm1164_vm4, %v1161_v54  ;;  %5518 = vmatprep.mubr.msk.bf16.mxu1 %vm1164_vm4, %v1191_v55  ;;  %v5828_v50 = vld [vmem:[#allocation6] sm:$0xff]  }
 0x172   : > { %v5829_v55 = vld [vmem:[#allocation6 + $0x60] sm:$0xff]  }
 0x176   : > { %v1196_v3 = vld [vmem:[#allocation2 + $0x12] ss:$2 sm:$0xff]  ;;  %v1206_v7 = vld [vmem:[#allocation2 + $0x13] ss:$2 sm:$0xff] }
 0x177   : > { %v1190_v57 = vld [vmem:[#allocation2 + $0x31] ss:$2 sm:$0x1f]  ;;  %v1180_v2 = vld [vmem:[#allocation2 + $0x30] ss:$2 sm:$0x1f]  ;;  %v1201_v8 = vpack.c.bf16 %v1196_v3, %v1194_v5  ;;  %v1211_v13 = vpack.c.bf16 %v1206_v7, %v1204_v16 }
 0x178   : > { %v1188_v59 = vld [vmem:[#allocation2 + $0x21] ss:$2 sm:$0xff]  ;;  %v1178_v1 = vld [vmem:[#allocation2 + $0x20] ss:$2 sm:$0xff]  ;;  %v5841_v16 = vld [vmem:[#allocation8 + $0x28] sm:$0xff]  }
 0x179   : > { %v1192_v60 = vpack.c.bf16 %v1190_v57, %v1188_v59  ;;  %v1182_v4 = vpack.c.bf16 %v1180_v2, %v1178_v1  ;;  %v1198_v11 = vld [vmem:[#allocation2 + $0x22] ss:$2 sm:$0xff]  ;;  %v1200_v12 = vld [vmem:[#allocation2 + $0x32] ss:$2 sm:$0x1f] }
 0x17a   : > { %v1202_v14 = vpack.c.bf16 %v1200_v12, %v1198_v11  ;;  %v1210_v20 = vld [vmem:[#allocation2 + $0x33] ss:$2 sm:$0x1f]  ;;  %v1216_v21 = vld [vmem:[#allocation2 + $0x14] ss:$2 sm:$0xff]  ;;  %v5838_v12 = vld [vmem:[#allocation8] sm:$0xff]  }
 0x17b   : > { %5519 = vmatmul.mubr.msk.bf16.vlgmr.msra.gmra.mrb[4].mxu1 %vm1164_vm4, %v1192_v60  ;;  %v1221_v25 = vpack.c.bf16 %v1216_v21, %v1214_v23  ;;  %v1218_v27 = vld [vmem:[#allocation2 + $0x24] ss:$2 sm:$0xff]  ;;  %v1220_v28 = vld [vmem:[#allocation2 + $0x34] ss:$2 sm:$0x1f] }
 0x17c   : > { %5523 = vmatpush3.bf16.msra.mxu1 %v5810_v19  ;;  %5528 = vmatprep.mubr.msk.bf16.mxu1 %vm1164_vm4, %v1181_v62  ;;  %v1208_v19 = vld [vmem:[#allocation2 + $0x23] ss:$2 sm:$0xff]  ;;  %v1222_v29 = vpack.c.bf16 %v1220_v28, %v1218_v27  ;;  %v5831_v59 = vld [vmem:[#allocation6 + $0x68] sm:$0xff]  }
 0x17d   : > { %5524 = vmatprep.subr.bf16.mxu1 %v5811_v61  ;;  %v1212_v22 = vpack.c.bf16 %v1210_v20, %v1208_v19  ;;  %v5832_v60 = vld [vmem:[#allocation6 + $0x10] sm:$0xff]   ;;  %v5834_v2 = vld [vmem:[#allocation6 + $0x48] sm:$0xff]   ;;  %v5839_v7 = vld [vmem:[#allocation8 + $0x20] sm:$0xff]  }
 0x17e   : > { %v5835_v5 = vld [vmem:[#allocation6 + $0x50] sm:$0xff]  }
 0x17f   : > { %v5837_v11 = vld [vmem:[#allocation8 + $0x18] sm:$0xff]  }
 0x180   : > { %5525 = vmatpush3.bf16.msra.mxu1 %v5811_v61  ;;  %v5833_v61 = vld [vmem:[#allocation6 + $0x70] sm:$0xff]  }
 0x181   : > { %5526 = vmatprep.subr.bf16.mxu1 %v5812_v63 }
 0x184   : > { %5527 = vmatpush3.bf16.msra.mxu1 %v5812_v63 }
 0x185   : > { %5532 = vmatprep.subr.bf16.mxu1 %v5813_v0 }
 0x187   : > { %5529 = vmatmul.mubr.msk.bf16.vlgmr.msra.gmra.mrb[4].mxu1 %vm1164_vm4, %v1182_v4 }
 0x188   : > { %5533 = vmatpush3.bf16.msra.mxu1 %v5813_v0  ;;  %5538 = vmatprep.mubr.msk.bf16.mxu1 %vm1164_vm4, %v1201_v8 }
 0x189   : > { %5534 = vmatprep.subr.bf16.mxu1 %v5814_v6 }
 0x18c   : > { %5535 = vmatpush3.bf16.msra.mxu1 %v5814_v6  ;;  %v5836_v6 = vld [vmem:[#allocation6 + $0x58] sm:$0xff]  }
 0x18d   : > { %5536 = vmatprep.subr.bf16.mxu1 %v5815_v9 }
 0x190   : > { %5537 = vmatpush3.bf16.msra.mxu1 %v5815_v9 }
 0x191   : > { %5542 = vmatprep.subr.bf16.mxu1 %v5816_v10 }
 0x193   : > { %5539 = vmatmul.mubr.msk.bf16.vlgmr.msra.gmra.mrb[4].mxu1 %vm1164_vm4, %v1202_v14  ;;  %v5840_v14 = vld [vmem:[#allocation8 + $0x8] sm:$0xff]  }
 0x194   : > { %5543 = vmatpush3.bf16.msra.mxu1 %v5816_v10  ;;  %5548 = vmatprep.mubr.msk.bf16.mxu1 %vm1164_vm4, %v1211_v13 }
 0x195   : > { %5544 = vmatprep.subr.bf16.mxu1 %v5817_v18 }
 0x198   : > { %5545 = vmatpush3.bf16.msra.mxu1 %v5817_v18  ;;  %v5842_v18 = vld [vmem:[#allocation8 + $0x10] sm:$0xff]  }
 0x199   : > { %5546 = vmatprep.subr.bf16.mxu1 %v5818_v17 }
 0x19c   : > { %5547 = vmatpush3.bf16.msra.mxu1 %v5818_v17 }
 0x19d   : > { %5552 = vmatprep.subr.bf16.mxu1 %v5819_v15 }
 0x19f   : > { %5549 = vmatmul.mubr.msk.bf16.vlgmr.msra.gmra.mrb[4].mxu1 %vm1164_vm4, %v1212_v22 }
 0x1a0   : > { %5553 = vmatpush3.bf16.msra.mxu1 %v5819_v15  ;;  %5558 = vmatprep.mubr.msk.bf16.mxu1 %vm1164_vm4, %v1221_v25 }
 0x1a1   : > { %5554 = vmatprep.subr.bf16.mxu1 %v5820_v24 }
 0x1a4   : > { %5555 = vmatpush3.bf16.msra.mxu1 %v5820_v24 }
 0x1a5   : > { %5556 = vmatprep.subr.bf16.mxu1 %v5821_v26 }
 0x1a8   : > { %5557 = vmatpush3.bf16.msra.mxu1 %v5821_v26 }
 0x1a9   : > { %5562 = vmatprep.subr.bf16.mxu1 %v7652_v32 }
 0x1ab   : > { %5559 = vmatmul.mubr.msk.bf16.vlgmr.msra.gmra.mrb[4].mxu1 %vm1164_vm4, %v1222_v29 }
 0x1ac   : > { %5563 = vmatpush3.bf16.msra.mxu1 %v5822_v30  ;;  %5568 = vmatprep.mubr.msk.bf16.mxu1 %vm6002_vm6, %v7652_v32 }
 0x1ad   : > { %5564 = vmatprep.subr.bf16.mxu1 %v7652_v32 }
 0x1b0   : > { %5565 = vmatpush3.bf16.msra.mxu1 %v5824_v33 }
 0x1b1   : > { %5566 = vmatprep.subr.bf16.mxu1 %v7652_v32 }
 0x1b4   : > { %5567 = vmatpush3.bf16.msra.mxu1 %v5826_v35 }
 0x1b5   : > { %5572 = vmatprep.subr.bf16.mxu1 %v7652_v32 }
 0x27e   : > { %v5560_v38 = vpop.f32.mrb[4].mxu1 }
 0x27f   : > { %v1643_v39 = vadd.f32 %v5560_v38, %v5296_v37  ;;  %v1615_v40 = vpop.f32.mrb[5].mxu1 }
 0x280   : > { %v1641_v41 = vadd.f32 %v5296_v37, %v1615_v40  ;;  %v5561_v42 = vpop.f32.mrb[6].mxu1  ;;  %v5317_v40 = vld [vmem:[%s7642_s7] ss:$0 sm:$0xff] }
 0x281   : > { %v1647_v43 = vmax.f32 %v1643_v39, 0.0  ;;  %v1644_v44 = vadd.f32 %v5561_v42, %v5296_v37  ;;  %v1618_v45 = vpop.f32.mrb[7].mxu1 }
 0x282   : > { %v1645_v46 = vmax.f32 %v1641_v41, 0.0  ;;  %v1642_v47 = vadd.f32 %v5296_v37, %v1618_v45 }
 0x283   : > { %1651 = vst.msk [vmem:[#allocation3 + $0x10] sm:$0xff] %vm1164_vm4, %v1647_v43  ;;  %v1648_v48 = vmax.f32 %v1644_v44, 0.0 }
 0x284   : > { %1649 = vst.msk [vmem:[#allocation3] sm:$0xff] %vm1164_vm4, %v1645_v46  ;;  %v1646_v49 = vmax.f32 %v1642_v47, 0.0 }
 0x285   : > { %1653 = vst.msk [vmem:[#allocation3 + $0x18] sm:$0x1f] %vm1652_vm7, %v1648_v48 }
 0x286   : > { %1650 = vst.msk [vmem:[#allocation3 + $0x8] sm:$0xff] %vm1164_vm4, %v1646_v49 }
 0x28c   : > { %v1661_v51 = vld [vmem:[#allocation3 + $0x11] ss:$2 sm:$0x1f]  ;;  %v1666_v52 = vld [vmem:[#allocation3 + $0x12] ss:$2 sm:$0x1f] }
 0x28d   : > { %v1659_v53 = vld [vmem:[#allocation3 + $0x1] ss:$2 sm:$0xff]  ;;  %v1664_v54 = vld [vmem:[#allocation3 + $0x2] ss:$2 sm:$0xff] }
 0x28e   : > { %v1662_v56 = vpack.c.bf16 %v1661_v51, %v1659_v53  ;;  %v1667_v57 = vpack.c.bf16 %v1666_v52, %v1664_v54  ;;  %v1654_v62 = vld [vmem:[#allocation3] ss:$2 sm:$0xff]  ;;  %v1656_v63 = vld [vmem:[#allocation3 + $0x10] ss:$2 sm:$0x1f] }
 0x28f   : > { %v1674_v0 = vld [vmem:[#allocation3 + $0x4] ss:$2 sm:$0xff]  ;;  %v1676_v1 = vld [vmem:[#allocation3 + $0x14] ss:$2 sm:$0x1f]  ;;  %v1657_v3 = vpack.c.bf16 %v1656_v63, %v1654_v62 }
 0x290   : > { %5569 = vmatmul.mubr.msk.bf16.vlgmr.msra.gmra.mrb[8].mxu1 %vm1164_vm4, %v1662_v56  ;;  %5589 = vmatmul.mubr.msk.bf16.vlgmr.msra.gmra.mrb[8].mxu0 %vm1164_vm4, %v1667_v57  ;;  %v1677_v4 = vpack.c.bf16 %v1676_v1, %v1674_v0  ;;  %v1669_v8 = vld [vmem:[#allocation3 + $0x3] ss:$2 sm:$0xff]  ;;  %v1671_v9 = vld [vmem:[#allocation3 + $0x13] ss:$2 sm:$0x1f] }
 0x291   : > { %5573 = vmatpush3.bf16.msra.mxu1 %v5828_v50  ;;  %5603 = vmatpush3.bf16.msra.mxu0 %v5829_v55  ;;  %v1672_v10 = vpack.c.bf16 %v1671_v9, %v1669_v8  ;;  %v5843_v50 = vld [vmem:[#allocation8 + $0x30] sm:$0xff]   ;;  %v5844_v51 = vld [vmem:[#allocation8 + $0x48] sm:$0xff]   ;;  %v5845_v56 = vld [vmem:[#allocation8 + $0x38] sm:$0xff]  }
 0x292   : > { %5574 = vmatprep.subr.bf16.mxu1 %v7652_v32  ;;  %5604 = vmatprep.subr.bf16.mxu0 %v7652_v32  ;;  %v5846_v57 = vld [vmem:[#allocation8 + $0x50] sm:$0xff]   ;;  %v5849_v62 = vld [vmem:[#allocation8 + $0x60] sm:$0xff]   ;;  %v5850_v1 = vld [vmem:[#allocation8 + $0x68] sm:$0xff]  }
 0x293   : > { %5578 = vmatprep.mubr.msk.bf16.mxu1 %vm6002_vm6, %v7652_v32  ;;  %5608 = vmatprep.mubr.msk.bf16.mxu0 %vm6002_vm6, %v7652_v32 }
 0x295   : > { %5575 = vmatpush3.bf16.msra.mxu1 %v5830_v58  ;;  %5605 = vmatpush3.bf16.msra.mxu0 %v5831_v59  ;;  %v5847_v58 = vld [vmem:[#allocation8 + $0x40] sm:$0xff]   ;;  %v5848_v59 = vld [vmem:[#allocation8 + $0x58] sm:$0xff]  }
 0x296   : > { %5576 = vmatprep.subr.bf16.mxu1 %v7652_v32  ;;  %5606 = vmatprep.subr.bf16.mxu0 %v7652_v32 }
 0x299   : > { %5577 = vmatpush3.bf16.msra.mxu1 %v5832_v60  ;;  %5607 = vmatpush3.bf16.msra.mxu0 %v5833_v61 }
 0x29a   : > { %5592 = vmatprep.subr.bf16.mxu1 %v7652_v32  ;;  %5622 = vmatprep.subr.bf16.mxu0 %v7652_v32 }
 0x29c   : > { %5579 = vmatmul.mubr.msk.bf16.vlgmr.msra.gmra.mrb[12].mxu1 %vm1164_vm4, %v1657_v3  ;;  %5609 = vmatmul.mubr.msk.bf16.vlgmr.msra.gmra.mrb[12].mxu0 %vm1164_vm4, %v1677_v4 }
 0x29d   : > { %5593 = vmatpush3.bf16.msra.mxu1 %v5834_v2  ;;  %5598 = vmatprep.mubr.msk.bf16.mxu1 %vm6002_vm6, %v7652_v32  ;;  %v5851_v2 = vld [vmem:[#allocation8 + $0x70] sm:$0xff]  }
 0x29e   : > { %5594 = vmatprep.subr.bf16.mxu1 %v7652_v32  ;;  %5628 = vmatprep.mubr.msk.bf16.mxu0 %vm6002_vm6, %v7652_v32 }
 0x29f   : > { %5623 = vmatpush3.bf16.msra.mxu0 %v5838_v12 }
 0x2a0   : > { %5624 = vmatprep.subr.bf16.mxu0 %v7652_v32 }
 0x2a1   : > { %5595 = vmatpush3.bf16.msra.mxu1 %v5835_v5 }
 0x2a2   : > { %5596 = vmatprep.subr.bf16.mxu1 %v7652_v32 }
 0x2a3   : > { %5625 = vmatpush3.bf16.msra.mxu0 %v5840_v14 }
 0x2a4   : > { %5626 = vmatprep.subr.bf16.mxu0 %v7652_v32 }
 0x2a5   : > { %5597 = vmatpush3.bf16.msra.mxu1 %v5836_v6 }
 0x2a6   : > { %5612 = vmatprep.subr.bf16.mxu1 %v7652_v32 }
 0x2a7   : > { %5627 = vmatpush3.bf16.msra.mxu0 %v5842_v18 }
 0x2a8   : > { %5599 = vmatmul.mubr.msk.bf16.vlgmr.msra.gmra.mrb[16].mxu1 %vm1164_vm4, %v1672_v10  ;;  %5642 = vmatprep.subr.bf16.mxu0 %v7652_v32 }
 0x2a9   : > { %5618 = vmatprep.mubr.msk.bf16.mxu1 %vm6002_vm6, %v7652_v32  ;;  %5613 = vmatpush3.bf16.msra.mxu1 %v5837_v11 }
 0x2aa   : > { %5614 = vmatprep.subr.bf16.mxu1 %v7652_v32 }
 0x2ad   : > { %5615 = vmatpush3.bf16.msra.mxu1 %v5839_v7 }
 0x2ae   : > { %5616 = vmatprep.subr.bf16.mxu1 %v7652_v32 }
 0x2b1   : > { %5617 = vmatpush3.bf16.msra.mxu1 %v5841_v16 }
 0x2b2   : > { %5632 = vmatprep.subr.bf16.mxu1 %v7652_v32 }
 0x363   : > { %v1746_v13 = vpop.f32.mrb[8].mxu1  ;;  %v1877_v17 = vpop.f32.mrb[8].mxu0 }
 0x364   : > { %v5570_v15 = vpop.f32.mrb[9].mxu1  ;;  %v5590_v19 = vpop.f32.mrb[9].mxu0 }
 0x365   : > { %v1749_v20 = vpop.f32.mrb[10].mxu1  ;;  %v1880_v21 = vpop.f32.mrb[10].mxu0 }
 0x366   : > { %v5571_v22 = vpop.f32.mrb[11].mxu1  ;;  %v5591_v23 = vpop.f32.mrb[11].mxu0 }
 0x36f   : > { %v1808_v24 = vpop.f32.mrb[12].mxu1  ;;  %v2019_v25 = vpop.f32.mrb[12].mxu0 }
 0x370   : > { %v1809_v26 = vadd.f32 %v1808_v24, %v1746_v13  ;;  %v5580_v27 = vpop.f32.mrb[13].mxu1  ;;  %v5610_v28 = vpop.f32.mrb[13].mxu0  ;;  %v6003_v24 = vmov 1966171168  }
 0x371   : > { %v1811_v29 = vpop.f32.mrb[14].mxu1  ;;  %v2022_v30 = vpop.f32.mrb[14].mxu0 }
 0x372   : > { %v1812_v31 = vadd.f32 %v1811_v29, %v1749_v20  ;;  %v5581_v33 = vpop.f32.mrb[15].mxu1  ;;  %v5611_v34 = vpop.f32.mrb[15].mxu0  ;;  %v1884_v35 = vadd.f32 %v1877_v17, %v1809_v26  ;;  %v2411_v26 = vlaneseq }
 0x374   : > { %v1885_v36 = vadd.f32 %v1880_v21, %v1812_v31  ;;  %v6442_v28 = vshrl.u32 %v2411_v26, 7 }
 0x37b   : > { %v1948_v37 = vpop.f32.mrb[16].mxu1 }
 0x37c   : > { %v1955_v38 = vadd.f32 %v1948_v37, %v1884_v35  ;;  %v5600_v39 = vpop.f32.mrb[17].mxu1 }
 0x37d   : > { %v1951_v41 = vpop.f32.mrb[18].mxu1 }
 0x37e   : > { %v2026_v42 = vadd.f32 %v2019_v25, %v1955_v38  ;;  %v1956_v43 = vadd.f32 %v1951_v41, %v1885_v36  ;;  %v5601_v44 = vpop.f32.mrb[19].mxu1  ;;  %v2409_v25 = vunpack.c.l.s4 %v6003_v24 }
 0x380   : > { %v2035_v45 = vadd.f32 %v5317_v40, %v2026_v42  ;;  %v2027_v46 = vadd.f32 %v2022_v30, %v1956_v43  ;;  %v2410_v27 = vunpack.c.0.s8 %v2409_v25  ;;  %v5338_v30 = vld [vmem:[%s7644_s9] ss:$0 sm:$0xff] }
 0x382   : > { %v2037_v47 = vmax.f32 %v2035_v45, 0.0  ;;  %v2036_v48 = vadd.f32 %v5317_v40, %v2027_v46  ;;  %v6448_v36 = vsub.s32 %v2410_v27, %v6442_v28  ;;  %v6452_v40 = vsub.s32 0, %v6442_v28 }
 0x384   : > { %2039 = vst.msk [vmem:[#allocation4] sm:$0xff] %vm1164_vm4, %v2037_v47  ;;  %v2038_v49 = vmax.f32 %v2036_v48, 0.0 }
 0x386   : > { %2040 = vst.msk [vmem:[#allocation4 + $0x8] sm:$0x1f] %vm1652_vm7, %v2038_v49  ;;  %vm5010_vm7 = vcmask 130048  }
 0x38d   : > { %v2044_v52 = vld [vmem:[#allocation4 + $0x1] ss:$2 sm:$0x1f]  ;;  %v2041_v53 = vld [vmem:[#allocation4] ss:$2 sm:$0x1f] }
 0x38e   : > { %v2045_v54 = vpack.c.bf16 %v2044_v52, %v2044_v52  ;;  %v2042_v55 = vpack.c.bf16 %v2041_v53, %v2041_v53  ;;  %v2047_v60 = vld [vmem:[#allocation4 + $0x2] ss:$2 sm:$0x1f]  ;;  %v2050_v61 = vld [vmem:[#allocation4 + $0x3] ss:$2 sm:$0x1f] }
 0x38f   : > { %v2048_v63 = vpack.c.bf16 %v2047_v60, %v2047_v60  ;;  %v2051_v0 = vpack.c.bf16 %v2050_v61, %v2050_v61  ;;  %v2053_v3 = vld [vmem:[#allocation4 + $0x4] ss:$2 sm:$0x1f] }
 0x390   : > { %5619 = vmatmul.mubr.msk.bf16.vlgmr.msra.gmra.mrb[20].mxu1 %vm1164_vm4, %v2045_v54  ;;  %5629 = vmatmul.mubr.msk.bf16.vlgmr.msra.gmra.mrb[16].mxu0 %vm1164_vm4, %v2042_v55  ;;  %v2054_v4 = vpack.c.bf16 %v2053_v3, %v2053_v3  ;;  %v2733_v54 = vld [vmem:[%s7645_s10] sm:$0xf] }
 0x391   : > { %5633 = vmatpush3.bf16.msra.mxu1 %v5843_v50  ;;  %5643 = vmatpush3.bf16.msra.mxu0 %v5844_v51  ;;  %v2742_v55 = vsel %vm586_vm0, %v2733_v54, 0 }
 0x392   : > { %5634 = vmatprep.subr.bf16.mxu1 %v7652_v32  ;;  %5644 = vmatprep.subr.bf16.mxu0 %v7652_v32 }
 0x393   : > { %5638 = vmatprep.mubr.msk.bf16.mxu1 %vm6002_vm6, %v7652_v32  ;;  %5648 = vmatprep.mubr.msk.bf16.mxu0 %vm6002_vm6, %v7652_v32 }
 0x395   : > { %5635 = vmatpush3.bf16.msra.mxu1 %v5845_v56  ;;  %5645 = vmatpush3.bf16.msra.mxu0 %v5846_v57 }
 0x396   : > { %5636 = vmatprep.subr.bf16.mxu1 %v7652_v32  ;;  %5646 = vmatprep.subr.bf16.mxu0 %v7652_v32 }
 0x399   : > { %5637 = vmatpush3.bf16.msra.mxu1 %v5847_v58  ;;  %5647 = vmatpush3.bf16.msra.mxu0 %v5848_v59 }
 0x39a   : > { %5652 = vmatprep.subr.bf16.mxu1 %v7652_v32  ;;  %5736 = vmatprep.subr.msk.bf16.mxu0 %vm586_vm0, %v2733_v54 }
 0x39c   : > { %5639 = vmatmul.mubr.msk.bf16.vlgmr.msra.gmra.mrb[24].mxu1 %vm1164_vm4, %v2048_v63  ;;  %5649 = vmatmul.mubr.msk.bf16.vlgmr.msra.gmra.mrb[20].mxu0 %vm1164_vm4, %v2051_v0 }
 0x39d   : > { %5653 = vmatpush3.bf16.msra.mxu1 %v5849_v62  ;;  %5658 = vmatprep.mubr.msk.bf16.mxu1 %vm6002_vm6, %v7652_v32 }
 0x39e   : > { %5654 = vmatprep.subr.bf16.mxu1 %v7652_v32  ;;  %5663 = vmatpush3.bf16.msra.mxu0 %v2742_v55 }
 0x39f   : > { %5668 = vmatprep.subr.bf16.mxu0 %v7652_v32 }
 0x3a1   : > { %5655 = vmatpush3.bf16.msra.mxu1 %v5850_v1 }
 0x3a2   : > { %5656 = vmatprep.subr.bf16.mxu1 %v7652_v32 }
 0x3a5   : > { %5657 = vmatpush3.bf16.msra.mxu1 %v5851_v2  ;;  %v6009_v2 = vmov 1983009808  }
 0x3a6   : > { %v2582_v3 = vunpack.c.l.s4 %v6009_v2 }
 0x3a8   : > { %5659 = vmatmul.mubr.msk.bf16.vlgmr.msra.gmra.mrb[28].mxu1 %vm1164_vm4, %v2054_v4  ;;  %vm3630_vm4 = vcmask 1045509  }
 0x463   : > { %v2123_v5 = vpop.f32.mrb[20].mxu1  ;;  %v2184_v6 = vpop.f32.mrb[16].mxu0 }
 0x464   : > { %v2185_v8 = vadd.f32 %v2184_v6, %v2123_v5  ;;  %v5620_v9 = vpop.f32.mrb[21].mxu1  ;;  %v5630_v10 = vpop.f32.mrb[17].mxu0 }
 0x465   : > { %v2126_v11 = vpop.f32.mrb[22].mxu1  ;;  %v2187_v12 = vpop.f32.mrb[18].mxu0 }
 0x466   : > { %v5621_v7 = vpop.f32.mrb[23].mxu1  ;;  %v5631_v14 = vpop.f32.mrb[19].mxu0 }
 0x46f   : > { %v2252_v16 = vpop.f32.mrb[24].mxu1  ;;  %v2321_v18 = vpop.f32.mrb[20].mxu0 }
 0x470   : > { %v2258_v13 = vadd.f32 %v2252_v16, %v2185_v8  ;;  %v5640_v17 = vpop.f32.mrb[25].mxu1  ;;  %v5650_v15 = vpop.f32.mrb[21].mxu0  ;;  %v2583_v8 = vunpack.c.0.s8 %v2582_v3 }
 0x471   : > { %v2255_v19 = vpop.f32.mrb[26].mxu1  ;;  %v2324_v20 = vpop.f32.mrb[22].mxu0 }
 0x472   : > { %v2327_v21 = vadd.f32 %v2321_v18, %v2258_v13  ;;  %v5641_v22 = vpop.f32.mrb[27].mxu1  ;;  %v5651_v23 = vpop.f32.mrb[23].mxu0  ;;  %v6502_v7 = vsub.s32 %v2583_v8, %v6442_v28 }
 0x47b   : > { %v2390_v29 = vpop.f32.mrb[28].mxu1 }
 0x47c   : > { %v2396_v31 = vadd.f32 %v2390_v29, %v2327_v21  ;;  %v5660_v33 = vpop.f32.mrb[29].mxu1 }
 0x47d   : > { %v2393_v34 = vpop.f32.mrb[30].mxu1 }
 0x47e   : > { %v2404_v35 = vadd.f32 %v5338_v30, %v2396_v31  ;;  %v5661_v37 = vpop.f32.mrb[31].mxu1 }
 0x480   : > { %v2405_v38 = vmax.f32 %v2404_v35, 0.0 }
 0x482   : > { %v2414_v39 = vrot.slane %v2405_v38, %v6448_v36  ;;  %v2407_v43 = vcombine.high %v2405_v38, %v2405_v38 }
 0x484   : > { %v2429_v41 = vrot.slane %v2414_v39, %v6448_v36  ;;  %v2422_v44 = vcombine.high %v2414_v39, %v2414_v39  ;;  %v2421_v46 = vrot.slane %v2407_v43, %v6448_v36 }
 0x486   : > { %v2454_v42 = vrot.slane %v2429_v41, %v6452_v40  ;;  %v6458_v45 = vcombine.high %v2429_v41, %v2429_v41  ;;  %v2443_v47 = vrot.slane %v2422_v44, %v6448_v36  ;;  %v6468_v49 = vrot.slane %v2421_v46, %v6448_v36 }
 0x488   : > { %2486 = vrot.lane.b32.xlu1 %v2454_v42, %s6004_s24  ;;  %2471 = vrot.lane.b32.xlu0 %v2454_v42, %s6005_s25  ;;  %v2462_v48 = vrot.slane %v6458_v45, %v6452_v40  ;;  %v2458_v50 = vrot.slane %v2443_v47, %v6452_v40  ;;  %v2470_v51 = vrot.slane %v6468_v49, %v6452_v40 }
 0x489   : > { %v6480_v52 = vcombine.high %v2443_v47, %v2443_v47 }
 0x48b   : > { %v2466_v53 = vrot.slane %v6480_v52, %v6452_v40 }
 0x48c   : > { %2516 = vrot.lane.b32.xlu1 %v2454_v42, %s6006_s26  ;;  %2501 = vrot.lane.b32.xlu0 %v2454_v42, %s6007_s30 }
 0x490   : > { %2531 = vrot.lane.b32.xlu0 %v2454_v42, %s6008_s27  ;;  %2475 = vrot.lane.b32.xlu1 %v2462_v48, %s6005_s25 }
 0x494   : > { %2490 = vrot.lane.b32.xlu1 %v2462_v48, %s6004_s24  ;;  %2473 = vrot.lane.b32.xlu0 %v2458_v50, %s6005_s25 }
 0x498   : > { %2494 = vrot.lane.b32.xlu1 %v2470_v51, %s6004_s24  ;;  %2479 = vrot.lane.b32.xlu0 %v2470_v51, %s6005_s25 }
 0x49c   : > { %2503 = vrot.lane.b32.xlu1 %v2458_v50, %s6007_s30  ;;  %2488 = vrot.lane.b32.xlu0 %v2458_v50, %s6004_s24 }
 0x4a0   : > { %2520 = vrot.lane.b32.xlu1 %v2462_v48, %s6006_s26  ;;  %2505 = vrot.lane.b32.xlu0 %v2462_v48, %s6007_s30 }
 0x4a4   : > { %2524 = vrot.lane.b32.xlu1 %v2470_v51, %s6006_s26  ;;  %2509 = vrot.lane.b32.xlu0 %v2470_v51, %s6007_s30 }
 0x4a8   : > { %2533 = vrot.lane.b32.xlu1 %v2458_v50, %s6008_s27  ;;  %2518 = vrot.lane.b32.xlu0 %v2458_v50, %s6006_s26 }
 0x4ac   : > { %2477 = vrot.lane.b32.xlu1 %v2466_v53, %s6005_s25  ;;  %2535 = vrot.lane.b32.xlu0 %v2462_v48, %s6008_s27 }
 0x4b0   : > { %2507 = vrot.lane.b32.xlu1 %v2466_v53, %s6007_s30  ;;  %2492 = vrot.lane.b32.xlu0 %v2466_v53, %s6004_s24  ;;  %s6014_s24 = smov 24  }
 0x4b4   : > { %2537 = vrot.lane.b32.xlu1 %v2466_v53, %s6008_s27  ;;  %2522 = vrot.lane.b32.xlu0 %v2466_v53, %s6006_s26 }
 0x4b8   : > { %2539 = vrot.lane.b32.xlu0 %v2470_v51, %s6008_s27  ;;  %s6016_s27 = smov 32  }
 0x4fa   : > { %v2487_v56 = vpop.permute.xlu1 %2486  ;;  %v2472_v57 = vpop.permute.xlu0 %2471 }
 0x4fb   : > { %v2547_v4 = vsel %vm2546_vm8, %v2429_v41, %v2472_v57 }
 0x4fc   : > { %v2553_v9 = vsel %vm2552_vm9, %v2547_v4, %v2487_v56 }
 0x4fe   : > { %v2517_v58 = vpop.permute.xlu1 %2516  ;;  %v2502_v59 = vpop.permute.xlu0 %2501 }
 0x4ff   : > { %v2559_v10 = vsel %vm2558_vm10, %v2553_v9, %v2502_v59 }
 0x500   : > { %v2564_v14 = vsel %vm586_vm0, %v2559_v10, %v2517_v58 }
 0x502   : > { %v2532_v60 = vpop.permute.xlu0 %2531  ;;  %v2476_v61 = vpop.permute.xlu1 %2475 }
 0x503   : > { %v6506_v16 = vsel %vm2569_vm11, %v2564_v14, %v2532_v60  ;;  %v2549_v19 = vsel %vm2546_vm8, %v6458_v45, %v2476_v61 }
 0x504   : > { %7676 = vst [vmem:[#allocation12_spill] sm:$0xff] %v6506_v16  ;;  %v2587_v20 = vrot.slane %v6506_v16, %v6502_v7  ;;  %v2580_v25 = vcombine.high %v6506_v16, %v6506_v16 }
 0x506   : > { %v2491_v62 = vpop.permute.xlu1 %2490  ;;  %v2474_v63 = vpop.permute.xlu0 %2473  ;;  %v2595_v31 = vcombine.high %v2587_v20, %v2587_v20  ;;  %v2594_v39 = vrot.slane %v2580_v25, %v6502_v7 }
 0x507   : > { %v2548_v18 = vsel %vm2546_vm8, %v2443_v47, %v2474_v63  ;;  %v2555_v21 = vsel %vm2552_vm9, %v2549_v19, %v2491_v62 }
 0x508   : > { %v2660_v46 = vcombine.low %v2587_v20, %v2595_v31 }
 0x50a   : > { %v2495_v0 = vpop.permute.xlu1 %2494  ;;  %v2480_v1 = vpop.permute.xlu0 %2479  ;;  %v2668_v58 = vrot.slane %v2660_v46, %v6502_v7 }
 0x50b   : > { %v2551_v54 = vsel %vm2546_vm8, %v6468_v49, %v2480_v1 }
 0x50c   : > { %v2557_v59 = vsel %vm2552_vm9, %v2551_v54, %v2495_v0 }
 0x50e   : > { %v2504_v5 = vpop.permute.xlu1 %2503  ;;  %v2489_v6 = vpop.permute.xlu0 %2488 }
 0x50f   : > { %v2554_v15 = vsel %vm2552_vm9, %v2548_v18, %v2489_v6 }
 0x510   : > { %v2560_v23 = vsel %vm2558_vm10, %v2554_v15, %v2504_v5 }
 0x512   : > { %v2521_v11 = vpop.permute.xlu1 %2520  ;;  %v2506_v12 = vpop.permute.xlu0 %2505 }
 0x513   : > { %v2561_v27 = vsel %vm2558_vm10, %v2555_v21, %v2506_v12 }
 0x514   : > { %v2566_v37 = vsel %vm586_vm0, %v2561_v27, %v2521_v11 }
 0x516   : > { %v2525_v13 = vpop.permute.xlu1 %2524  ;;  %v2510_v17 = vpop.permute.xlu0 %2509 }
 0x517   : > { %v2563_v2 = vsel %vm2558_vm10, %v2557_v59, %v2510_v17 }
 0x518   : > { %v2568_v8 = vsel %vm586_vm0, %v2563_v2, %v2525_v13 }
 0x51a   : > { %v2534_v22 = vpop.permute.xlu1 %2533  ;;  %v2519_v24 = vpop.permute.xlu0 %2518 }
 0x51b   : > { %v2565_v29 = vsel %vm586_vm0, %v2560_v23, %v2519_v24 }
 0x51c   : > { %v6521_v30 = vsel %vm2569_vm11, %v2565_v29, %v2534_v22 }
 0x51d   : > { %7677 = vst [vmem:[#allocation13_spill] sm:$0xff] %v6521_v30  ;;  %v2596_v33 = vcombine.high %v6521_v30, %v6521_v30  ;;  %v2603_v34 = vrot.slane %v6521_v30, %v6502_v7 }
 0x51e   : > { %v2478_v35 = vpop.permute.xlu1 %2477  ;;  %v2536_v38 = vpop.permute.xlu0 %2535 }
 0x51f   : > { %v6530_v41 = vsel %vm2569_vm11, %v2566_v37, %v2536_v38  ;;  %v2610_v42 = vrot.slane %v2596_v33, %v6502_v7  ;;  %v2611_v43 = vcombine.high %v2603_v34, %v2603_v34  ;;  %v2661_v45 = vcombine.low %v2594_v39, %v2603_v34 }
 0x520   : > { %7678 = vst [vmem:[#allocation14_spill] sm:$0xff] %v6530_v41  ;;  %v2619_v44 = vrot.slane %v6530_v41, %v6502_v7  ;;  %v2550_v47 = vsel %vm2546_vm8, %v6480_v52, %v2478_v35  ;;  %v2612_v1 = vcombine.high %v6530_v41, %v6530_v41  ;;  %vm5013_vm8 = vcmask 261120  }
 0x521   : > { %v2677_v53 = vcombine.low %v2611_v43, %v2610_v42  ;;  %v2675_v56 = vrot.slane %v2661_v45, %v6502_v7 }
 0x522   : > { %v2508_v48 = vpop.permute.xlu1 %2507  ;;  %v2493_v50 = vpop.permute.xlu0 %2492  ;;  %v2627_v51 = vcombine.high %v2619_v44, %v2619_v44  ;;  %v2626_v18 = vrot.slane %v2612_v1, %v6502_v7 }
 0x523   : > { %v2556_v55 = vsel %vm2552_vm9, %v2550_v47, %v2493_v50  ;;  %v2685_v62 = vrot.slane %v2677_v53, %v6502_v7  ;;  %v2676_v4 = vcombine.low %v2668_v58, %v2675_v56  ;;  %vm5090_vm9 = vcmask 128000  }
 0x524   : > { %v2678_v57 = vcombine.low %v2619_v44, %v2627_v51  ;;  %v2562_v61 = vsel %vm2558_vm10, %v2556_v55, %v2508_v48 }
 0x526   : > { %v2538_v60 = vpop.permute.xlu1 %2537  ;;  %v2523_v52 = vpop.permute.xlu0 %2522  ;;  %v2692_v63 = vrot.slane %v2678_v57, %v6502_v7 }
 0x527   : > { %v2567_v49 = vsel %vm586_vm0, %v2562_v61, %v2523_v52 }
 0x528   : > { %v6551_v3 = vsel %vm2569_vm11, %v2567_v49, %v2538_v60  ;;  %v2693_v0 = vcombine.low %v2685_v62, %v2692_v63 }
 0x529   : > { %7679 = vst [vmem:[#allocation15_spill] sm:$0xff] %v6551_v3  ;;  %v2628_v5 = vcombine.high %v6551_v3, %v6551_v3  ;;  %v2635_v6 = vrot.slane %v6551_v3, %v6502_v7 }
 0x52a   : > { %v2540_v9 = vpop.permute.xlu0 %2539  ;;  %v2731_v10 = vpack.c.bf16 %v2693_v0, %v2676_v4 }
 0x52b   : > { %v6559_v11 = vsel %vm2569_vm11, %v2568_v8, %v2540_v9  ;;  %v2642_v12 = vrot.slane %v2628_v5, %v6502_v7  ;;  %v2643_v14 = vcombine.high %v2635_v6, %v2635_v6  ;;  %v2694_v21 = vcombine.low %v2626_v18, %v2635_v6 }
 0x52c   : > { %7680 = vst [vmem:[#allocation16_spill] sm:$0xff] %v6559_v11  ;;  %v2644_v17 = vcombine.high %v6559_v11, %v6559_v11  ;;  %v2651_v15 = vrot.slane %v6559_v11, %v6502_v7  ;;  %5664 = vmatprep.mubr.msk.bf16.mxu0 %vm2734_vm12, %v2731_v10 }
 0x52d   : > { %v2695_v19 = vcombine.low %v2643_v14, %v2642_v12  ;;  %v2702_v24 = vrot.slane %v2694_v21, %v6502_v7 }
 0x52e   : > { %v2659_v13 = vcombine.high %v2651_v15, %v2651_v15  ;;  %v2658_v20 = vrot.slane %v2644_v17, %v6502_v7 }
 0x52f   : > { %v2709_v22 = vrot.slane %v2695_v19, %v6502_v7 }
 0x530   : > { %v2711_v23 = vcombine.low %v2651_v15, %v2659_v13  ;;  %v2725_v27 = vrot.slane %v2658_v20, %v6502_v7 }
 0x531   : > { %v2710_v29 = vcombine.low %v2702_v24, %v2709_v22 }
 0x532   : > { %v2718_v25 = vrot.slane %v2711_v23, %v6502_v7 }
 0x534   : > { %v2726_v31 = vcombine.low %v2718_v25, %v2725_v27 }
 0x536   : > { %v2732_v33 = vpack.c.bf16 %v2726_v31, %v2710_v29 }
 0x538   : > { %5665 = vmatmul.mubr.msk.bf16.vlgmr.msra.gmra.mrb[24].mxu0 %vm2734_vm12, %v2732_v33 }
 0x539   : > { %5674 = vmatprep.mubr.msk.bf16.mxu0 %vm6002_vm6, %v7652_v32  ;;  %vm4588_vm6 = vcmask 62464  }
 0x60b   : > { %v5666_v34 = vpop.f32.mrb[24].mxu0 }
 0x60c   : > { %v2831_v35 = vcombine.high %v5666_v34, %v5666_v34  ;;  %v2778_v37 = vpop.f32.mrb[25].mxu0  ;;  %v6577_v38 = vrot.slane %v5666_v34, %v6502_v7 }
 0x60d   : > { %v2797_v39 = vcombine.high %v2778_v37, %v2778_v37  ;;  %v5667_v42 = vpop.f32.mrb[26].mxu0  ;;  %v6585_v47 = vrot.slane %v2778_v37, %v6502_v7 }
 0x60e   : > { %v2845_v43 = vrot.slane %v2831_v35, %v6502_v7  ;;  %v2781_v44 = vpop.f32.mrb[27].mxu0  ;;  %v2855_v46 = vrot.slane %v5667_v42, %v6502_v7  ;;  %v2846_v51 = vcombine.high %v6577_v38, %v6577_v38  ;;  %v2848_v60 = vcombine.high %v5667_v42, %v5667_v42 }
 0x60f   : > { %v6581_v45 = vrot.slane %v2797_v39, %v6502_v7  ;;  %v2814_v48 = vcombine.high %v2781_v44, %v2781_v44  ;;  %v6588_v50 = vrot.slane %v2781_v44, %v6502_v7  ;;  %v6607_v59 = vcombine.high %v6585_v47, %v6585_v47 }
 0x610   : > { %v2847_v54 = vcombine.high %v2845_v43, %v2845_v43  ;;  %v2863_v55 = vcombine.high %v2855_v46, %v2855_v46  ;;  %v3182_v52 = vcombine.low %v2846_v51, %v2845_v43  ;;  %v6623_v5 = vrot.slane %v2848_v60, %v6502_v7 }
 0x611   : > { %v6594_v53 = vcombine.high %v6581_v45, %v6581_v45  ;;  %v6597_v56 = vrot.slane %v2814_v48, %v6502_v7  ;;  %v6601_v57 = vcombine.high %v6588_v50, %v6588_v50  ;;  %v3180_v8 = vrot.slane %v6577_v38, %v6502_v7 }
 0x612   : > { %v3196_v62 = vrot.slane %v2847_v54, %v6502_v7  ;;  %v3198_v49 = vcombine.low %v2855_v46, %v2863_v55  ;;  %v3189_v4 = vrot.slane %v3182_v52, %v6502_v7  ;;  %v3134_v9 = vcombine.low %v6585_v47, %v6607_v59 }
 0x613   : > { %v3150_v58 = vcombine.low %v6594_v53, %v6588_v50  ;;  %v6611_v61 = vcombine.high %v6597_v56, %v6597_v56  ;;  %v3164_v2 = vrot.slane %v6601_v57, %v6502_v7  ;;  %v3212_v18 = vrot.slane %v6623_v5, %v6502_v7 }
 0x614   : > { %v6630_v10 = vcombine.low %v3189_v4, %v3196_v62  ;;  %v3205_v14 = vrot.slane %v3198_v49, %v6502_v7  ;;  %v3141_v17 = vrot.slane %v3134_v9, %v6502_v7  ;;  %v3148_v19 = vrot.slane %v6581_v45, %v6502_v7 }
 0x615   : > { %v3157_v63 = vrot.slane %v3150_v58, %v6502_v7  ;;  %v3166_v1 = vcombine.low %v6597_v56, %v6611_v61  ;;  %v2942_v20 = vrot.slane %v2846_v51, %v6448_v36  ;;  %v2950_v22 = vrot.slane %v2845_v43, %v6448_v36 }
 0x616   : > { %3220 = vrot.lane.b32.xlu1 %v6630_v10, %s6010_s28  ;;  %v6640_v15 = vcombine.low %v3205_v14, %v3212_v18  ;;  %v6646_v13 = vcombine.low %v3141_v17, %v3148_v19  ;;  %v2966_v29 = vrot.slane %v2855_v46, %v6448_v36  ;;  %v2958_v34 = vrot.slane %v2847_v54, %v6448_v36 }
 0x617   : > { %v6620_v0 = vcombine.low %v3157_v63, %v3164_v2  ;;  %v3173_v6 = vrot.slane %v3166_v1, %v6502_v7  ;;  %v2943_v21 = vcombine.high %v2942_v20, %v2942_v20  ;;  %v3059_v23 = vrot.slane %v2942_v20, %v6452_v40 }
 0x618   : > { %7681 = vst [vmem:[#allocation17_spill] sm:$0xff] %v6646_v13  ;;  %v2951_v25 = vcombine.high %v2950_v22, %v2950_v22  ;;  %v2974_v35 = vrot.slane %v2863_v55, %v6448_v36  ;;  %v3067_v37 = vrot.slane %v2950_v22, %v6452_v40  ;;  %v3083_v46 = vrot.slane %v2966_v29, %v6452_v40 }
 0x619   : > { %v6632_v12 = vcombine.low %v3173_v6, %v3180_v8  ;;  %v3063_v24 = vrot.slane %v2943_v21, %v6452_v40  ;;  %v3075_v48 = vrot.slane %v2958_v34, %v6452_v40  ;;  %v2959_v54 = vcombine.high %v2958_v34, %v2958_v34 }
 0x61a   : > { %3216 = vrot.lane.b32.xlu1 %v6620_v0, %s6010_s28  ;;  %v3071_v39 = vrot.slane %v2951_v25, %v6452_v40  ;;  %v2975_v55 = vcombine.high %v2974_v35, %v2974_v35  ;;  %v2967_v60 = vcombine.high %v2966_v29, %v2966_v29  ;;  %v2894_v63 = vrot.slane %v6594_v53, %v6448_v36 }
 0x61b   : > { %3218 = vrot.lane.b32.xlu0 %v6632_v12, %s6010_s28  ;;  %v3079_v52 = vrot.slane %v2959_v54, %v6452_v40  ;;  %v2902_v1 = vrot.slane %v6588_v50, %v6448_v36  ;;  %v2910_v6 = vrot.slane %v6601_v57, %v6448_v36  ;;  %v2918_v18 = vrot.slane %v6597_v56, %v6448_v36 }
 0x61c   : > { %v3095_v62 = vrot.slane %v2975_v55, %v6452_v40  ;;  %v3087_v8 = vrot.slane %v2967_v60, %v6452_v40  ;;  %v3011_v9 = vrot.slane %v2894_v63, %v6452_v40  ;;  %v3091_v50 = vrot.slane %v2974_v35, %v6452_v40 }
 0x61d   : > { %v3019_v57 = vrot.slane %v2902_v1, %v6452_v40  ;;  %v2895_v17 = vcombine.high %v2894_v63, %v2894_v63  ;;  %v2911_v19 = vcombine.high %v2910_v6, %v2910_v6  ;;  %v2903_v22 = vcombine.high %v2902_v1, %v2902_v1 }
 0x61e   : > { %3214 = vrot.lane.b32.xlu1 %v6646_v13, %s6010_s28  ;;  %v2870_v60 = vrot.slane %v6585_v47, %v6448_v36 }
 0x61f   : > { %3222 = vrot.lane.b32.xlu0 %v6640_v15, %s6010_s28  ;;  %v3015_v56 = vrot.slane %v2895_v17, %v6452_v40  ;;  %v3023_v29 = vrot.slane %v2903_v22, %v6452_v40 }
 0x620   : > { %v2871_v1 = vcombine.high %v2870_v60, %v2870_v60 }
 0x688   : > { %v3221_v27 = vpop.permute.xlu1 %3220 }
 0x689   : > { %v3247_v7 = vmul.f32 %v3221_v27, %v3059_v23  ;;  %v3248_v31 = vmul.f32 %v3221_v27, %v3063_v24  ;;  %v3249_v42 = vmul.f32 %v3221_v27, %v3067_v37  ;;  %v3250_v43 = vmul.f32 %v3221_v27, %v3071_v39 }
 0x68a   : > { %v3251_v58 = vmul.f32 %v3221_v27, %v3075_v48  ;;  %v3252_v2 = vmul.f32 %v3221_v27, %v3079_v52  ;;  %v3031_v23 = vrot.slane %v2911_v19, %v6452_v40  ;;  %v2919_v24 = vcombine.high %v2918_v18, %v2918_v18 }
 0x68b   : > { %3325 = vrot.lane.b32.xlu1 %v3247_v7, %s6011_s19  ;;  %3327 = vrot.lane.b32.xlu0 %v3248_v31, %s6011_s19  ;;  %v2926_v31 = vrot.slane %v6611_v61, %v6448_v36  ;;  %v2934_v37 = vrot.slane %v6577_v38, %v6448_v36  ;;  %v3027_v39 = vrot.slane %v2910_v6, %v6452_v40 }
 0x68c   : > { %v3217_v4 = vpop.permute.xlu1 %3216  ;;  %v3039_v7 = vrot.slane %v2919_v24, %v6452_v40  ;;  %v2982_v61 = vrot.slane %v6623_v5, %v6448_v36  ;;  %v3035_v38 = vrot.slane %v2918_v18, %v6452_v40 }
 0x68d   : > { %v6654_v33 = vpop.permute.xlu0 %3218  ;;  %v3235_v14 = vmul.f32 %v3217_v4, %v3011_v9  ;;  %v3237_v21 = vmul.f32 %v3217_v4, %v3019_v57  ;;  %v3236_v25 = vmul.f32 %v3217_v4, %v3015_v56  ;;  %v3240_v27 = vmul.f32 %v3217_v4, %v3031_v23 }
 0x68e   : > { %v3238_v34 = vmul.f32 %v3217_v4, %v3023_v29  ;;  %v3242_v35 = vmul.f32 %v6654_v33, %v3039_v7  ;;  %v2935_v54 = vcombine.high %v2934_v37, %v2934_v37  ;;  %v3241_v55 = vmul.f32 %v6654_v33, %v3035_v38 }
 0x68f   : > { %3329 = vrot.lane.b32.xlu1 %v3249_v42, %s6011_s19  ;;  %3331 = vrot.lane.b32.xlu0 %v3250_v43, %s6011_s19  ;;  %v3043_v42 = vrot.slane %v2926_v31, %v6452_v40  ;;  %v2927_v43 = vcombine.high %v2926_v31, %v2926_v31  ;;  %v2983_v52 = vcombine.high %v2982_v61, %v2982_v61 }
 0x690   : > { %v3051_v5 = vrot.slane %v2934_v37, %v6452_v40  ;;  %v3099_v47 = vrot.slane %v2982_v61, %v6452_v40  ;;  %v2987_v9 = vrot.slane %v2870_v60, %v6452_v40 }
 0x691   : > { %v6662_v44 = vpop.permute.xlu0 %3222  ;;  %v3243_v48 = vmul.f32 %v6654_v33, %v3043_v42 }
 0x692   : > { %v3253_v51 = vmul.f32 %v6662_v44, %v3083_v46  ;;  %v3256_v49 = vmul.f32 %v6662_v44, %v3095_v62  ;;  %v3254_v53 = vmul.f32 %v6662_v44, %v3087_v8  ;;  %v3255_v20 = vmul.f32 %v6662_v44, %v3091_v50  ;;  %v3215_v8 = vpop.permute.xlu1 %3214 }
 0x693   : > { %3333 = vrot.lane.b32.xlu1 %v3251_v58, %s6011_s19  ;;  %v3239_v46 = vmul.f32 %v3217_v4, %v3027_v39  ;;  %v3055_v62 = vrot.slane %v2935_v54, %v6452_v40  ;;  %v3245_v63 = vmul.f32 %v6654_v33, %v3051_v5  ;;  %v3257_v6 = vmul.f32 %v6662_v44, %v3099_v47 }
 0x694   : > { %3337 = vrot.lane.b32.xlu0 %v3253_v51, %s6011_s19  ;;  %v3047_v51 = vrot.slane %v2927_v43, %v6452_v40  ;;  %v3229_v50 = vmul.f32 %v3215_v8, %v2987_v9 }
 0x696   : > { %v3244_v58 = vmul.f32 %v6654_v33, %v3047_v51 }
 0x697   : > { %3335 = vrot.lane.b32.xlu1 %v3252_v2, %s6011_s19  ;;  %v3246_v2 = vmul.f32 %v6654_v33, %v3055_v62  ;;  %v2991_v33 = vrot.slane %v2871_v1, %v6452_v40 }
 0x698   : > { %3343 = vrot.lane.b32.xlu0 %v3256_v49, %s6011_s19  ;;  %v3103_v49 = vrot.slane %v2983_v52, %v6452_v40 }
 0x699   : > { %v3230_v18 = vmul.f32 %v3215_v8, %v2991_v33 }
 0x69a   : > { %v3258_v4 = vmul.f32 %v6662_v44, %v3103_v49 }
 0x69b   : > { %3339 = vrot.lane.b32.xlu1 %v3254_v53, %s6011_s19  ;;  %v2886_v53 = vrot.slane %v6581_v45, %v6448_v36 }
 0x69c   : > { %3301 = vrot.lane.b32.xlu0 %v3235_v14, %s6011_s19  ;;  %v2878_v14 = vrot.slane %v6607_v59, %v6448_v36 }
 0x69d   : > { %v3003_v44 = vrot.slane %v2886_v53, %v6452_v40  ;;  %v2887_v36 = vcombine.high %v2886_v53, %v2886_v53 }
 0x69e   : > { %v2995_v57 = vrot.slane %v2878_v14, %v6452_v40  ;;  %v2879_v17 = vcombine.high %v2878_v14, %v2878_v14 }
 0x69f   : > { %3341 = vrot.lane.b32.xlu1 %v3255_v20, %s6011_s19  ;;  %v3233_v19 = vmul.f32 %v3215_v8, %v3003_v44 }
 0x6a0   : > { %3305 = vrot.lane.b32.xlu0 %v3237_v21, %s6011_s19  ;;  %v3231_v20 = vmul.f32 %v3215_v8, %v2995_v57  ;;  %v2999_v45 = vrot.slane %v2879_v17, %v6452_v40  ;;  %v3007_v21 = vrot.slane %v2887_v36, %v6452_v40 }
 0x6a2   : > { %v3232_v59 = vmul.f32 %v3215_v8, %v2999_v45  ;;  %v3234_v22 = vmul.f32 %v3215_v8, %v3007_v21 }
 0x6a3   : > { %3303 = vrot.lane.b32.xlu1 %v3236_v25, %s6011_s19 }
 0x6a4   : > { %3311 = vrot.lane.b32.xlu0 %v3240_v27, %s6011_s19 }
 0x6a7   : > { %3307 = vrot.lane.b32.xlu1 %v3238_v34, %s6011_s19 }
 0x6a8   : > { %3315 = vrot.lane.b32.xlu0 %v3242_v35, %s6011_s19 }
 0x6ab   : > { %3309 = vrot.lane.b32.xlu1 %v3239_v46, %s6011_s19 }
 0x6ac   : > { %3317 = vrot.lane.b32.xlu0 %v3243_v48, %s6011_s19 }
 0x6af   : > { %3313 = vrot.lane.b32.xlu1 %v3241_v55, %s6011_s19 }
 0x6b0   : > { %3319 = vrot.lane.b32.xlu0 %v3244_v58, %s6011_s19 }
 0x6b3   : > { %3321 = vrot.lane.b32.xlu1 %v3245_v63, %s6011_s19 }
 0x6b4   : > { %3323 = vrot.lane.b32.xlu0 %v3246_v2, %s6011_s19 }
 0x6b7   : > { %3347 = vrot.lane.b32.xlu1 %v3258_v4, %s6011_s19 }
 0x6b8   : > { %3345 = vrot.lane.b32.xlu0 %v3257_v6, %s6011_s19 }
 0x6bb   : > { %3291 = vrot.lane.b32.xlu1 %v3230_v18, %s6011_s19 }
 0x6bc   : > { %3289 = vrot.lane.b32.xlu0 %v3229_v50, %s6011_s19 }
 0x6bf   : > { %3297 = vrot.lane.b32.xlu1 %v3233_v19, %s6011_s19 }
 0x6c0   : > { %3293 = vrot.lane.b32.xlu0 %v3231_v20, %s6011_s19 }
 0x6c4   : > { %3295 = vrot.lane.b32.xlu0 %v3232_v59, %s6011_s19 }
 0x6c8   : > { %3299 = vrot.lane.b32.xlu0 %v3234_v22, %s6011_s19 }
 0x6fd   : > { %v3326_v56 = vpop.permute.xlu1 %3325  ;;  %v3328_v23 = vpop.permute.xlu0 %3327 }
 0x6fe   : > { %v3434_v24 = vsel %vm3379_vm13, %v3326_v56, 0.0  ;;  %v3437_v7 = vsel %vm3379_vm13, %v3328_v23, 0.0 }
 0x6ff   : > { %3435 = vadd.xlane.f32.xlu0 %v3434_v24 }
 0x701   : > { %v3330_v25 = vpop.permute.xlu1 %3329  ;;  %v3332_v27 = vpop.permute.xlu0 %3331 }
 0x702   : > { %v3440_v29 = vsel %vm3379_vm13, %v3330_v25, 0.0  ;;  %v3443_v35 = vsel %vm3379_vm13, %v3332_v27, 0.0 }
 0x703   : > { %3441 = vadd.xlane.f32.xlu1 %v3440_v29  ;;  %3438 = vadd.xlane.f32.xlu0 %v3437_v7 }
 0x705   : > { %v3334_v31 = vpop.permute.xlu1 %3333 }
 0x706   : > { %v3338_v34 = vpop.permute.xlu0 %3337  ;;  %v3446_v42 = vsel %vm3379_vm13, %v3334_v31, 0.0 }
 0x707   : > { %3444 = vadd.xlane.f32.xlu1 %v3443_v35  ;;  %v3452_v51 = vsel %vm3379_vm13, %v3338_v34, 0.0 }
 0x709   : > { %v3336_v37 = vpop.permute.xlu1 %3335 }
 0x70a   : > { %v3344_v39 = vpop.permute.xlu0 %3343  ;;  %v3449_v48 = vsel %vm3379_vm13, %v3336_v37, 0.0 }
 0x70b   : > { %3447 = vadd.xlane.f32.xlu1 %v3446_v42  ;;  %v3461_v47 = vsel %vm3379_vm13, %v3344_v39, 0.0 }
 0x70d   : > { %v3340_v43 = vpop.permute.xlu1 %3339 }
 0x70e   : > { %v3302_v46 = vpop.permute.xlu0 %3301  ;;  %v3455_v58 = vsel %vm3379_vm13, %v3340_v43, 0.0 }
 0x70f   : > { %3450 = vadd.xlane.f32.xlu1 %v3449_v48  ;;  %v3398_v8 = vsel %vm3379_vm13, %v3302_v46, 0.0 }
 0x711   : > { %v3342_v61 = vpop.permute.xlu1 %3341 }
 0x712   : > { %v3306_v38 = vpop.permute.xlu0 %3305  ;;  %v3458_v62 = vsel %vm3379_vm13, %v3342_v61, 0.0 }
 0x713   : > { %3453 = vadd.xlane.f32.xlu1 %v3452_v51  ;;  %v3404_v53 = vsel %vm3379_vm13, %v3306_v38, 0.0 }
 0x715   : > { %v3304_v54 = vpop.permute.xlu1 %3303 }
 0x716   : > { %v3312_v55 = vpop.permute.xlu0 %3311  ;;  %v3401_v60 = vsel %vm3379_vm13, %v3304_v54, 0.0 }
 0x717   : > { %3456 = vadd.xlane.f32.xlu1 %v3455_v58  ;;  %3402 = vadd.xlane.f32.xlu0 %v3401_v60  ;;  %v3413_v1 = vsel %vm3379_vm13, %v3312_v55, 0.0  ;;  %v3501_v55 = vand.u32 127, %v2411_v26 }
 0x719   : > { %v3308_v52 = vpop.permute.xlu1 %3307  ;;  %v6804_v60 = vsub.s32 %v3501_v55, %v6442_v28 }
 0x71a   : > { %v3316_v5 = vpop.permute.xlu0 %3315  ;;  %v3407_v63 = vsel %vm3379_vm13, %v3308_v52, 0.0 }
 0x71b   : > { %3459 = vadd.xlane.f32.xlu1 %v3458_v62  ;;  %3408 = vadd.xlane.f32.xlu0 %v3407_v63  ;;  %v3419_v36 = vsel %vm3379_vm13, %v3316_v5, 0.0 }
 0x71d   : > { %v3310_v2 = vpop.permute.xlu1 %3309 }
 0x71e   : > { %v3318_v49 = vpop.permute.xlu0 %3317  ;;  %v3410_v50 = vsel %vm3379_vm13, %v3310_v2, 0.0 }
 0x71f   : > { %3462 = vadd.xlane.f32.xlu1 %v3461_v47  ;;  %3414 = vadd.xlane.f32.xlu0 %v3413_v1  ;;  %v3422_v22 = vsel %vm3379_vm13, %v3318_v49, 0.0 }
 0x721   : > { %v3314_v4 = vpop.permute.xlu1 %3313 }
 0x722   : > { %v3320_v6 = vpop.permute.xlu0 %3319  ;;  %v3416_v19 = vsel %vm3379_vm13, %v3314_v4, 0.0 }
 0x723   : > { %3399 = vadd.xlane.f32.xlu1 %v3398_v8  ;;  %v3425_v23 = vsel %vm3379_vm13, %v3320_v6, 0.0 }
 0x725   : > { %v3322_v9 = vpop.permute.xlu1 %3321 }
 0x726   : > { %v3324_v33 = vpop.permute.xlu0 %3323  ;;  %v3428_v24 = vsel %vm3379_vm13, %v3322_v9, 0.0 }
 0x727   : > { %3405 = vadd.xlane.f32.xlu1 %v3404_v53  ;;  %v3431_v25 = vsel %vm3379_vm13, %v3324_v33, 0.0 }
 0x729   : > { %v3348_v14 = vpop.permute.xlu1 %3347 }
 0x72a   : > { %v3346_v18 = vpop.permute.xlu0 %3345  ;;  %v3467_v27 = vsel %vm3379_vm13, %v3348_v14, 0.0 }
 0x72b   : > { %v3464_v44 = vsel %vm3379_vm13, %v3346_v18, 0.0  ;;  %3411 = vadd.xlane.f32.xlu1 %v3410_v50 }
 0x72c   : > { %3465 = vadd.xlane.f32.xlu0 %v3464_v44 }
 0x72d   : > { %v3292_v57 = vpop.permute.xlu1 %3291 }
 0x72e   : > { %v3290_v17 = vpop.permute.xlu0 %3289  ;;  %v3383_v7 = vsel %vm3379_vm13, %v3292_v57, 0.0 }
 0x72f   : > { %v3380_v20 = vsel %vm3379_vm13, %v3290_v17, 0.0  ;;  %3417 = vadd.xlane.f32.xlu1 %v3416_v19 }
 0x730   : > { %3381 = vadd.xlane.f32.xlu0 %v3380_v20 }
 0x731   : > { %v3298_v21 = vpop.permute.xlu1 %3297 }
 0x732   : > { %v3294_v45 = vpop.permute.xlu0 %3293  ;;  %v3392_v56 = vsel %vm3379_vm13, %v3298_v21, 0.0 }
 0x733   : > { %v3386_v59 = vsel %vm3379_vm13, %v3294_v45, 0.0  ;;  %3420 = vadd.xlane.f32.xlu1 %v3419_v36 }
 0x734   : > { %3387 = vadd.xlane.f32.xlu0 %v3386_v59 }
 0x736   : > { %v3296_v29 = vpop.permute.xlu0 %3295 }
 0x737   : > { %3423 = vadd.xlane.f32.xlu1 %v3422_v22  ;;  %v3389_v31 = vsel %vm3379_vm13, %v3296_v29, 0.0 }
 0x738   : > { %3393 = vadd.xlane.f32.xlu0 %v3392_v56 }
 0x73a   : > { %v3300_v34 = vpop.permute.xlu0 %3299 }
 0x73b   : > { %3426 = vadd.xlane.f32.xlu1 %v3425_v23  ;;  %v3395_v35 = vsel %vm3379_vm13, %v3300_v34, 0.0 }
 0x73f   : > { %3429 = vadd.xlane.f32.xlu1 %v3428_v24 }
 0x743   : > { %3432 = vadd.xlane.f32.xlu1 %v3431_v25 }
 0x747   : > { %3468 = vadd.xlane.f32.xlu1 %v3467_v27 }
 0x74b   : > { %3384 = vadd.xlane.f32.xlu1 %v3383_v7 }
 0x74f   : > { %3390 = vadd.xlane.f32.xlu1 %v3389_v31 }
 0x753   : > { %3396 = vadd.xlane.f32.xlu1 %v3395_v35 }
 0x78c   : > { %v6790_v48 = vpop.xlane.xlu0 %3435 }
 0x78d   : > { %v3577_v47 = vrot.slane %v6790_v48, %v6804_v60 }
 0x790   : > { %v6780_v37 = vpop.xlane.xlu1 %3441  ;;  %v6794_v38 = vpop.xlane.xlu0 %3438 }
 0x791   : > { %v3581_v63 = vrot.slane %v6794_v38, %v6804_v60  ;;  %v3585_v4 = vrot.slane %v6780_v37, %v6804_v60 }
 0x793   : > { %v3642_v9 = vsel %vm3622_vm14, %v3581_v63, %v3577_v47 }
 0x794   : > { %v6782_v39 = vpop.xlane.xlu1 %3444  ;;  %v3643_v20 = vsel %vm3624_vm15, %v3585_v4, %v3642_v9 }
 0x795   : > { %v3589_v33 = vrot.slane %v6782_v39, %v6804_v60 }
 0x797   : > { %v3644_v59 = vsel %vm3626_vm2, %v3589_v33, %v3643_v20 }
 0x798   : > { %v6784_v42 = vpop.xlane.xlu1 %3447 }
 0x799   : > { %v3593_v18 = vrot.slane %v6784_v42, %v6804_v60 }
 0x79b   : > { %v3645_v22 = vsel %vm3628_vm3, %v3593_v18, %v3644_v59 }
 0x79c   : > { %v6786_v43 = vpop.xlane.xlu1 %3450 }
 0x79d   : > { %v3597_v44 = vrot.slane %v6786_v43, %v6804_v60 }
 0x79f   : > { %v3646_v56 = vsel %vm3630_vm4, %v3597_v44, %v3645_v22 }
 0x7a0   : > { %v6788_v46 = vpop.xlane.xlu1 %3453  ;;  %v3667_v24 = vsel %vm3657_vm5, %v3646_v56, -inf }
 0x7a1   : > { %v3601_v55 = vrot.slane %v6788_v46, %v6804_v60 }
 0x7a4   : > { %v6792_v61 = vpop.xlane.xlu1 %3456  ;;  %v6798_v54 = vpop.xlane.xlu0 %3402 }
 0x7a5   : > { %v3533_v2 = vrot.slane %v6798_v54, %v6804_v60  ;;  %v3605_v31 = vrot.slane %v6792_v61, %v6804_v60 }
 0x7a8   : > { %v6796_v51 = vpop.xlane.xlu1 %3459  ;;  %v6808_v5 = vpop.xlane.xlu0 %3408 }
 0x7a9   : > { %v3541_v53 = vrot.slane %v6808_v5, %v6804_v60  ;;  %v3609_v34 = vrot.slane %v6796_v51, %v6804_v60 }
 0x7ac   : > { %v6801_v58 = vpop.xlane.xlu1 %3462  ;;  %v6825_v6 = vpop.xlane.xlu0 %3414 }
 0x7ad   : > { %v3549_v57 = vrot.slane %v6825_v6, %v6804_v60 }
 0x7b0   : > { %v6806_v52 = vpop.xlane.xlu1 %3399 }
 0x7b1   : > { %v3529_v62 = vrot.slane %v6806_v52, %v6804_v60 }
 0x7b3   : > { %v3632_v1 = vsel %vm3622_vm14, %v3533_v2, %v3529_v62  ;;  %v3613_v62 = vrot.slane %v6801_v58, %v6804_v60 }
 0x7b4   : > { %v6816_v49 = vpop.xlane.xlu1 %3405 }
 0x7b5   : > { %v3537_v26 = vrot.slane %v6816_v49, %v6804_v60 }
 0x7b7   : > { %v3633_v8 = vsel %vm3624_vm15, %v3537_v26, %v3632_v1  ;;  %v3647_v1 = vsel %vm3622_vm14, %v3605_v31, %v3601_v55 }
 0x7b8   : > { %v6833_v14 = vpop.xlane.xlu1 %3411  ;;  %v3634_v17 = vsel %vm3626_vm2, %v3541_v53, %v3633_v8  ;;  %v3648_v9 = vsel %vm3624_vm15, %v3609_v34, %v3647_v1 }
 0x7b9   : > { %v3545_v50 = vrot.slane %v6833_v14, %v6804_v60  ;;  %v6860_v29 = vpop.xlane.xlu0 %3465 }
 0x7ba   : > { %v3617_v26 = vrot.slane %v6860_v29, %v6804_v60 }
 0x7bb   : > { %v3635_v19 = vsel %vm3628_vm3, %v3545_v50, %v3634_v17 }
 0x7bc   : > { %v6846_v45 = vpop.xlane.xlu1 %3417  ;;  %v3636_v36 = vsel %vm3630_vm4, %v3549_v57, %v3635_v19  ;;  %v3649_v57 = vsel %vm3626_vm2, %v3613_v62, %v3648_v9 }
 0x7bd   : > { %v3661_v21 = vsel %vm3657_vm5, %v3636_v36, -inf  ;;  %v6874_v63 = vpop.xlane.xlu0 %3381  ;;  %v3553_v4 = vrot.slane %v6846_v45, %v6804_v60  ;;  %v3650_v19 = vsel %vm3628_vm3, %v3617_v26, %v3649_v57 }
 0x7be   : > { %3662 = vmax.xlane.f32.xlu0 %v3661_v21 }
 0x7c0   : > { %v6853_v23 = vpop.xlane.xlu1 %3420 }
 0x7c1   : > { %v3557_v2 = vrot.slane %v6853_v23, %v6804_v60  ;;  %v6900_v20 = vpop.xlane.xlu0 %3387 }
 0x7c2   : > { %3668 = vmax.xlane.f32.xlu0 %v3667_v24  ;;  %v3505_v24 = vrot.slane %v6874_v63, %v6804_v60  ;;  %v3513_v62 = vrot.slane %v6900_v20, %v6804_v60 }
 0x7c3   : > { %v3637_v18 = vsel %vm3622_vm14, %v3557_v2, %v3553_v4 }
 0x7c4   : > { %v6856_v25 = vpop.xlane.xlu1 %3423 }
 0x7c5   : > { %v3561_v47 = vrot.slane %v6856_v25, %v6804_v60 }
 0x7c7   : > { %v3638_v17 = vsel %vm3624_vm15, %v3561_v47, %v3637_v18  ;;  %v6919_v47 = vpop.xlane.xlu0 %3393 }
 0x7c8   : > { %v6858_v27 = vpop.xlane.xlu1 %3426 }
 0x7c9   : > { %v3565_v8 = vrot.slane %v6858_v27, %v6804_v60 }
 0x7cb   : > { %v3639_v59 = vsel %vm3626_vm2, %v3565_v8, %v3638_v17  ;;  %v6012_v8 = vmov 0  }
 0x7cc   : > { %v6862_v7 = vpop.xlane.xlu1 %3429  ;;  %5785 = vset.pattern.permute.xlu0 %v6012_v8  ;;  %5784 = vset.pattern.permute.xlu1 %v6012_v8  ;;  %v6953_v8 = vsub.s32 4, %v6442_v28 }
 0x7cd   : > { %v3569_v33 = vrot.slane %v6862_v7, %v6804_v60 }
 0x7cf   : > { %v3640_v56 = vsel %vm3628_vm3, %v3569_v33, %v3639_v59  ;;  %v3521_v33 = vrot.slane %v6919_v47, %v6804_v60 }
 0x7d0   : > { %v6868_v35 = vpop.xlane.xlu1 %3432 }
 0x7d1   : > { %v3573_v50 = vrot.slane %v6868_v35, %v6804_v60 }
 0x7d3   : > { %v3641_v34 = vsel %vm3630_vm4, %v3573_v50, %v3640_v56 }
 0x7d4   : > { %v6890_v53 = vpop.xlane.xlu1 %3468  ;;  %v3664_v26 = vsel %vm3657_vm5, %v3641_v34, -inf }
 0x7d5   : > { %v3621_v44 = vrot.slane %v6890_v53, %v6804_v60 }
 0x7d7   : > { %v3651_v36 = vsel %vm3630_vm4, %v3621_v44, %v3650_v19 }
 0x7d8   : > { %v6904_v21 = vpop.xlane.xlu1 %3384  ;;  %v3670_v22 = vsel %vm3657_vm5, %v3651_v36, -inf  ;;  %v6937_v36 = vsub.s32 1, %v6442_v28 }
 0x7d9   : > { %v3509_v31 = vrot.slane %v6904_v21, %v6804_v60  ;;  %3671 = vmax.xlane.f32.xlu1 %v3670_v22  ;;  %v6940_v22 = vsub.s32 3, %v6442_v28 }
 0x7db   : > { %v3623_v55 = vsel %vm3622_vm14, %v3509_v31, %v3505_v24  ;;  %v6945_v31 = vsub.s32 2, %v6442_v28 }
 0x7dc   : > { %v6916_v2 = vpop.xlane.xlu1 %3390  ;;  %v3625_v4 = vsel %vm3624_vm15, %v3513_v62, %v3623_v55 }
 0x7dd   : > { %v3517_v1 = vrot.slane %v6916_v2, %v6804_v60  ;;  %3665 = vmax.xlane.f32.xlu1 %v3664_v26 }
 0x7df   : > { %v3627_v9 = vsel %vm3626_vm2, %v3517_v1, %v3625_v4 }
 0x7e0   : > { %v6927_v18 = vpop.xlane.xlu1 %3396  ;;  %v3629_v44 = vsel %vm3628_vm3, %v3521_v33, %v3627_v9 }
 0x7e1   : > { %v3525_v50 = vrot.slane %v6927_v18, %v6804_v60 }
 0x7e3   : > { %v3631_v57 = vsel %vm3630_vm4, %v3525_v50, %v3629_v44 }
 0x7e4   : > { %v3658_v17 = vsel %vm3657_vm5, %v3631_v57, -inf  ;;  %v6958_v57 = vsub.s32 5, %v6442_v28 }
 0x7e5   : > { %3659 = vmax.xlane.f32.xlu0 %v3658_v17 }
 0x84b   : > { %v6934_v19 = vpop.xlane.xlu0 %3662 }
 0x84f   : > { %v3669_v59 = vpop.xlane.xlu0 %3668 }
 0x850   : > { %v3753_v56 = vrot.slane %v3669_v59, %v6452_v40  ;;  %v3757_v24 = vrot.slane %v3669_v59, %v6937_v36  ;;  %v3765_v34 = vrot.slane %v3669_v59, %v6940_v22  ;;  %v3761_v62 = vrot.slane %v3669_v59, %v6945_v31 }
 0x851   : > { %v3769_v33 = vrot.slane %v3669_v59, %v6953_v8 }
 0x852   : > { %v3846_v55 = vsub.f32 %v6790_v48, %v3753_v56  ;;  %v3847_v26 = vsub.f32 %v6794_v38, %v3757_v24  ;;  %v3849_v1 = vsub.f32 %v6782_v39, %v3765_v34  ;;  %v3848_v50 = vsub.f32 %v6780_v37, %v3761_v62 }
 0x853   : > { %v3773_v48 = vrot.slane %v3669_v59, %v6958_v57  ;;  %v3850_v38 = vsub.f32 %v6784_v42, %v3769_v33 }
 0x854   : > { %v3894_v4 = vmul.f32 1.442695, %v3846_v55  ;;  %v3900_v9 = vmul.f32 1.442695, %v3849_v1  ;;  %v3896_v44 = vmul.f32 1.442695, %v3847_v26  ;;  %v3709_v26 = vrot.slane %v6934_v19, %v6937_v36 }
 0x855   : > { %v3898_v39 = vmul.f32 1.442695, %v3848_v50  ;;  %v3851_v17 = vsub.f32 %v6786_v43, %v3773_v48  ;;  %v3902_v56 = vmul.f32 1.442695, %v3850_v38  ;;  %v3705_v50 = vrot.slane %v6934_v19, %v6452_v40 }
 0x856   : > { %5855 = vpow2.f32 %v3894_v4 }
 0x857   : > { %5857 = vpow2.f32 %v3900_v9  ;;  %v3904_v37 = vmul.f32 1.442695, %v3851_v17 }
 0x858   : > { %5859 = vpow2.f32 %v3896_v44 }
 0x859   : > { %5861 = vpow2.f32 %v3898_v39  ;;  %v3725_v39 = vrot.slane %v6934_v19, %v6958_v57 }
 0x85a   : > { %5863 = vpow2.f32 %v3902_v56  ;;  %v3834_v56 = vsub.f32 %v6806_v52, %v3705_v50 }
 0x85b   : > { %5865 = vpow2.f32 %v3904_v37 }
 0x860   : > { %v6963_v24 = vpop.eup %5855 }
 0x861   : > { %4003 = vperm.xlu1 %5784, %v6963_v24   ;;  %v6966_v34 = vpop.eup %5857 }
 0x862   : > { %v6968_v28 = vpop.eup %5859  ;;  %4012 = vperm.xlu0 %5785, %v6966_v34  }
 0x863   : > { %v6987_v33 = vpop.eup %5861 }
 0x864   : > { %v6996_v17 = vpop.eup %5863 }
 0x865   : > { %4006 = vperm.xlu1 %5784, %v6968_v28  }
 0x866   : > { %v6971_v59 = vpop.xlane.xlu1 %3671 }
 0x867   : > { %v3777_v42 = vrot.slane %v6971_v59, %v6452_v40  ;;  %v3781_v43 = vrot.slane %v6971_v59, %v6937_v36  ;;  %v3785_v55 = vrot.slane %v6971_v59, %v6945_v31  ;;  %v3789_v62 = vrot.slane %v6971_v59, %v6940_v22 }
 0x869   : > { %v3852_v1 = vsub.f32 %v6788_v46, %v3777_v42  ;;  %v3853_v4 = vsub.f32 %v6792_v61, %v3781_v43  ;;  %v3855_v9 = vsub.f32 %v6801_v58, %v3789_v62  ;;  %v3854_v44 = vsub.f32 %v6796_v51, %v3785_v55  ;;  %4009 = vperm.xlu1 %5784, %v6987_v33   ;;  %v7007_v55 = vpop.eup %5865 }
 0x86a   : > { %v3835_v46 = vsub.f32 %v6798_v54, %v3709_v26  ;;  %v3713_v58 = vrot.slane %v6934_v19, %v6945_v31  ;;  %v7001_v37 = vpop.xlane.xlu1 %3665  ;;  %v3839_v42 = vsub.f32 %v6825_v6, %v3725_v39  ;;  %v3717_v62 = vrot.slane %v6934_v19, %v6940_v22 }
 0x86b   : > { %v3906_v48 = vmul.f32 1.442695, %v3852_v1  ;;  %v3908_v38 = vmul.f32 1.442695, %v3853_v4  ;;  %v3912_v61 = vmul.f32 1.442695, %v3855_v9  ;;  %v3741_v54 = vrot.slane %v7001_v37, %v6940_v22 }
 0x86c   : > { %v3910_v51 = vmul.f32 1.442695, %v3854_v44  ;;  %v3872_v43 = vmul.f32 1.442695, %v3835_v46  ;;  %v3836_v52 = vsub.f32 %v6816_v49, %v3713_v58  ;;  %v3870_v26 = vmul.f32 1.442695, %v3834_v56 }
 0x86d   : > { %5867 = vpow2.f32 %v3906_v48  ;;  %4015 = vperm.xlu1 %5784, %v6996_v17   ;;  %v3880_v1 = vmul.f32 1.442695, %v3839_v42  ;;  %v3749_v6 = vrot.slane %v7001_v37, %v6958_v57  ;;  %v3843_v4 = vsub.f32 %v6858_v27, %v3741_v54 }
 0x86e   : > { %5869 = vpow2.f32 %v3908_v38  ;;  %v3721_v9 = vrot.slane %v6934_v19, %v6953_v8  ;;  %v3837_v50 = vsub.f32 %v6808_v5, %v3717_v62  ;;  %v3874_v44 = vmul.f32 1.442695, %v3836_v52 }
 0x86f   : > { %5871 = vpow2.f32 %v3912_v61  ;;  %v3793_v38 = vrot.slane %v6971_v59, %v6953_v8  ;;  %v3845_v39 = vsub.f32 %v6868_v35, %v3749_v6  ;;  %v3888_v27 = vmul.f32 1.442695, %v3843_v4 }
 0x870   : > { %5873 = vpow2.f32 %v3910_v51  ;;  %v3838_v19 = vsub.f32 %v6833_v14, %v3721_v9  ;;  %v3876_v5 = vmul.f32 1.442695, %v3837_v50  ;;  %v3729_v46 = vrot.slane %v7001_v37, %v6452_v40 }
 0x871   : > { %4018 = vperm.xlu1 %5784, %v7007_v55   ;;  %5875 = vpow2.f32 %v3872_v43  ;;  %v3856_v35 = vsub.f32 %v6860_v29, %v3793_v38  ;;  %v3892_v51 = vmul.f32 1.442695, %v3845_v39  ;;  %v3733_v43 = vrot.slane %v7001_v37, %v6937_v36 }
 0x872   : > { %5877 = vpow2.f32 %v3870_v26  ;;  %v7031_v61 = vpop.xlane.xlu0 %3659  ;;  %v3878_v42 = vmul.f32 1.442695, %v3838_v19  ;;  %v3840_v54 = vsub.f32 %v6846_v45, %v3729_v46  ;;  %v3737_v6 = vrot.slane %v7001_v37, %v6945_v31 }
 0x873   : > { %5879 = vpow2.f32 %v3880_v1  ;;  %v3681_v14 = vrot.slane %v7031_v61, %v6452_v40  ;;  %v3914_v29 = vmul.f32 1.442695, %v3856_v35  ;;  %v3689_v26 = vrot.slane %v7031_v61, %v6945_v31 }
 0x874   : > { %5881 = vpow2.f32 %v3874_v44  ;;  %v3841_v45 = vsub.f32 %v6853_v23, %v3733_v43  ;;  %v3882_v4 = vmul.f32 1.442695, %v3840_v54  ;;  %v3697_v44 = vrot.slane %v7031_v61, %v6953_v8 }
 0x875   : > { %5883 = vpow2.f32 %v3888_v27  ;;  %v3828_v1 = vsub.f32 %v6874_v63, %v3681_v14  ;;  %v3830_v63 = vsub.f32 %v6900_v20, %v3689_v26  ;;  %v3745_v39 = vrot.slane %v7001_v37, %v6953_v8 }
 0x876   : > { %5885 = vpow2.f32 %v3876_v5  ;;  %v3842_v23 = vsub.f32 %v6856_v25, %v3737_v6  ;;  %v3884_v27 = vmul.f32 1.442695, %v3841_v45  ;;  %v3832_v46 = vsub.f32 %v6919_v47, %v3697_v44 }
 0x877   : > { %v7019_v48 = vpop.eup %5867  ;;  %5887 = vpow2.f32 %v3892_v51  ;;  %v3858_v38 = vmul.f32 1.442695, %v3828_v1  ;;  %v3862_v20 = vmul.f32 1.442695, %v3830_v63  ;;  %v3797_v35 = vrot.slane %v6971_v59, %v6958_v57 }
 0x878   : > { %v7021_v49 = vpop.eup %5869  ;;  %4021 = vperm.xlu0 %5785, %v7019_v48   ;;  %5889 = vpow2.f32 %v3878_v42  ;;  %v3844_v37 = vsub.f32 %v6862_v7, %v3745_v39  ;;  %v3886_v25 = vmul.f32 1.442695, %v3842_v23  ;;  %v3866_v42 = vmul.f32 1.442695, %v3832_v46 }
 0x879   : > { %4024 = vperm.xlu1 %5784, %v7021_v49   ;;  %v7033_v58 = vpop.eup %5871  ;;  %5891 = vpow2.f32 %v3914_v29  ;;  %v3857_v47 = vsub.f32 %v6890_v53, %v3797_v35  ;;  %v3685_v59 = vrot.slane %v7031_v61, %v6937_v36  ;;  %v3693_v26 = vrot.slane %v7031_v61, %v6940_v22 }
 0x87a   : > { %v7035_v56 = vpop.eup %5873  ;;  %5893 = vpow2.f32 %v3882_v4  ;;  %v3890_v43 = vmul.f32 1.442695, %v3844_v37  ;;  %v3701_v45 = vrot.slane %v7031_v61, %v6958_v57 }
 0x87b   : > { %v7045_v62 = vpop.eup %5875  ;;  %5895 = vpow2.f32 %v3858_v38  ;;  %v3916_v29 = vmul.f32 1.442695, %v3857_v47  ;;  %v3829_v53 = vsub.f32 %v6904_v21, %v3685_v59  ;;  %v3831_v4 = vsub.f32 %v6916_v2, %v3693_v26 }
 0x87c   : > { %4030 = vperm.xlu0 %5785, %v7033_v58   ;;  %v7047_v52 = vpop.eup %5877  ;;  %5897 = vpow2.f32 %v3884_v27  ;;  %v3833_v21 = vsub.f32 %v6927_v18, %v3701_v45 }
 0x87d   : > { %4027 = vperm.xlu1 %5784, %v7035_v56   ;;  %v7057_v9 = vpop.eup %5879  ;;  %5899 = vpow2.f32 %v3862_v20  ;;  %v3860_v44 = vmul.f32 1.442695, %v3829_v53  ;;  %v3864_v39 = vmul.f32 1.442695, %v3831_v4 }
 0x87e   : > { %v7059_v50 = vpop.eup %5881  ;;  %5901 = vpow2.f32 %v3886_v25  ;;  %v3868_v2 = vmul.f32 1.442695, %v3833_v21 }
 0x87f   : > { %v7069_v19 = vpop.eup %5883  ;;  %5903 = vpow2.f32 %v3866_v42 }
 0x880   : > { %3970 = vperm.xlu0 %5785, %v7045_v62   ;;  %v7071_v5 = vpop.eup %5885  ;;  %5905 = vpow2.f32 %v3890_v43 }
 0x881   : > { %3967 = vperm.xlu1 %5784, %v7047_v52   ;;  %v7079_v51 = vpop.eup %5887  ;;  %5907 = vpow2.f32 %v3916_v29 }
 0x882   : > { %v7081_v14 = vpop.eup %5889  ;;  %5909 = vpow2.f32 %v3860_v44 }
 0x883   : > { %v7088_v7 = vpop.eup %5891  ;;  %5911 = vpow2.f32 %v3864_v39 }
 0x884   : > { %3982 = vperm.xlu0 %5785, %v7057_v9   ;;  %v7090_v54 = vpop.eup %5893  ;;  %5913 = vpow2.f32 %v3868_v2 }
 0x885   : > { %3973 = vperm.xlu1 %5784, %v7059_v50   ;;  %v7097_v1 = vpop.eup %5895 }
 0x886   : > { %v7099_v6 = vpop.eup %5897 }
 0x887   : > { %v7106_v63 = vpop.eup %5899 }
 0x888   : > { %3994 = vperm.xlu0 %5785, %v7069_v19   ;;  %7682 = vst [vmem:[#allocation18_spill] sm:$0xff] %v7106_v63  ;;  %v7108_v38 = vpop.eup %5901 }
 0x889   : > { %3976 = vperm.xlu1 %5784, %v7071_v5   ;;  %v7113_v23 = vpop.eup %5903 }
 0x88a   : > { %7683 = vst [vmem:[#allocation19_spill] sm:$0xff] %v7113_v23  ;;  %v7115_v27 = vpop.eup %5905 }
 0x88b   : > { %v7119_v61 = vpop.eup %5907 }
 0x88c   : > { %4000 = vperm.xlu0 %5785, %v7079_v51   ;;  %v7122_v46 = vpop.eup %5909 }
 0x88d   : > { %3979 = vperm.xlu1 %5784, %v7081_v14   ;;  %v7125_v18 = vpop.eup %5911 }
 0x88e   : > { %7684 = vst [vmem:[#allocation20_spill] sm:$0xff] %v7125_v18  ;;  %v7128_v20 = vpop.eup %5913 }
 0x88f   : > { %7685 = vst [vmem:[#allocation21_spill] sm:$0xff] %v7128_v20 }
 0x890   : > { %4033 = vperm.xlu0 %5785, %v7088_v7  }
 0x891   : > { %3985 = vperm.xlu1 %5784, %v7090_v54  }
 0x894   : > { %3949 = vperm.xlu0 %5785, %v7097_v1  }
 0x895   : > { %3988 = vperm.xlu1 %5784, %v7099_v6  }
 0x898   : > { %3955 = vperm.xlu0 %5785, %v7106_v63  }
 0x899   : > { %3991 = vperm.xlu1 %5784, %v7108_v38  }
 0x89c   : > { %3961 = vperm.xlu0 %5785, %v7113_v23  }
 0x89d   : > { %3997 = vperm.xlu1 %5784, %v7115_v27  }
 0x8a1   : > { %4036 = vperm.xlu1 %5784, %v7119_v61  }
 0x8a5   : > { %3952 = vperm.xlu1 %5784, %v7122_v46  }
 0x8a9   : > { %3958 = vperm.xlu1 %5784, %v7125_v18  }
 0x8ad   : > { %3964 = vperm.xlu1 %5784, %v7128_v20  }
 0x8e0   : > { %v4004_v35 = vpop.permute.xlu1 %4003 }
 0x8e1   : > { %v4013_v47 = vpop.permute.xlu0 %4012  ;;  %v4113_v30 = vrot.slane %v4004_v35, %v6804_v60 }
 0x8e4   : > { %v4007_v37 = vpop.permute.xlu1 %4006 }
 0x8e5   : > { %v4117_v39 = vrot.slane %v4007_v37, %v6804_v60 }
 0x8e7   : > { %v4173_v13 = vsel %vm3622_vm14, %v4117_v39, %v4113_v30 }
 0x8e8   : > { %v4010_v25 = vpop.permute.xlu1 %4009 }
 0x8e9   : > { %v4121_v3 = vrot.slane %v4010_v25, %v6804_v60 }
 0x8eb   : > { %v4174_v37 = vsel %vm3624_vm15, %v4121_v3, %v4173_v13 }
 0x8ec   : > { %v4016_v42 = vpop.permute.xlu1 %4015 }
 0x8f0   : > { %v4019_v43 = vpop.permute.xlu1 %4018 }
 0x8f1   : > { %v4133_v35 = vrot.slane %v4019_v43, %v6804_v60 }
 0x8f7   : > { %v4022_v59 = vpop.permute.xlu0 %4021 }
 0x8f8   : > { %v4025_v29 = vpop.permute.xlu1 %4024 }
 0x8fb   : > { %v7131_v26 = vpop.permute.xlu0 %4030 }
 0x8fc   : > { %v4028_v53 = vpop.permute.xlu1 %4027 }
 0x8ff   : > { %v3971_v45 = vpop.permute.xlu0 %3970 }
 0x900   : > { %v3968_v4 = vpop.permute.xlu1 %3967  ;;  %v4069_v32 = vrot.slane %v3971_v45, %v6804_v60 }
 0x901   : > { %v4065_v2 = vrot.slane %v3968_v4, %v6804_v60  ;;  %v4129_v4 = vrot.slane %v4016_v42, %v6804_v60 }
 0x903   : > { %v3983_v21 = vpop.permute.xlu0 %3982  ;;  %v4163_v18 = vsel %vm3622_vm14, %v4069_v32, %v4065_v2  ;;  %v4141_v2 = vrot.slane %v4025_v29, %v6804_v60 }
 0x904   : > { %v3974_v44 = vpop.permute.xlu1 %3973 }
 0x905   : > { %v4073_v41 = vrot.slane %v3974_v44, %v6804_v60  ;;  %v4125_v44 = vrot.slane %v4013_v47, %v6804_v60 }
 0x907   : > { %v3995_v20 = vpop.permute.xlu0 %3994  ;;  %v4164_v45 = vsel %vm3624_vm15, %v4073_v41, %v4163_v18  ;;  %v4175_v3 = vsel %vm3626_vm2, %v4125_v44, %v4174_v37  ;;  %v4137_v37 = vrot.slane %v4022_v59, %v6804_v60 }
 0x908   : > { %v3977_v11 = vpop.permute.xlu1 %3976 }
 0x909   : > { %v4077_v16 = vrot.slane %v3977_v11, %v6804_v60  ;;  %v4085_v11 = vrot.slane %v3983_v21, %v6804_v60 }
 0x90b   : > { %v4165_v63 = vsel %vm3626_vm2, %v4077_v16, %v4164_v45  ;;  %v4001_v13 = vpop.permute.xlu0 %4000 }
 0x90c   : > { %v3980_v23 = vpop.permute.xlu1 %3979 }
 0x90d   : > { %v4081_v25 = vrot.slane %v3980_v23, %v6804_v60  ;;  %v4176_v23 = vsel %vm3628_vm3, %v4129_v4, %v4175_v3  ;;  %v4145_v4 = vrot.slane %v4028_v53, %v6804_v60  ;;  %v4109_v3 = vrot.slane %v4001_v13, %v6804_v60 }
 0x90e   : > { %v4177_v18 = vsel %vm3630_vm4, %v4133_v35, %v4176_v23  ;;  %v4101_v35 = vrot.slane %v3995_v20, %v6804_v60 }
 0x90f   : > { %v4166_v30 = vsel %vm3628_vm3, %v4081_v25, %v4165_v63  ;;  %v4197_v47 = vsel %vm3657_vm5, %v4177_v18, 0.0  ;;  %v4034_v63 = vpop.permute.xlu0 %4033 }
 0x910   : > { %v3986_v32 = vpop.permute.xlu1 %3985  ;;  %v4167_v39 = vsel %vm3630_vm4, %v4085_v11, %v4166_v30  ;;  %v4178_v30 = vsel %vm3622_vm14, %v4141_v2, %v4137_v37  ;;  %v4153_v53 = vrot.slane %v4034_v63, %v6804_v60 }
 0x911   : > { %v4191_v41 = vsel %vm3657_vm5, %v4167_v39, 0.0  ;;  %v4089_v43 = vrot.slane %v3986_v32, %v6804_v60  ;;  %v4149_v32 = vrot.slane %v7131_v26, %v6804_v60  ;;  %v4179_v59 = vsel %vm3624_vm15, %v4145_v4, %v4178_v30 }
 0x912   : > { %4192 = vadd.xlane.f32.xlu0 %v4191_v41 }
 0x913   : > { %v3950_v39 = vpop.permute.xlu0 %3949 }
 0x914   : > { %v3989_v42 = vpop.permute.xlu1 %3988  ;;  %v4041_v2 = vrot.slane %v3950_v39, %v6804_v60 }
 0x915   : > { %v4093_v16 = vrot.slane %v3989_v42, %v6804_v60  ;;  %v4180_v42 = vsel %vm3626_vm2, %v4149_v32, %v4179_v59 }
 0x916   : > { %4198 = vadd.xlane.f32.xlu0 %v4197_v47 }
 0x917   : > { %v4168_v25 = vsel %vm3622_vm14, %v4093_v16, %v4089_v43  ;;  %v4181_v16 = vsel %vm3628_vm3, %v4153_v53, %v4180_v42  ;;  %v3956_v43 = vpop.permute.xlu0 %3955 }
 0x918   : > { %v3992_v21 = vpop.permute.xlu1 %3991  ;;  %v4049_v4 = vrot.slane %v3956_v43, %v6804_v60 }
 0x919   : > { %v4097_v45 = vrot.slane %v3992_v21, %v6804_v60 }
 0x91b   : > { %v4169_v44 = vsel %vm3624_vm15, %v4097_v45, %v4168_v25 }
 0x91c   : > { %v3998_v11 = vpop.permute.xlu1 %3997  ;;  %v4170_v41 = vsel %vm3626_vm2, %v4101_v35, %v4169_v44  ;;  %v3962_v44 = vpop.permute.xlu0 %3961 }
 0x91d   : > { %v4105_v29 = vrot.slane %v3998_v11, %v6804_v60  ;;  %v4057_v32 = vrot.slane %v3962_v44, %v6804_v60 }
 0x91f   : > { %v4171_v23 = vsel %vm3628_vm3, %v4105_v29, %v4170_v41 }
 0x920   : > { %v4037_v20 = vpop.permute.xlu1 %4036  ;;  %v4172_v18 = vsel %vm3630_vm4, %v4109_v3, %v4171_v23 }
 0x921   : > { %v4157_v26 = vrot.slane %v4037_v20, %v6804_v60  ;;  %v4194_v47 = vsel %vm3657_vm5, %v4172_v18, 0.0 }
 0x922   : > { %4195 = vadd.xlane.f32.xlu1 %v4194_v47 }
 0x923   : > { %v4182_v13 = vsel %vm3630_vm4, %v4157_v26, %v4181_v16 }
 0x924   : > { %v3953_v63 = vpop.permute.xlu1 %3952  ;;  %v4200_v21 = vsel %vm3657_vm5, %v4182_v13, 0.0 }
 0x925   : > { %v4045_v37 = vrot.slane %v3953_v63, %v6804_v60  ;;  %4201 = vadd.xlane.f32.xlu0 %v4200_v21 }
 0x927   : > { %v4158_v45 = vsel %vm3622_vm14, %v4045_v37, %v4041_v2 }
 0x928   : > { %v3959_v25 = vpop.permute.xlu1 %3958  ;;  %v4159_v11 = vsel %vm3624_vm15, %v4049_v4, %v4158_v45 }
 0x929   : > { %v4053_v35 = vrot.slane %v3959_v25, %v6804_v60 }
 0x92b   : > { %v4160_v30 = vsel %vm3626_vm2, %v4053_v35, %v4159_v11 }
 0x92c   : > { %v3965_v29 = vpop.permute.xlu1 %3964  ;;  %v4161_v59 = vsel %vm3628_vm3, %v4057_v32, %v4160_v30 }
 0x92d   : > { %v4061_v39 = vrot.slane %v3965_v29, %v6804_v60 }
 0x92f   : > { %v4162_v3 = vsel %vm3630_vm4, %v4061_v39, %v4161_v59 }
 0x930   : > { %v4188_v53 = vsel %vm3657_vm5, %v4162_v3, 0.0 }
 0x931   : > { %4189 = vadd.xlane.f32.xlu1 %v4188_v53 }
 0x99f   : > { %v4193_v41 = vpop.xlane.xlu0 %4192 }
 0x9a3   : > { %v4199_v23 = vpop.xlane.xlu0 %4198 }
 0x9a4   : > { %5915 = vrcp.f32 %v4199_v23 }
 0x9ae   : > { %v5916_v20 = vpop.eup %5915 }
 0x9af   : > { %v4300_v18 = vrot.slane %v5916_v20, %v6940_v22  ;;  %v4292_v42 = vrot.slane %v5916_v20, %v6937_v36  ;;  %v4308_v60 = vrot.slane %v5916_v20, %v6958_v57  ;;  %v4296_v16 = vrot.slane %v5916_v20, %v6945_v31  ;;  %v4196_v44 = vpop.xlane.xlu1 %4195 }
 0x9b0   : > { %v4288_v21 = vrot.slane %v5916_v20, %v6452_v40 }
 0x9b1   : > { %v4384_v26 = vmul.f32 %v6966_v34, %v4300_v18  ;;  %v4382_v47 = vmul.f32 %v6968_v28, %v4292_v42  ;;  %v4386_v13 = vmul.f32 %v7007_v55, %v4308_v60  ;;  %v4383_v63 = vmul.f32 %v6987_v33, %v4296_v16 }
 0x9b2   : > { %v4202_v43 = vpop.xlane.xlu0 %4201  ;;  %v4381_v34 = vmul.f32 %v6963_v24, %v4288_v21  ;;  %v4304_v28 = vrot.slane %v5916_v20, %v6953_v8 }
 0x9b3   : > { %5917 = vrcp.f32 %v4202_v43  ;;  %4500 = vperm.xlu0 %5785, %v4384_v26   ;;  %4490 = vperm.xlu1 %5784, %v4382_v47  }
 0x9b4   : > { %5919 = vrcp.f32 %v4193_v41  ;;  %v4385_v37 = vmul.f32 %v6996_v17, %v4304_v28 }
 0x9b5   : > { %5921 = vrcp.f32 %v4196_v44 }
 0x9b7   : > { %4510 = vperm.xlu0 %5785, %v4386_v13   ;;  %4495 = vperm.xlu1 %5784, %v4383_v63   ;;  %v7687_v63 = vld [vmem:[#allocation19_spill] sm:$0xff] }
 0x9bb   : > { %4485 = vperm.xlu1 %5784, %v4381_v34  }
 0x9bd   : > { %v5918_v2 = vpop.eup %5917 }
 0x9be   : > { %v4316_v45 = vrot.slane %v5918_v2, %v6937_v36  ;;  %v4320_v4 = vrot.slane %v5918_v2, %v6945_v31  ;;  %v4312_v25 = vrot.slane %v5918_v2, %v6452_v40  ;;  %v4324_v24 = vrot.slane %v5918_v2, %v6940_v22  ;;  %v5920_v11 = vpop.eup %5919 }
 0x9bf   : > { %4505 = vperm.xlu1 %5784, %v4385_v37   ;;  %v4332_v17 = vrot.slane %v5918_v2, %v6958_v57  ;;  %v4328_v32 = vrot.slane %v5918_v2, %v6953_v8  ;;  %v4248_v39 = vrot.slane %v5920_v11, %v6945_v31  ;;  %v4240_v59 = vrot.slane %v5920_v11, %v6452_v40  ;;  %v5922_v41 = vpop.eup %5921 }
 0x9c0   : > { %v4388_v33 = vmul.f32 %v7021_v49, %v4316_v45  ;;  %v4389_v55 = vmul.f32 %v7035_v56, %v4320_v4  ;;  %v4387_v35 = vmul.f32 %v7019_v48, %v4312_v25  ;;  %v4390_v30 = vmul.f32 %v7033_v58, %v4324_v24 }
 0x9c1   : > { %v4392_v49 = vmul.f32 %v7119_v61, %v4332_v17  ;;  %v4244_v56 = vrot.slane %v5920_v11, %v6937_v36  ;;  %v4391_v29 = vmul.f32 %v7088_v7, %v4328_v32  ;;  %v4371_v58 = vmul.f32 %v7059_v50, %v4248_v39  ;;  %v4190_v50 = vpop.xlane.xlu1 %4189 }
 0x9c2   : > { %4520 = vperm.xlu0 %5785, %v4388_v33   ;;  %v4252_v3 = vrot.slane %v5920_v11, %v6940_v22  ;;  %v4369_v61 = vmul.f32 %v7047_v52, %v4240_v59  ;;  %v4256_v53 = vrot.slane %v5920_v11, %v6953_v8  ;;  %v4260_v23 = vrot.slane %v5920_v11, %v6958_v57 }
 0x9c3   : > { %4525 = vperm.xlu1 %5784, %v4389_v55   ;;  %v4370_v48 = vmul.f32 %v7045_v62, %v4244_v56  ;;  %v4272_v20 = vrot.slane %v5922_v41, %v6945_v31  ;;  %v4268_v42 = vrot.slane %v5922_v41, %v6937_v36  ;;  %5923 = vrcp.f32 %v4190_v50 }
 0x9c4   : > { %v4372_v7 = vmul.f32 %v7071_v5, %v4252_v3  ;;  %v4373_v62 = vmul.f32 %v7081_v14, %v4256_v53  ;;  %v4374_v18 = vmul.f32 %v7057_v9, %v4260_v23  ;;  %v4276_v5 = vrot.slane %v5922_v41, %v6940_v22  ;;  %v7692_v53 = vld [vmem:[#allocation13_spill] sm:$0xff] }
 0x9c5   : > { %v4377_v52 = vmul.f32 %v7108_v38, %v4272_v20  ;;  %v4376_v26 = vmul.f32 %v7099_v6, %v4268_v42  ;;  %v4264_v47 = vrot.slane %v5922_v41, %v6452_v40  ;;  %v4280_v60 = vrot.slane %v5922_v41, %v6953_v8  ;;  %v7693_v20 = vld [vmem:[#allocation14_spill] sm:$0xff] }
 0x9c6   : > { %4515 = vperm.xlu0 %5785, %v4387_v35   ;;  %v4378_v14 = vmul.f32 %v7069_v19, %v4276_v5  ;;  %v4284_v38 = vrot.slane %v5922_v41, %v6958_v57  ;;  %v4836_v41 = vrot.slane %v7692_v53, 1  ;;  %v4838_v23 = vrot.slane %v7692_v53, 3  ;;  %v7694_v5 = vld [vmem:[#allocation15_spill] sm:$0xff] }
 0x9c7   : > { %4530 = vperm.xlu1 %5784, %v4390_v30   ;;  %v4375_v9 = vmul.f32 %v7090_v54, %v4264_v47  ;;  %v4379_v16 = vmul.f32 %v7115_v27, %v4280_v60 }
 0x9c8   : > { %v4380_v6 = vmul.f32 %v7079_v51, %v4284_v38 }
 0x9ca   : > { %4540 = vperm.xlu0 %5785, %v4392_v49  }
 0x9cb   : > { %4535 = vperm.xlu1 %5784, %v4391_v29   ;;  %v7691_v29 = vld [vmem:[#allocation12_spill] sm:$0xff] }
 0x9cd   : > { %v5924_v43 = vpop.eup %5923 }
 0x9ce   : > { %4430 = vperm.xlu0 %5785, %v4370_v48   ;;  %v4220_v13 = vrot.slane %v5924_v43, %v6937_v36  ;;  %v4216_v54 = vrot.slane %v5924_v43, %v6452_v40  ;;  %v4224_v27 = vrot.slane %v5924_v43, %v6945_v31  ;;  %v4232_v51 = vrot.slane %v5924_v43, %v6953_v8  ;;  %v7686_v36 = vld [vmem:[#allocation18_spill] sm:$0xff]  ;;  %v7690_v8 = vld [vmem:[#allocation21_spill] sm:$0xff] }
 0x9cf   : > { %4435 = vperm.xlu1 %5784, %v4371_v58   ;;  %v4236_v31 = vrot.slane %v5924_v43, %v6958_v57 }
 0x9d0   : > { %v4364_v19 = vmul.f32 %v7122_v46, %v4220_v13  ;;  %v4228_v46 = vrot.slane %v5924_v43, %v6940_v22  ;;  %v4367_v40 = vmul.f32 %v7687_v63, %v4232_v51 }
 0x9d1   : > { %v4368_v34 = vmul.f32 %v7690_v8, %v4236_v31 }
 0x9d2   : > { %4425 = vperm.xlu0 %5785, %v4369_v61  }
 0x9d3   : > { %4440 = vperm.xlu1 %5784, %v4372_v7   ;;  %v4837_v7 = vrot.slane %v7692_v53, 2 }
 0x9d6   : > { %4445 = vperm.xlu0 %5785, %v4373_v62   ;;  %v4839_v62 = vrot.slane %v7692_v53, 4 }
 0x9d7   : > { %4450 = vperm.xlu1 %5784, %v4374_v18  }
 0x9da   : > { %4465 = vperm.xlu0 %5785, %v4377_v52  }
 0x9db   : > { %4460 = vperm.xlu1 %5784, %v4376_v26  }
 0x9de   : > { %4470 = vperm.xlu0 %5785, %v4378_v14  }
 0x9df   : > { %4455 = vperm.xlu1 %5784, %v4375_v9   ;;  %v7695_v9 = vld [vmem:[#allocation16_spill] sm:$0xff] }
 0x9e2   : > { %4475 = vperm.xlu0 %5785, %v4379_v16  }
 0x9e3   : > { %4545 = vrot.lane.b32.xlu1 %v6620_v0, %s6005_s25  ;;  %v4363_v0 = vmul.f32 %v7097_v1, %v4216_v54  ;;  %v7689_v1 = vld [vmem:[#allocation17_spill] sm:$0xff] }
 0x9e6   : > { %4480 = vperm.xlu0 %5785, %v4380_v6  }
 0x9e7   : > { %4549 = vrot.lane.b32.xlu1 %v6630_v10, %s6005_s25  ;;  %v4365_v10 = vmul.f32 %v7686_v36, %v4224_v27 }
 0x9ea   : > { %4547 = vrot.lane.b32.xlu0 %v6632_v12, %s6005_s25  ;;  %v7688_v12 = vld [vmem:[#allocation20_spill] sm:$0xff] }
 0x9eb   : > { %4400 = vperm.xlu1 %5784, %v4364_v19   ;;  %v4366_v21 = vmul.f32 %v7688_v12, %v4228_v46  ;;  %v7324_v12 = vstv %s7292_s22 }
 0x9ee   : > { %4551 = vrot.lane.b32.xlu0 %v6640_v15, %s6005_s25 }
 0x9ef   : > { %4395 = vperm.xlu1 %5784, %v4363_v0  }
 0x9f2   : > { %4405 = vperm.xlu0 %5785, %v4365_v10  }
 0x9f3   : > { %4415 = vperm.xlu1 %5784, %v4367_v40  }
 0x9f6   : > { %4410 = vperm.xlu0 %5785, %v4366_v21  }
 0x9f7   : > { %4543 = vrot.lane.b32.xlu1 %v7689_v1, %s6005_s25  ;;  %s6015_s25 = smov 16  }
 0x9fa   : > { %4420 = vperm.xlu0 %5785, %v4368_v34  }
 0xa32   : > { %v7264_v15 = vpop.permute.xlu1 %4490  ;;  %v7268_v22 = vpop.permute.xlu0 %4500 }
 0xa36   : > { %v7266_v28 = vpop.permute.xlu1 %4495  ;;  %v7272_v37 = vpop.permute.xlu0 %4510 }
 0xa3a   : > { %v7270_v2 = vpop.permute.xlu1 %4485 }
 0xa3e   : > { %v7274_v45 = vpop.permute.xlu1 %4505 }
 0xa41   : > { %v7276_v57 = vpop.permute.xlu0 %4520 }
 0xa42   : > { %v7278_v4 = vpop.permute.xlu1 %4525 }
 0xa45   : > { %v7280_v33 = vpop.permute.xlu0 %4515 }
 0xa46   : > { %v7282_v55 = vpop.permute.xlu1 %4530 }
 0xa49   : > { %v7284_v25 = vpop.permute.xlu0 %4540 }
 0xa4a   : > { %v7286_v24 = vpop.permute.xlu1 %4535 }
 0xa4d   : > { %v4431_v44 = vpop.permute.xlu0 %4430 }
 0xa4e   : > { %v4436_v35 = vpop.permute.xlu1 %4435 }
 0xa51   : > { %v4426_v17 = vpop.permute.xlu0 %4425 }
 0xa52   : > { %v4441_v11 = vpop.permute.xlu1 %4440 }
 0xa55   : > { %v4446_v30 = vpop.permute.xlu0 %4445 }
 0xa56   : > { %v4451_v32 = vpop.permute.xlu1 %4450 }
 0xa59   : > { %v7288_v49 = vpop.permute.xlu0 %4465 }
 0xa5a   : > { %v7290_v56 = vpop.permute.xlu1 %4460 }
 0xa5d   : > { %v7295_v48 = vpop.permute.xlu0 %4470 }
 0xa5e   : > { %v7300_v61 = vpop.permute.xlu1 %4455 }
 0xa61   : > { %v7321_v0 = vpop.permute.xlu0 %4475 }
 0xa62   : > { %v4546_v13 = vpop.permute.xlu1 %4545 }
 0xa63   : > { %v4564_v51 = vmul.f32 %v4546_v13, %v4426_v17  ;;  %v4565_v36 = vmul.f32 %v4546_v13, %v4431_v44  ;;  %v4566_v10 = vmul.f32 %v4546_v13, %v4436_v35  ;;  %v4567_v46 = vmul.f32 %v4546_v13, %v4441_v11 }
 0xa64   : > { %v4568_v63 = vmul.f32 %v4546_v13, %v4446_v30  ;;  %v4569_v40 = vmul.f32 %v4546_v13, %v4451_v32 }
 0xa65   : > { %v4631_v31 = vsel %vm4588_vm6, %v4564_v51, 0.0  ;;  %v4638_v1 = vsel %vm4588_vm6, %v4565_v36, 0.0  ;;  %v4645_v8 = vsel %vm4588_vm6, %v4566_v10, 0.0  ;;  %v4652_v34 = vsel %vm4588_vm6, %v4567_v46, 0.0  ;;  %v4481_v46 = vpop.permute.xlu0 %4480 }
 0xa66   : > { %v4632_v3 = vrot.slane %v4631_v31, 4  ;;  %v4639_v58 = vrot.slane %v4638_v1, 4  ;;  %v4646_v17 = vrot.slane %v4645_v8, 4  ;;  %v4653_v44 = vrot.slane %v4652_v34, 4  ;;  %v4550_v35 = vpop.permute.xlu1 %4549 }
 0xa67   : > { %v4659_v11 = vsel %vm4588_vm6, %v4568_v63, 0.0  ;;  %v4666_v30 = vsel %vm4588_vm6, %v4569_v40, 0.0  ;;  %v4576_v32 = vmul.f32 %v4550_v35, %v7270_v2  ;;  %v4577_v13 = vmul.f32 %v4550_v35, %v7264_v15 }
 0xa68   : > { %v4633_v51 = vadd.f32 %v4632_v3, %v4631_v31  ;;  %v4640_v59 = vadd.f32 %v4639_v58, %v4638_v1  ;;  %v4647_v36 = vadd.f32 %v4646_v17, %v4645_v8  ;;  %v4654_v39 = vadd.f32 %v4653_v44, %v4652_v34 }
 0xa69   : > { %v4660_v10 = vrot.slane %v4659_v11, 4  ;;  %v4667_v21 = vrot.slane %v4666_v30, 4  ;;  %v4578_v27 = vmul.f32 %v4550_v35, %v7266_v28  ;;  %v4579_v54 = vmul.f32 %v4550_v35, %v7268_v22 }
 0xa6a   : > { %v4634_v19 = vrot.slane %v4633_v51, 2  ;;  %v4641_v16 = vrot.slane %v4640_v59, 2  ;;  %v4648_v63 = vrot.slane %v4647_v36, 2  ;;  %v4655_v60 = vrot.slane %v4654_v39, 2 }
 0xa6b   : > { %v7337_v40 = vadd.f32 %v4660_v10, %v4659_v11  ;;  %v7339_v2 = vadd.f32 %v4667_v21, %v4666_v30  ;;  %v4580_v15 = vmul.f32 %v4550_v35, %v7274_v45  ;;  %v4581_v58 = vmul.f32 %v4550_v35, %v7272_v37 }
 0xa6c   : > { %v4635_v3 = vadd.f32 %v4634_v19, %v4633_v51  ;;  %v4642_v31 = vadd.f32 %v4641_v16, %v4640_v59  ;;  %v4649_v1 = vadd.f32 %v4648_v63, %v4647_v36  ;;  %v7343_v8 = vadd.f32 %v4655_v60, %v4654_v39  ;;  %v4548_v39 = vpop.permute.xlu0 %4547 }
 0xa6d   : > { %v4662_v28 = vrot.slane %v7337_v40, 2  ;;  %v4715_v22 = vsel %vm4588_vm6, %v4576_v32, 0.0  ;;  %v4722_v34 = vsel %vm4588_vm6, %v4577_v13, 0.0  ;;  %v4729_v17 = vsel %vm4588_vm6, %v4578_v27, 0.0 }
 0xa6e   : > { %v4636_v44 = vrot.slane %v4635_v3, 1  ;;  %v4643_v21 = vrot.slane %v4642_v31, 1  ;;  %v4650_v11 = vrot.slane %v4649_v1, 1  ;;  %v4657_v45 = vrot.slane %v7343_v8, 1 }
 0xa6f   : > { %v4716_v30 = vrot.slane %v4715_v22, 4  ;;  %v4723_v37 = vrot.slane %v4722_v34, 4  ;;  %v4730_v19 = vrot.slane %v4729_v17, 4  ;;  %v4736_v59 = vsel %vm4588_vm6, %v4579_v54, 0.0  ;;  %v7360_v54 = vpop.permute.xlu1 %4400 }
 0xa70   : > { %v7351_v60 = vadd.f32 %v4636_v44, %v4635_v3  ;;  %v7353_v16 = vadd.f32 %v4643_v21, %v4642_v31  ;;  %v7355_v35 = vadd.f32 %v4650_v11, %v4649_v1  ;;  %v4737_v32 = vrot.slane %v4736_v59, 4 }
 0xa71   : > { %v4717_v13 = vadd.f32 %v4716_v30, %v4715_v22  ;;  %v4724_v27 = vadd.f32 %v4723_v37, %v4722_v34  ;;  %v4731_v51 = vadd.f32 %v4730_v19, %v4729_v17  ;;  %v4743_v36 = vsel %vm4588_vm6, %v4580_v15, 0.0 }
 0xa72   : > { %v4738_v10 = vadd.f32 %v4737_v32, %v4736_v59  ;;  %v4744_v63 = vrot.slane %v4743_v36, 4  ;;  %v4750_v14 = vsel %vm4588_vm6, %v4581_v58, 0.0  ;;  %v4570_v52 = vmul.f32 %v4548_v39, %v7300_v61 }
 0xa73   : > { %v4718_v3 = vrot.slane %v4717_v13, 2  ;;  %v4725_v44 = vrot.slane %v4724_v27, 2  ;;  %v4732_v31 = vrot.slane %v4731_v51, 2  ;;  %v4751_v21 = vrot.slane %v4750_v14, 4 }
 0xa74   : > { %v4739_v1 = vrot.slane %v4738_v10, 2  ;;  %v7362_v11 = vadd.f32 %v4744_v63, %v4743_v36  ;;  %v4571_v22 = vmul.f32 %v4548_v39, %v7290_v56  ;;  %v4572_v34 = vmul.f32 %v4548_v39, %v7288_v49 }
 0xa75   : > { %v4719_v15 = vadd.f32 %v4718_v3, %v4717_v13  ;;  %v4726_v17 = vadd.f32 %v4725_v44, %v4724_v27  ;;  %v4733_v30 = vadd.f32 %v4732_v31, %v4731_v51  ;;  %v7366_v37 = vadd.f32 %v4751_v21, %v4750_v14  ;;  %v7377_v27 = vpop.permute.xlu1 %4395  ;;  %v4552_v3 = vpop.permute.xlu0 %4551 }
 0xa76   : > { %v7368_v58 = vadd.f32 %v4739_v1, %v4738_v10  ;;  %v4573_v19 = vmul.f32 %v4548_v39, %v7295_v48  ;;  %v4574_v59 = vmul.f32 %v4548_v39, %v7321_v0  ;;  %v4575_v42 = vmul.f32 %v4548_v39, %v4481_v46 }
 0xa77   : > { %v4720_v32 = vrot.slane %v4719_v15, 1  ;;  %v4727_v36 = vrot.slane %v4726_v17, 1  ;;  %v4734_v63 = vrot.slane %v4733_v30, 1  ;;  %v4673_v49 = vsel %vm4588_vm6, %v4570_v52, 0.0 }
 0xa78   : > { %v4741_v56 = vrot.slane %v7368_v58, 1  ;;  %v4680_v13 = vsel %vm4588_vm6, %v4571_v22, 0.0  ;;  %v4687_v14 = vsel %vm4588_vm6, %v4572_v34, 0.0  ;;  %v4674_v0 = vrot.slane %v4673_v49, 4 }
 0xa79   : > { %v7379_v51 = vadd.f32 %v4720_v32, %v4719_v15  ;;  %v7381_v10 = vadd.f32 %v4727_v36, %v4726_v17  ;;  %v7383_v48 = vadd.f32 %v4734_v63, %v4733_v30  ;;  %v4681_v44 = vrot.slane %v4680_v13, 4 }
 0xa7a   : > { %v4688_v46 = vrot.slane %v4687_v14, 4  ;;  %v4694_v39 = vsel %vm4588_vm6, %v4573_v19, 0.0  ;;  %v4701_v52 = vsel %vm4588_vm6, %v4574_v59, 0.0  ;;  %v4675_v31 = vadd.f32 %v4674_v0, %v4673_v49  ;;  %v4416_v49 = vpop.permute.xlu1 %4415 }
 0xa7b   : > { %v4695_v21 = vrot.slane %v4694_v39, 4  ;;  %v4702_v1 = vrot.slane %v4701_v52, 4  ;;  %v4708_v22 = vsel %vm4588_vm6, %v4575_v42, 0.0  ;;  %v4682_v34 = vadd.f32 %v4681_v44, %v4680_v13 }
 0xa7c   : > { %v4689_v15 = vadd.f32 %v4688_v46, %v4687_v14  ;;  %v4709_v32 = vrot.slane %v4708_v22, 4  ;;  %v4582_v17 = vmul.f32 %v4552_v3, %v7280_v33  ;;  %v4676_v30 = vrot.slane %v4675_v31, 2 }
 0xa7d   : > { %v4696_v36 = vadd.f32 %v4695_v21, %v4694_v39  ;;  %v7389_v63 = vadd.f32 %v4702_v1, %v4701_v52  ;;  %v4583_v50 = vmul.f32 %v4552_v3, %v7276_v57  ;;  %v4683_v6 = vrot.slane %v4682_v34, 2  ;;  %v4406_v57 = vpop.permute.xlu0 %4405 }
 0xa7e   : > { %v4690_v19 = vrot.slane %v4689_v15, 2  ;;  %v7392_v43 = vadd.f32 %v4709_v32, %v4708_v22  ;;  %v4584_v59 = vmul.f32 %v4552_v3, %v7278_v4  ;;  %v4677_v0 = vadd.f32 %v4676_v30, %v4675_v31 }
 0xa7f   : > { %v4697_v42 = vrot.slane %v4696_v36, 2  ;;  %v4585_v14 = vmul.f32 %v4552_v3, %v7282_v55  ;;  %v4684_v33 = vadd.f32 %v4683_v6, %v4682_v34  ;;  %v4586_v46 = vmul.f32 %v4552_v3, %v7286_v24 }
 0xa80   : > { %v4691_v44 = vadd.f32 %v4690_v19, %v4689_v15  ;;  %v4587_v39 = vmul.f32 %v4552_v3, %v7284_v25  ;;  %v4678_v52 = vrot.slane %v4677_v0, 1  ;;  %v4757_v1 = vsel %vm4588_vm6, %v4582_v17, 0.0  ;;  %v4544_v17 = vpop.permute.xlu1 %4543 }
 0xa81   : > { %v7399_v21 = vadd.f32 %v4697_v42, %v4696_v36  ;;  %v4764_v4 = vsel %vm4588_vm6, %v4583_v50, 0.0  ;;  %v4685_v31 = vrot.slane %v4684_v33, 1  ;;  %v4758_v32 = vrot.slane %v4757_v1, 4 }
 0xa82   : > { %v4692_v22 = vrot.slane %v4691_v44, 1  ;;  %v4765_v30 = vrot.slane %v4764_v4, 4  ;;  %v7403_v13 = vadd.f32 %v4678_v52, %v4677_v0  ;;  %v4771_v24 = vsel %vm4588_vm6, %v4584_v59, 0.0  ;;  %v4411_v59 = vpop.permute.xlu0 %4410 }
 0xa83   : > { %v4778_v25 = vsel %vm4588_vm6, %v4585_v14, 0.0  ;;  %v7408_v6 = vadd.f32 %v4685_v31, %v4684_v33  ;;  %v4759_v34 = vadd.f32 %v4758_v32, %v4757_v1  ;;  %v4772_v50 = vrot.slane %v4771_v24, 4 }
 0xa84   : > { %v7410_v3 = vadd.f32 %v4692_v22, %v4691_v44  ;;  %v4766_v15 = vadd.f32 %v4765_v30, %v4764_v4  ;;  %v4779_v36 = vrot.slane %v4778_v25, 4  ;;  %v4785_v19 = vsel %vm4588_vm6, %v4586_v46, 0.0 }
 0xa85   : > { %v4792_v0 = vsel %vm4588_vm6, %v4587_v39, 0.0  ;;  %v4760_v42 = vrot.slane %v4759_v34, 2  ;;  %v4786_v55 = vrot.slane %v4785_v19, 4  ;;  %v4773_v47 = vadd.f32 %v4772_v50, %v4771_v24 }
 0xa86   : > { %v4767_v52 = vrot.slane %v4766_v15, 2  ;;  %v4793_v38 = vrot.slane %v4792_v0, 4  ;;  %v4780_v14 = vadd.f32 %v4779_v36, %v4778_v25  ;;  %v4558_v33 = vmul.f32 %v4544_v17, %v7377_v27 }
 0xa87   : > { %v4559_v44 = vmul.f32 %v4544_v17, %v7360_v54  ;;  %v4761_v1 = vadd.f32 %v4760_v42, %v4759_v34  ;;  %v7416_v31 = vadd.f32 %v4786_v55, %v4785_v19  ;;  %v4774_v46 = vrot.slane %v4773_v47, 2 }
 0xa88   : > { %v4768_v4 = vadd.f32 %v4767_v52, %v4766_v15  ;;  %v7418_v22 = vadd.f32 %v4793_v38, %v4792_v0  ;;  %v4781_v32 = vrot.slane %v4780_v14, 2  ;;  %v4560_v39 = vmul.f32 %v4544_v17, %v4406_v57  ;;  %v4421_v57 = vpop.permute.xlu0 %4420 }
 0xa89   : > { %v4561_v30 = vmul.f32 %v4544_v17, %v4411_v59  ;;  %v4762_v26 = vrot.slane %v4761_v1, 1  ;;  %v4788_v18 = vrot.slane %v7416_v31, 2  ;;  %v4562_v24 = vmul.f32 %v4544_v17, %v4416_v49 }
 0xa8a   : > { %v4769_v61 = vrot.slane %v4768_v4, 1  ;;  %v4775_v25 = vadd.f32 %v4774_v46, %v4773_v47  ;;  %v7421_v50 = vadd.f32 %v4781_v32, %v4780_v14  ;;  %v4589_v54 = vsel %vm4588_vm6, %v4558_v33, 0.0 }
 0xa8b   : > { %v4596_v27 = vsel %vm4588_vm6, %v4559_v44, 0.0  ;;  %v7425_v55 = vadd.f32 %v4762_v26, %v4761_v1  ;;  %v4590_v34 = vrot.slane %v4589_v54, 4  ;;  %v4603_v0 = vsel %vm4588_vm6, %v4560_v39, 0.0 }
 0xa8c   : > { %v7427_v38 = vadd.f32 %v4769_v61, %v4768_v4  ;;  %v4597_v15 = vrot.slane %v4596_v27, 4  ;;  %v4776_v36 = vrot.slane %v4775_v25, 1  ;;  %v4783_v19 = vrot.slane %v7421_v50, 1 }
 0xa8d   : > { %v4610_v47 = vsel %vm4588_vm6, %v4561_v30, 0.0  ;;  %v4591_v49 = vadd.f32 %v4590_v34, %v4589_v54  ;;  %v4604_v52 = vrot.slane %v4603_v0, 4  ;;  %v4617_v26 = vsel %vm4588_vm6, %v4562_v24, 0.0 }
 0xa8e   : > { %v4598_v42 = vadd.f32 %v4597_v15, %v4596_v27  ;;  %v4611_v59 = vrot.slane %v4610_v47, 4  ;;  %v7432_v14 = vadd.f32 %v4776_v36, %v4775_v25  ;;  %v4563_v61 = vmul.f32 %v4544_v17, %v4421_v57 }
 0xa8f   : > { %v4658_v33 = vadd.f32 %v4657_v45, %v7343_v8  ;;  %v4592_v44 = vrot.slane %v4591_v49, 2  ;;  %v4605_v4 = vadd.f32 %v4604_v52, %v4603_v0  ;;  %v4618_v32 = vrot.slane %v4617_v26, 4 }
 0xa90   : > { %v4599_v1 = vrot.slane %v4598_v42, 2  ;;  %v4612_v46 = vadd.f32 %v4611_v59, %v4610_v47  ;;  %v4624_v39 = vsel %vm4588_vm6, %v4563_v61, 0.0  ;;  %v4663_v30 = vadd.f32 %v4662_v28, %v7337_v40 }
 0xa91   : > { %v4669_v25 = vrot.slane %v7339_v2, 2  ;;  %v4593_v54 = vadd.f32 %v4592_v44, %v4591_v49  ;;  %v4606_v17 = vrot.slane %v4605_v4, 2  ;;  %v4619_v34 = vadd.f32 %v4618_v32, %v4617_v26 }
 0xa92   : > { %v4600_v24 = vadd.f32 %v4599_v1, %v4598_v42  ;;  %v4613_v27 = vrot.slane %v4612_v46, 2  ;;  %v4625_v15 = vrot.slane %v4624_v39, 4  ;;  %v4664_v8 = vrot.slane %v4663_v30, 1 }
 0xa93   : > { %v4670_v45 = vadd.f32 %v4669_v25, %v7339_v2  ;;  %v4594_v57 = vrot.slane %v4593_v54, 1  ;;  %v4607_v0 = vadd.f32 %v4606_v17, %v4605_v4  ;;  %v4620_v52 = vrot.slane %v4619_v34, 2  ;;  %v5852_v2 = vld [vmem:[%s7646_s11] sm:$0xff]  }
 0xa94   : > { %v4601_v36 = vrot.slane %v4600_v24, 1  ;;  %v7444_v47 = vadd.f32 %v4613_v27, %v4612_v46  ;;  %v4626_v59 = vadd.f32 %v4625_v15, %v4624_v39  ;;  %v4665_v61 = vadd.f32 %v4664_v8, %v4663_v30  ;;  %5669 = vmatpush3.bf16.msra.mxu0 %v5852_v2 }
 0xa95   : > { %v4671_v40 = vrot.slane %v4670_v45, 1  ;;  %v7446_v28 = vadd.f32 %v4594_v57, %v4593_v54  ;;  %v4608_v42 = vrot.slane %v4607_v0, 1  ;;  %v7454_v44 = vadd.f32 %v4620_v52, %v4619_v34 }
 0xa96   : > { %v7448_v49 = vadd.f32 %v4601_v36, %v4600_v24  ;;  %v4615_v26 = vrot.slane %v7444_v47, 1  ;;  %v4627_v1 = vrot.slane %v4626_v59, 2  ;;  %v4807_v46 = vmul.f32 %v7324_v12, %v7351_v60 }
 0xa97   : > { %v4672_v4 = vadd.f32 %v4671_v40, %v4670_v45  ;;  %v7458_v32 = vadd.f32 %v4608_v42, %v4607_v0  ;;  %v4808_v39 = vmul.f32 %v7324_v12, %v7353_v16  ;;  %v4809_v30 = vmul.f32 %v7324_v12, %v7355_v35 }
 0xa98   : > { %v4810_v25 = vmul.f32 %v7324_v12, %v4658_v33  ;;  %v4628_v54 = vadd.f32 %v4627_v1, %v4626_v59  ;;  %v4811_v24 = vmul.f32 %v7324_v12, %v4665_v61  ;;  %v4892_v27 = vadd.f32 %v4807_v46, %v7692_v53 }
 0xa99   : > { %v4812_v17 = vmul.f32 %v7324_v12, %v4672_v4  ;;  %v7696_v34 = vmov 0.0   ;;  %v4893_v60 = vadd.f32 %v4836_v41, %v4808_v39  ;;  %v4894_v16 = vadd.f32 %v4837_v7, %v4809_v30 }
 0xa9a   : > { %5670 = vmatprep.subr.bf16.mxu0 %v7696_v34  ;;  %v4895_v35 = vadd.f32 %v4838_v23, %v4810_v25  ;;  %v4742_v33 = vadd.f32 %v4741_v56, %v7368_v58  ;;  %v4629_v15 = vrot.slane %v4628_v54, 1  ;;  %v4896_v8 = vadd.f32 %v4839_v62, %v4811_v24 }
 0xa9b   : > { %v7697_v45 = vrot.slane %v7692_v53, 5  ;;  %v7698_v41 = vrot.slane %v7362_v11, 2  ;;  %v4939_v0 = vrot.slane %v4893_v60, 7  ;;  %v4941_v7 = vrot.slane %v4894_v16, 6 }
 0xa9c   : > { %v4943_v52 = vrot.slane %v4895_v35, 5  ;;  %v4753_v23 = vrot.slane %v7366_v37, 2  ;;  %v4630_v59 = vadd.f32 %v4629_v15, %v4628_v54  ;;  %v4945_v61 = vrot.slane %v4896_v8, 4 }
 0xa9d   : > { %v4897_v57 = vadd.f32 %v7697_v45, %v4812_v17  ;;  %v4747_v36 = vadd.f32 %v7698_v41, %v7362_v11  ;;  %v4940_v56 = vsel %vm3622_vm14, %v4939_v0, %v4892_v27  ;;  %v4819_v53 = vmul.f32 %v7324_v12, %v7379_v51 }
 0xa9e   : > { %v4754_v62 = vadd.f32 %v4753_v23, %v7366_v37  ;;  %v4820_v42 = vmul.f32 %v7324_v12, %v7381_v10  ;;  %v7493_v11 = vmul.f32 %v7324_v12, %v4630_v59  ;;  %v4942_v2 = vsel %vm3624_vm15, %v4941_v7, %v4940_v56 }
 0xa9f   : > { %v4947_v40 = vrot.slane %v4897_v57, 3  ;;  %v4748_v58 = vrot.slane %v4747_v36, 1  ;;  %v4821_v4 = vmul.f32 %v7324_v12, %v7383_v48  ;;  %v4944_v46 = vsel %vm3626_vm2, %v4943_v52, %v4942_v2 }
 0xaa0   : > { %v4755_v39 = vrot.slane %v4754_v62, 1  ;;  %v4822_v37 = vmul.f32 %v7324_v12, %v4742_v33  ;;  %v4904_v30 = vadd.f32 %v4819_v53, %v7694_v5  ;;  %v4946_v51 = vsel %vm3628_vm3, %v4945_v61, %v4944_v46 }
 0xaa1   : > { %v4749_v1 = vadd.f32 %v4748_v58, %v4747_v36  ;;  %v7699_v25 = vrot.slane %v7694_v5, 1  ;;  %v7700_v24 = vrot.slane %v7694_v5, 2  ;;  %v4948_v27 = vsel %vm3630_vm4, %v4947_v40, %v4946_v51 }
 0xaa2   : > { %v4756_v48 = vadd.f32 %v4755_v39, %v4754_v62  ;;  %v7701_v60 = vrot.slane %v7694_v5, 3  ;;  %v7702_v35 = vrot.slane %v7399_v21, 1  ;;  %4949 = vrot.lane.b32.xlu0 %v4948_v27, %s6013_s21  ;;  %v7703_v15 = vrot.slane %v7694_v5, 4 }
 0xaa3   : > { %v4823_v10 = vmul.f32 %v7324_v12, %v4749_v1  ;;  %v4905_v54 = vadd.f32 %v7699_v25, %v4820_v42  ;;  %v4906_v17 = vadd.f32 %v7700_v24, %v4821_v4  ;;  %v7704_v41 = vrot.slane %v7389_v63, 2 }
 0xaa4   : > { %v4907_v16 = vadd.f32 %v7701_v60, %v4822_v37  ;;  %v4700_v33 = vadd.f32 %v7702_v35, %v7399_v21  ;;  %v4824_v0 = vmul.f32 %v7324_v12, %v4756_v48  ;;  %v4711_v52 = vrot.slane %v7392_v43, 2 }
 0xaa5   : > { %v4908_v8 = vadd.f32 %v7703_v15, %v4823_v10  ;;  %v4977_v45 = vrot.slane %v4905_v54, 7  ;;  %v4979_v57 = vrot.slane %v4906_v17, 6  ;;  %v4705_v36 = vadd.f32 %v7704_v41, %v7389_v63 }
 0xaa6   : > { %v4981_v7 = vrot.slane %v4907_v16, 5  ;;  %v4813_v23 = vmul.f32 %v7324_v12, %v7403_v13  ;;  %v4814_v40 = vmul.f32 %v7324_v12, %v7408_v6  ;;  %v7705_v58 = vrot.slane %v7694_v5, 5  ;;  %v5853_v13 = vld [vmem:[%s7646_s11 + $0x8] sm:$0xff]  }
 0xaa7   : > { %v4978_v21 = vsel %vm3622_vm14, %v4977_v45, %v4904_v30  ;;  %v4983_v59 = vrot.slane %v4908_v8, 4  ;;  %v4706_v61 = vrot.slane %v4705_v36, 1  ;;  %v4712_v62 = vadd.f32 %v4711_v52, %v7392_v43  ;;  %5671 = vmatpush3.bf16.msra.mxu0 %v5853_v13 }
 0xaa8   : > { %v4909_v56 = vadd.f32 %v7705_v58, %v4824_v0  ;;  %v4980_v63 = vsel %vm3624_vm15, %v4979_v57, %v4978_v21  ;;  %v4815_v53 = vmul.f32 %v7324_v12, %v7410_v3  ;;  %v4816_v1 = vmul.f32 %v7324_v12, %v4700_v33  ;;  %5672 = vmatprep.subr.bf16.mxu0 %v7696_v34 }
 0xaa9   : > { %v4982_v42 = vsel %vm3626_vm2, %v4981_v7, %v4980_v63  ;;  %v4707_v2 = vadd.f32 %v4706_v61, %v4705_v36  ;;  %v4898_v6 = vadd.f32 %v4813_v23, %v7693_v20  ;;  %v4713_v46 = vrot.slane %v4712_v62, 1 }
 0xaaa   : > { %v4984_v5 = vsel %vm3628_vm3, %v4983_v59, %v4982_v42  ;;  %v4985_v4 = vrot.slane %v4909_v56, 3  ;;  %v7706_v43 = vrot.slane %v7693_v20, 1  ;;  %v7707_v37 = vrot.slane %v7693_v20, 2 }
 0xaab   : > { %v4817_v3 = vmul.f32 %v7324_v12, %v4707_v2  ;;  %v7708_v51 = vrot.slane %v7693_v20, 3  ;;  %v4784_v25 = vadd.f32 %v4783_v19, %v7421_v50  ;;  %v4714_v24 = vadd.f32 %v4713_v46, %v4712_v62 }
 0xaac   : > { %v4899_v39 = vadd.f32 %v7706_v43, %v4814_v40  ;;  %v4900_v30 = vadd.f32 %v7707_v37, %v4815_v53  ;;  %v4986_v54 = vsel %vm3630_vm4, %v4985_v4, %v4984_v5  ;;  %v4789_v27 = vadd.f32 %v4788_v18, %v7416_v31 }
 0xaad   : > { %v4901_v10 = vadd.f32 %v7708_v51, %v4816_v1  ;;  %4987 = vrot.lane.b32.xlu0 %v4986_v54, %s6014_s24  ;;  %v7709_v48 = vrot.slane %v7693_v20, 4  ;;  %v4795_v33 = vrot.slane %v7418_v22, 2  ;;  %v4818_v50 = vmul.f32 %v7324_v12, %v4714_v24 }
 0xaae   : > { %v4958_v17 = vrot.slane %v4899_v39, 7  ;;  %v4960_v16 = vrot.slane %v4900_v30, 6  ;;  %v4790_v34 = vrot.slane %v4789_v27, 1  ;;  %v4825_v15 = vmul.f32 %v7324_v12, %v7425_v55 }
 0xaaf   : > { %v4902_v60 = vadd.f32 %v7709_v48, %v4817_v3  ;;  %v4962_v35 = vrot.slane %v4901_v10, 5  ;;  %v4796_v31 = vadd.f32 %v4795_v33, %v7418_v22  ;;  %v4826_v45 = vmul.f32 %v7324_v12, %v7427_v38 }
 0xab0   : > { %v4959_v19 = vsel %vm3622_vm14, %v4958_v17, %v4898_v6  ;;  %v7710_v57 = vrot.slane %v7693_v20, 5  ;;  %v4791_v0 = vadd.f32 %v4790_v34, %v4789_v27  ;;  %v4827_v7 = vmul.f32 %v7324_v12, %v7432_v14 }
 0xab1   : > { %v4961_v8 = vsel %vm3624_vm15, %v4960_v16, %v4959_v19  ;;  %v4964_v18 = vrot.slane %v4902_v60, 4  ;;  %v4797_v55 = vrot.slane %v4796_v31, 1  ;;  %v4828_v23 = vmul.f32 %v7324_v12, %v4784_v25 }
 0xab2   : > { %v4903_v41 = vadd.f32 %v7710_v57, %v4818_v50  ;;  %v4963_v36 = vsel %vm3626_vm2, %v4962_v35, %v4961_v8  ;;  %v4910_v21 = vadd.f32 %v4825_v15, %v7695_v9  ;;  %v4829_v59 = vmul.f32 %v7324_v12, %v4791_v0 }
 0xab3   : > { %v4965_v52 = vsel %vm3628_vm3, %v4964_v18, %v4963_v36  ;;  %v7711_v38 = vrot.slane %v7695_v9, 1  ;;  %v7712_v61 = vrot.slane %v7695_v9, 2  ;;  %v4798_v58 = vadd.f32 %v4797_v55, %v4796_v31 }
 0xab4   : > { %v4966_v22 = vrot.slane %v4903_v41, 3  ;;  %v7713_v56 = vrot.slane %v7695_v9, 3  ;;  %v4616_v63 = vadd.f32 %v4615_v26, %v7444_v47  ;;  %v4622_v62 = vrot.slane %v7454_v44, 1 }
 0xab5   : > { %v4911_v20 = vadd.f32 %v7711_v38, %v4826_v45  ;;  %v4912_v40 = vadd.f32 %v7712_v61, %v4827_v7  ;;  %v7714_v13 = vrot.slane %v7695_v9, 4  ;;  %v4830_v6 = vmul.f32 %v7324_v12, %v4798_v58 }
 0xab6   : > { %v4913_v14 = vadd.f32 %v7713_v56, %v4828_v23  ;;  %v4967_v53 = vsel %vm3630_vm4, %v4966_v22, %v4965_v52  ;;  %v4623_v4 = vadd.f32 %v4622_v62, %v7454_v44  ;;  %v4801_v46 = vmul.f32 %v7324_v12, %v7446_v28 }
 0xab7   : > { %v4914_v42 = vadd.f32 %v7714_v13, %v4829_v59  ;;  %v4996_v2 = vrot.slane %v4911_v20, 7  ;;  %v4998_v1 = vrot.slane %v4912_v40, 6  ;;  %4968 = vrot.lane.b32.xlu1 %v4967_v53, %s6015_s25  ;;  %v4802_v43 = vmul.f32 %v7324_v12, %v7448_v49  ;;  %v5341_v59 = vld [vmem:[%s7647_s12] ss:$0 sm:$0xff] }
 0xab8   : > { %v5000_v5 = vrot.slane %v4913_v14, 5  ;;  %v4803_v39 = vmul.f32 %v7324_v12, %v7458_v32  ;;  %v7715_v3 = vrot.slane %v7695_v9, 5  ;;  %v4804_v51 = vmul.f32 %v7324_v12, %v4616_v63  ;;  %v5854_v9 = vld [vmem:[%s7646_s11 + $0x10] ss:$0 sps:$4 sm:$0xff]  }
 0xab9   : > { %v4997_v47 = vsel %vm3622_vm14, %v4996_v2, %v4910_v21  ;;  %v5002_v26 = vrot.slane %v4914_v42, 4  ;;  %v4805_v44 = vmul.f32 %v7324_v12, %v4623_v4  ;;  %v4835_v10 = vrot.slane %v7691_v29, 5 }
 0xaba   : > { %v4915_v37 = vadd.f32 %v7715_v3, %v4830_v6  ;;  %v4999_v30 = vsel %vm3624_vm15, %v4998_v1, %v4997_v47  ;;  %v7716_v25 = vrot.slane %v7691_v29, 1  ;;  %v7717_v49 = vrot.slane %v7691_v29, 2 }
 0xabb   : > { %v5001_v28 = vsel %vm3626_vm2, %v5000_v5, %v4999_v30  ;;  %v7718_v27 = vrot.slane %v7691_v29, 3  ;;  %v7719_v48 = vrot.slane %v7691_v29, 4  ;;  %v4886_v16 = vadd.f32 %v4801_v46, %v7691_v29 }
 0xabc   : > { %v4887_v54 = vadd.f32 %v7716_v25, %v4802_v43  ;;  %v4888_v24 = vadd.f32 %v7717_v49, %v4803_v39  ;;  %v5003_v32 = vsel %vm3628_vm3, %v5002_v26, %v5001_v28  ;;  %v5004_v17 = vrot.slane %v4915_v37, 3 }
 0xabd   : > { %v4889_v12 = vadd.f32 %v7718_v27, %v4804_v51  ;;  %v4890_v60 = vadd.f32 %v7719_v48, %v4805_v44  ;;  %v4891_v35 = vadd.f32 %v4835_v10, %v7493_v11  ;;  %v5048_v18 = vsel %vm586_vm0, %v5854_v9, 0 }
 0xabe   : > { %v4922_v33 = vrot.slane %v4887_v54, 7  ;;  %v4924_v50 = vrot.slane %v4888_v24, 6  ;;  %v5005_v19 = vsel %vm3630_vm4, %v5004_v17, %v5003_v32  ;;  %5673 = vmatpush3.bf16.msra.mxu0 %v5048_v18  ;;  %vm5043_vm0 = vcmask 326656  }
 0xabf   : > { %5006 = vrot.lane.b32.xlu1 %v5005_v19, %s6016_s27  ;;  %v4926_v15 = vrot.slane %v4889_v12, 5  ;;  %v4930_v8 = vrot.slane %v4891_v35, 3  ;;  %v4928_v45 = vrot.slane %v4890_v60, 4 }
 0xac0   : > { %v4923_v34 = vsel %vm3622_vm14, %v4922_v33, %v4886_v16 }
 0xac1   : > { %v4925_v31 = vsel %vm3624_vm15, %v4924_v50, %v4923_v34 }
 0xac2   : > { %v4927_v29 = vsel %vm3626_vm2, %v4926_v15, %v4925_v31 }
 0xac3   : > { %v4929_v11 = vsel %vm3628_vm3, %v4928_v45, %v4927_v29 }
 0xac4   : > { %v4931_v57 = vsel %vm3630_vm4, %v4930_v8, %v4929_v11 }
 0xb14   : > { %v4950_v41 = vpop.permute.xlu0 %4949 }
 0xb15   : > { %v5009_v0 = vsel %vm2734_vm12, %v4931_v57, %v4950_v41 }
 0xb1f   : > { %v4988_v52 = vpop.permute.xlu0 %4987 }
 0xb29   : > { %v4969_v36 = vpop.permute.xlu1 %4968 }
 0xb2a   : > { %v5011_v7 = vsel %vm5010_vm7, %v5009_v0, %v4969_v36 }
 0xb2b   : > { %v5012_v23 = vsel %vm573_vm1, %v5011_v7, %v4988_v52 }
 0xb31   : > { %v5007_v55 = vpop.permute.xlu1 %5006 }
 0xb32   : > { %v5014_v21 = vsel %vm5013_vm8, %v5012_v23, %v5007_v55 }
 0xb33   : > { %v5015_v22 = vpack.c.bf16 %v5014_v21, %v5014_v21 }
 0xb35   : > { %5675 = vmatmul.mubr.msk.bf16.vlgmr.msra.gmra.mrb[28].mxu0 %vm5043_vm0, %v5015_v22 }
 0xc08   : > { %v5084_v38 = vpop.f32.mrb[28].mxu0 }
 0xc09   : > { %v5085_v20 = vadd.f32 %v5341_v59, %v5084_v38  ;;  %v5676_v61 = vpop.f32.mrb[29].mxu0 }
 0xc0a   : > { %v5087_v40 = vpop.f32.mrb[30].mxu0 }
 0xc0b   : > { %5091 = vst.msk [vmem:[%s516_s18] sm:$0x3f] %vm5090_vm9, %v5085_v20  ;;  %v5677_v58 = vpop.f32.mrb[31].mxu0 }
 0xc0c PF: > { %s27_s15 = sadd.s32 1, %s5995_s15  }
 0xc0d   : > { %p24_p5 = scmp.ge.s32.totalorder %s27_s15, 4  }
 0xc0f   :  { %26 = sbr.rel (!%p24_p5) target bundleno = 4 (0x4), region = 166 }
 0xc16   :  { %5111 = vsyncpa [#allocation7], 1 }
 0xc17   :  { %5113 = vsyncpa [#allocation7 + $0x1], 1 }
 0xc18   :  { %5114 = vsyncpa [#allocation9], 1 }

</bundles_post_ra>
